<compile_context>
chip_gen: v6e
topology: v6e:2x2x1
jax: 0.10.0
libtpu: 0.0.40
codegen_flags: <defaults>
</compile_context>

<pallas_src>
import math
from functools import partial

import jax
import jax.numpy as jnp
import numpy as np
from jax.experimental import pallas as pl
from jax.experimental.pallas import tpu as pltpu


def _round_up(x, m):
    return ((x + m - 1) // m) * m


def _pick_block_batch(b, max_bt=8):
    """Largest per-step batch tile that divides b and leaves >= 2 grid steps."""
    best = 1
    for bt in range(1, min(b, max_bt) + 1):
        if b % bt == 0 and b // bt >= 2:
            best = bt
    return best


def _linear_attention_kernel(x_ref, wqkv_ref, wout_ref, bout_ref, gamma_ref,
                             beta_ref, o_ref, *, heads, dim_head, scale, eps,
                             n_valid):
    hidden = heads * dim_head
    bt, c, n = x_ref.shape

    # Shared (per grid step) loads — hoisted out of the per-sample loop.
    w_qkv_t = wqkv_ref[...]          # (c, 3*hidden)  bf16, lane-dense
    w_out = wout_ref[...]            # (c, hidden)    bf16, lane-dense
    bias = bout_ref[...]             # (c, 1)         f32
    gamma = gamma_ref[...]           # (c, 1)         f32
    beta = beta_ref[...]             # (c, 1)         f32
    inv_count = 1.0 / float(c * n_valid)

    # Lane mask only materializes when N had to be padded (static branch).
    lane_mask = None
    if n != n_valid:
        lane_mask = jax.lax.broadcasted_iota(jnp.int32, (1, n), 1) < n_valid

    # bt is a small static tile (<= 8); unroll over samples — softmax and
    # GroupNorm are per-sample anyway, and this keeps every matmul a clean
    # 2-D / head-batched contraction with N on the lane axis.
    for ib in range(bt):
        x = x_ref[ib]                                          # (c, n) bf16

        # to_qkv: 1x1 conv, no bias  ->  (3*hidden, n), accumulate in f32.
        qkv = jnp.einsum('co,cn->on', w_qkv_t, x,
                         preferred_element_type=jnp.float32)

        q = qkv[:hidden].reshape(heads, dim_head, n)
        k = qkv[hidden:2 * hidden].reshape(heads, dim_head, n)
        v = qkv[2 * hidden:].reshape(heads, dim_head, n)

        # softmax over dim_head (d); fold the *scale into the EUP reciprocal.
        qe = jnp.exp(q - jnp.max(q, axis=1, keepdims=True))
        q = qe * (pl.reciprocal(jnp.sum(qe, axis=1, keepdims=True),
                                approx=True) * scale)

        # softmax over spatial (n); ignore padded lanes if any.
        if lane_mask is not None:
            k = jnp.where(lane_mask[None], k, -1e30)
        ke = jnp.exp(k - jnp.max(k, axis=2, keepdims=True))
        k = ke * pl.reciprocal(jnp.sum(ke, axis=2, keepdims=True),
                               approx=True)

        # Linear attention: bf16 MXU operands, f32 accumulation.
        q16 = q.astype(jnp.bfloat16)
        k16 = k.astype(jnp.bfloat16)
        v16 = jnp.swapaxes(v, 1, 2).astype(jnp.bfloat16)       # (h, n, e)
        # context[h,d,e] = sum_n k[h,d,n] * v[h,n,e]  (MXU-native contraction)
        context = jnp.einsum('hdn,hne->hde', k16, v16,
                             preferred_element_type=jnp.float32)
        # attn[h,e,n] = sum_d context[h,d,e] * q[h,d,n]
        attn = jnp.einsum('hde,hdn->hen', context.astype(jnp.bfloat16), q16,
                          preferred_element_type=jnp.float32)
        attn = attn.reshape(hidden, n).astype(jnp.bfloat16)

        # to_out[0]: 1x1 conv with bias  ->  (c, n).
        y = jnp.einsum('ch,hn->cn', w_out, attn,
                       preferred_element_type=jnp.float32) + bias

        # to_out[1]: GroupNorm(1, dim) — single-pass sum / sum-of-squares.
        y_stats = y if lane_mask is None else jnp.where(lane_mask, y, 0.0)
        s1 = jnp.sum(y_stats, axis=(0, 1), keepdims=True)
        s2 = jnp.sum(y_stats * y_stats, axis=(0, 1), keepdims=True)
        mu = s1 * inv_count
        var = s2 * inv_count - mu * mu
        rstd = jax.lax.rsqrt(var + eps)
        a = gamma * rstd                                       # (c, 1)
        o_ref[ib] = y * a + (beta - mu * a)


def linear_attention(x, w_qkv, w_out, b_out, gamma, beta, *, heads=4,
                     dim_head=32, eps=1e-5, max_bt=8):
    b, c, h, w = x.shape
    n = h * w
    hidden = heads * dim_head

    n_pad = _round_up(n, 128)
    x3 = x.reshape(b, c, n)
    if n_pad != n:
        x3 = jnp.pad(x3, ((0, 0), (0, 0), (0, n_pad - n)))

    bt = _pick_block_batch(b, max_bt)          # bt always divides b
    grid = (b // bt,)

    # bf16 operands for the MXU path; accumulation stays f32 in-kernel.
    x3 = x3.astype(jnp.bfloat16)
    w_qkv_t = jnp.transpose(w_qkv).astype(jnp.bfloat16)   # (c, 3*hidden)
    w_out_b = w_out.astype(jnp.bfloat16)                  # (c, hidden)

    kernel = partial(_linear_attention_kernel, heads=heads, dim_head=dim_head,
                     scale=dim_head ** -0.5, eps=eps, n_valid=n)

    # NOTE: for large C / N, halve bt (or tile N) to stay inside v7x's
    # 64 MiB VMEM; intermediates here are already bf16 where possible.
    out = pl.pallas_call(
        kernel,
        out_shape=jax.ShapeDtypeStruct((b, c, n_pad), jnp.float32),
        grid=grid,
        in_specs=[
            pl.BlockSpec((bt, c, n_pad), lambda i: (i, 0, 0)),     # x
            pl.BlockSpec((c, 3 * hidden), lambda i: (0, 0)),       # w_qkv^T
            pl.BlockSpec((c, hidden), lambda i: (0, 0)),           # w_out
            pl.BlockSpec((c, 1), lambda i: (0, 0)),                # b_out
            pl.BlockSpec((c, 1), lambda i: (0, 0)),                # gn gamma
            pl.BlockSpec((c, 1), lambda i: (0, 0)),                # gn beta
        ],
        out_specs=pl.BlockSpec((bt, c, n_pad), lambda i: (i, 0, 0)),
        compiler_params=pltpu.CompilerParams(
            dimension_semantics=("parallel",)),
    )(x3, w_qkv_t, w_out_b, b_out.reshape(c, 1), gamma.reshape(c, 1),
      beta.reshape(c, 1))

    out = out[:, :, :n]
    return out.reshape(b, c, h, w)


def reference(x, w_qkv, w_out, b_out, gamma, beta, *, heads=4, dim_head=32,
              eps=1e-5):
    # Pure-JAX f32 reference mirroring the PyTorch LinearAttention.forward.
    b, c, h, w = x.shape
    n = h * w
    hidden = heads * dim_head
    x3 = x.reshape(b, c, n)
    qkv = jnp.einsum('oc,bcn->bon', w_qkv, x3)
    q, k, v = (t.reshape(b, heads, dim_head, n)
               for t in (qkv[:, :hidden], qkv[:, hidden:2 * hidden],
                         qkv[:, 2 * hidden:]))
    q = jax.nn.softmax(q, axis=2) * dim_head ** -0.5
    k = jax.nn.softmax(k, axis=3)
    context = jnp.einsum('bhdn,bhen->bhde', k, v)
    out = jnp.einsum('bhde,bhdn->bhen', context, q)
    out = out.reshape(b, hidden, n)
    y = jnp.einsum('oc,bcn->bon', w_out, out) + b_out[None, :, None]
    mu = y.mean(axis=(1, 2), keepdims=True)
    var = ((y - mu) ** 2).mean(axis=(1, 2), keepdims=True)
    yn = (y - mu) / jnp.sqrt(var + eps)
    yn = gamma[None, :, None] * yn + beta[None, :, None]
    return yn.reshape(b, c, h, w)


if __name__ == "__main__":
    B, DIM, H, W = 4, 4, 16, 16
    HEADS, DIM_HEAD = 4, 32
    HIDDEN = HEADS * DIM_HEAD

    key = jax.random.PRNGKey(0)
    kx, kq, ko, kb = jax.random.split(key, 4)
    x = jax.random.normal(kx, (B, DIM, H, W), dtype=jnp.float32)
    # Conv2d(dim, 3*hidden, 1, bias=False) weight, squeezed to (out_ch, in_ch).
    w_qkv = jax.random.normal(kq, (3 * HIDDEN, DIM),
                              dtype=jnp.float32) * (1.0 / math.sqrt(DIM))
    # Conv2d(hidden, dim, 1) weight + bias.
    w_out = jax.random.normal(ko, (DIM, HIDDEN),
                              dtype=jnp.float32) * (1.0 / math.sqrt(HIDDEN))
    b_out = jax.random.normal(kb, (DIM,), dtype=jnp.float32) * 0.1
    # GroupNorm(1, dim) affine params (PyTorch init: ones / zeros).
    gamma = jnp.ones((DIM,), dtype=jnp.float32)
    beta = jnp.zeros((DIM,), dtype=jnp.float32)

    out = linear_attention(x, w_qkv, w_out, b_out, gamma, beta,
                           heads=HEADS, dim_head=DIM_HEAD)
    out = jax.block_until_ready(out)

    ref = reference(x, w_qkv, w_out, b_out, gamma, beta,
                    heads=HEADS, dim_head=DIM_HEAD)
    # bf16 MXU operands + approx EUP reciprocals vs. a pure-f32 reference:
    # expect a few % deviation after the GroupNorm rescales to unit variance.
    np.testing.assert_allclose(np.asarray(out), np.asarray(ref),
                               rtol=5e-2, atol=5e-2)
    print("KERNEL_OK")
</pallas_src>

<mosaic_0001>
module attributes {stable_mosaic.version = 11 : i64} {
  func.func @_linear_attention_kernel(%arg0: i32, %arg1: memref<2x4x256xbf16, #tpu.memory_space<vmem>>, %arg2: memref<4x384xbf16, #tpu.memory_space<vmem>>, %arg3: memref<4x128xbf16, #tpu.memory_space<vmem>>, %arg4: memref<4x1xf32, #tpu.memory_space<vmem>>, %arg5: memref<4x1xf32, #tpu.memory_space<vmem>>, %arg6: memref<4x1xf32, #tpu.memory_space<vmem>>, %arg7: memref<2x4x256xf32, #tpu.memory_space<vmem>>) attributes {dimension_semantics = [#tpu.dimension_semantics<parallel>], iteration_bounds = array<i64: 2>, scalar_prefetch = 0 : i64, scratch_operands = 0 : i64, tpu.core_type = #tpu.core_type<tc>, window_params = [{transform_indices = @transform_0, window_bounds = array<i64: 2, 4, 256>}, {pipeline_mode = #tpu.pipeline_mode<synchronous>, transform_indices = @transform_1, window_bounds = array<i64: 4, 384>}, {pipeline_mode = #tpu.pipeline_mode<synchronous>, transform_indices = @transform_2, window_bounds = array<i64: 4, 128>}, {pipeline_mode = #tpu.pipeline_mode<synchronous>, transform_indices = @transform_3, window_bounds = array<i64: 4, 1>}, {pipeline_mode = #tpu.pipeline_mode<synchronous>, transform_indices = @transform_4, window_bounds = array<i64: 4, 1>}, {pipeline_mode = #tpu.pipeline_mode<synchronous>, transform_indices = @transform_5, window_bounds = array<i64: 4, 1>}, {transform_indices = @transform_6, window_bounds = array<i64: 2, 4, 256>}]} {
    %c0 = arith.constant 0 : index
    %c0_0 = arith.constant 0 : index
    %0 = vector.load %arg2[%c0, %c0_0] : memref<4x384xbf16, #tpu.memory_space<vmem>>, vector<4x384xbf16>
    %c0_1 = arith.constant 0 : index
    %c0_2 = arith.constant 0 : index
    %1 = vector.load %arg3[%c0_1, %c0_2] : memref<4x128xbf16, #tpu.memory_space<vmem>>, vector<4x128xbf16>
    %c0_3 = arith.constant 0 : index
    %c0_4 = arith.constant 0 : index
    %2 = vector.load %arg4[%c0_3, %c0_4] : memref<4x1xf32, #tpu.memory_space<vmem>>, vector<4x1xf32>
    %c0_5 = arith.constant 0 : index
    %c0_6 = arith.constant 0 : index
    %3 = vector.load %arg5[%c0_5, %c0_6] : memref<4x1xf32, #tpu.memory_space<vmem>>, vector<4x1xf32>
    %c0_7 = arith.constant 0 : index
    %c0_8 = arith.constant 0 : index
    %4 = vector.load %arg6[%c0_7, %c0_8] : memref<4x1xf32, #tpu.memory_space<vmem>>, vector<4x1xf32>
    %c0_9 = arith.constant 0 : index
    %c0_10 = arith.constant 0 : index
    %c0_11 = arith.constant 0 : index
    %5 = vector.load %arg1[%c0_9, %c0_10, %c0_11] : memref<2x4x256xbf16, #tpu.memory_space<vmem>>, vector<1x4x256xbf16>
    %6 = vector.shape_cast %5 : vector<1x4x256xbf16> to vector<4x256xbf16>
    "tpu.trace_start"() <{level = 10 : i32, message = "co,cn->on"}> : () -> ()
    %cst = arith.constant dense<0.000000e+00> : vector<384x256xf32>
    %7 = tpu.matmul %0, %6, %cst {dimension_numbers = #tpu.dot_dimension_numbers<[0], [0], [1], [1], [0, 1, 1, 1], [], []>} : vector<4x384xbf16>, vector<4x256xbf16>, vector<384x256xf32> -> vector<384x256xf32>
    "tpu.trace_stop"() : () -> ()
    %8 = vector.extract_strided_slice %7 {offsets = [0, 0], sizes = [128, 256], strides = [1, 1]} : vector<384x256xf32> to vector<128x256xf32>
    %9 = vector.shape_cast %8 : vector<128x256xf32> to vector<4x32x256xf32>
    %10 = vector.extract_strided_slice %7 {offsets = [128, 0], sizes = [128, 256], strides = [1, 1]} : vector<384x256xf32> to vector<128x256xf32>
    %11 = vector.shape_cast %10 : vector<128x256xf32> to vector<4x32x256xf32>
    %12 = vector.extract_strided_slice %7 {offsets = [256, 0], sizes = [128, 256], strides = [1, 1]} : vector<384x256xf32> to vector<128x256xf32>
    %13 = vector.shape_cast %12 : vector<128x256xf32> to vector<4x32x256xf32>
    %cst_12 = arith.constant dense<0xFF800000> : vector<4x256xf32>
    %14 = vector.multi_reduction <maximumf>, %9, %cst_12 [1] : vector<4x32x256xf32> to vector<4x256xf32>
    %15 = vector.shape_cast %14 : vector<4x256xf32> to vector<4x1x256xf32>
    %16 = vector.broadcast %15 : vector<4x1x256xf32> to vector<4x32x256xf32>
    %17 = arith.subf %9, %16 : vector<4x32x256xf32>
    %18 = math.exp %17 : vector<4x32x256xf32>
    %cst_13 = arith.constant dense<0.000000e+00> : vector<4x256xf32>
    %19 = vector.multi_reduction <add>, %18, %cst_13 [1] : vector<4x32x256xf32> to vector<4x256xf32>
    %20 = vector.shape_cast %19 : vector<4x256xf32> to vector<4x1x256xf32>
    %21 = tpu.reciprocal %20 {approx = true} : vector<4x1x256xf32> -> vector<4x1x256xf32>
    %cst_14 = arith.constant 0.176776692 : f32
    %22 = vector.broadcast %cst_14 : f32 to vector<4x1x256xf32>
    %23 = arith.mulf %21, %22 : vector<4x1x256xf32>
    %24 = vector.broadcast %23 : vector<4x1x256xf32> to vector<4x32x256xf32>
    %25 = arith.mulf %18, %24 : vector<4x32x256xf32>
    %cst_15 = arith.constant dense<0xFF800000> : vector<4x32xf32>
    %26 = vector.multi_reduction <maximumf>, %11, %cst_15 [2] : vector<4x32x256xf32> to vector<4x32xf32>
    %27 = vector.shape_cast %26 : vector<4x32xf32> to vector<4x32x1xf32>
    %28 = vector.broadcast %27 : vector<4x32x1xf32> to vector<4x32x256xf32>
    %29 = arith.subf %11, %28 : vector<4x32x256xf32>
    %30 = math.exp %29 : vector<4x32x256xf32>
    %cst_16 = arith.constant dense<0.000000e+00> : vector<4x32xf32>
    %31 = vector.multi_reduction <add>, %30, %cst_16 [2] : vector<4x32x256xf32> to vector<4x32xf32>
    %32 = vector.shape_cast %31 : vector<4x32xf32> to vector<4x32x1xf32>
    %33 = tpu.reciprocal %32 {approx = true} : vector<4x32x1xf32> -> vector<4x32x1xf32>
    %34 = vector.broadcast %33 : vector<4x32x1xf32> to vector<4x32x256xf32>
    %35 = arith.mulf %30, %34 : vector<4x32x256xf32>
    %36 = arith.truncf %25 : vector<4x32x256xf32> to vector<4x32x256xbf16>
    %37 = arith.truncf %35 : vector<4x32x256xf32> to vector<4x32x256xbf16>
    %38 = tpu.transpose %13, [0, 2, 1] : vector<4x32x256xf32> -> vector<4x256x32xf32>
    %39 = arith.truncf %38 : vector<4x256x32xf32> to vector<4x256x32xbf16>
    "tpu.trace_start"() <{level = 10 : i32, message = "hdn,hne->hde"}> : () -> ()
    %cst_17 = arith.constant dense<0.000000e+00> : vector<4x32x32xf32>
    %40 = tpu.matmul %37, %39, %cst_17 {dimension_numbers = #tpu.dot_dimension_numbers<[2], [1], [1], [2], [0, 0, 0, 1, 1, 2], [0], [0]>} : vector<4x32x256xbf16>, vector<4x256x32xbf16>, vector<4x32x32xf32> -> vector<4x32x32xf32>
    "tpu.trace_stop"() : () -> ()
    %41 = arith.truncf %40 : vector<4x32x32xf32> to vector<4x32x32xbf16>
    "tpu.trace_start"() <{level = 10 : i32, message = "hde,hdn->hen"}> : () -> ()
    %cst_18 = arith.constant dense<0.000000e+00> : vector<4x32x256xf32>
    %42 = tpu.matmul %41, %36, %cst_18 {dimension_numbers = #tpu.dot_dimension_numbers<[1], [1], [2], [2], [0, 0, 0, 2, 1, 2], [0], [0]>} : vector<4x32x32xbf16>, vector<4x32x256xbf16>, vector<4x32x256xf32> -> vector<4x32x256xf32>
    "tpu.trace_stop"() : () -> ()
    %43 = vector.shape_cast %42 : vector<4x32x256xf32> to vector<128x256xf32>
    %44 = arith.truncf %43 : vector<128x256xf32> to vector<128x256xbf16>
    "tpu.trace_start"() <{level = 10 : i32, message = "ch,hn->cn"}> : () -> ()
    %cst_19 = arith.constant dense<0.000000e+00> : vector<4x256xf32>
    %45 = tpu.matmul %1, %44, %cst_19 {dimension_numbers = #tpu.dot_dimension_numbers<[1], [0], [0], [1], [0, 0, 1, 1], [], []>} : vector<4x128xbf16>, vector<128x256xbf16>, vector<4x256xf32> -> vector<4x256xf32>
    "tpu.trace_stop"() : () -> ()
    %46 = vector.broadcast %2 : vector<4x1xf32> to vector<4x256xf32>
    %47 = arith.addf %45, %46 : vector<4x256xf32>
    %48 = vector.shape_cast %47 : vector<4x256xf32> to vector<1x4x256xf32>
    %cst_20 = arith.constant dense<0.000000e+00> : vector<1xf32>
    %49 = vector.multi_reduction <add>, %48, %cst_20 [1, 2] : vector<1x4x256xf32> to vector<1xf32>
    %50 = vector.shape_cast %49 : vector<1xf32> to vector<1x1x1xf32>
    %51 = vector.extract %50[0, 0, 0] : f32 from vector<1x1x1xf32>
    %52 = vector.broadcast %51 : f32 to vector<1x1xf32>
    %53 = arith.mulf %47, %47 : vector<4x256xf32>
    %54 = vector.shape_cast %53 : vector<4x256xf32> to vector<1x4x256xf32>
    %cst_21 = arith.constant dense<0.000000e+00> : vector<1xf32>
    %55 = vector.multi_reduction <add>, %54, %cst_21 [1, 2] : vector<1x4x256xf32> to vector<1xf32>
    %56 = vector.shape_cast %55 : vector<1xf32> to vector<1x1x1xf32>
    %57 = vector.extract %56[0, 0, 0] : f32 from vector<1x1x1xf32>
    %58 = vector.broadcast %57 : f32 to vector<1x1xf32>
    %cst_22 = arith.constant 9.765625E-4 : f32
    %59 = vector.broadcast %cst_22 : f32 to vector<1x1xf32>
    %60 = arith.mulf %52, %59 : vector<1x1xf32>
    %cst_23 = arith.constant 9.765625E-4 : f32
    %61 = vector.broadcast %cst_23 : f32 to vector<1x1xf32>
    %62 = arith.mulf %58, %61 : vector<1x1xf32>
    %63 = arith.mulf %60, %60 : vector<1x1xf32>
    %64 = arith.subf %62, %63 : vector<1x1xf32>
    %cst_24 = arith.constant 9.99999974E-6 : f32
    %65 = vector.broadcast %cst_24 : f32 to vector<1x1xf32>
    %66 = arith.addf %64, %65 : vector<1x1xf32>
    %67 = math.rsqrt %66 : vector<1x1xf32>
    %68 = vector.broadcast %67 : vector<1x1xf32> to vector<4x1xf32>
    %69 = arith.mulf %3, %68 : vector<4x1xf32>
    %70 = vector.broadcast %69 : vector<4x1xf32> to vector<4x256xf32>
    %71 = arith.mulf %47, %70 : vector<4x256xf32>
    %72 = vector.broadcast %60 : vector<1x1xf32> to vector<4x1xf32>
    %73 = arith.mulf %72, %69 : vector<4x1xf32>
    %74 = arith.subf %4, %73 : vector<4x1xf32>
    %75 = vector.broadcast %74 : vector<4x1xf32> to vector<4x256xf32>
    %76 = arith.addf %71, %75 : vector<4x256xf32>
    %c0_25 = arith.constant 0 : index
    %c0_26 = arith.constant 0 : index
    %c0_27 = arith.constant 0 : index
    %77 = vector.load %arg7[%c0_25, %c0_26, %c0_27] : memref<2x4x256xf32, #tpu.memory_space<vmem>>, vector<1x4x256xf32>
    %78 = vector.shape_cast %77 : vector<1x4x256xf32> to vector<4x256xf32>
    %79 = vector.shape_cast %76 : vector<4x256xf32> to vector<1x4x256xf32>
    tpu.vector_store %arg7[%c0_25, %c0_26, %c0_27], %79 {strides = array<i32>} : memref<2x4x256xf32, #tpu.memory_space<vmem>>, vector<1x4x256xf32>,
    %c1 = arith.constant 1 : index
    %c0_28 = arith.constant 0 : index
    %c0_29 = arith.constant 0 : index
    %80 = vector.load %arg1[%c1, %c0_28, %c0_29] : memref<2x4x256xbf16, #tpu.memory_space<vmem>>, vector<1x4x256xbf16>
    %81 = vector.shape_cast %80 : vector<1x4x256xbf16> to vector<4x256xbf16>
    "tpu.trace_start"() <{level = 10 : i32, message = "co,cn->on"}> : () -> ()
    %cst_30 = arith.constant dense<0.000000e+00> : vector<384x256xf32>
    %82 = tpu.matmul %0, %81, %cst_30 {dimension_numbers = #tpu.dot_dimension_numbers<[0], [0], [1], [1], [0, 1, 1, 1], [], []>} : vector<4x384xbf16>, vector<4x256xbf16>, vector<384x256xf32> -> vector<384x256xf32>
    "tpu.trace_stop"() : () -> ()
    %83 = vector.extract_strided_slice %82 {offsets = [0, 0], sizes = [128, 256], strides = [1, 1]} : vector<384x256xf32> to vector<128x256xf32>
    %84 = vector.shape_cast %83 : vector<128x256xf32> to vector<4x32x256xf32>
    %85 = vector.extract_strided_slice %82 {offsets = [128, 0], sizes = [128, 256], strides = [1, 1]} : vector<384x256xf32> to vector<128x256xf32>
    %86 = vector.shape_cast %85 : vector<128x256xf32> to vector<4x32x256xf32>
    %87 = vector.extract_strided_slice %82 {offsets = [256, 0], sizes = [128, 256], strides = [1, 1]} : vector<384x256xf32> to vector<128x256xf32>
    %88 = vector.shape_cast %87 : vector<128x256xf32> to vector<4x32x256xf32>
    %cst_31 = arith.constant dense<0xFF800000> : vector<4x256xf32>
    %89 = vector.multi_reduction <maximumf>, %84, %cst_31 [1] : vector<4x32x256xf32> to vector<4x256xf32>
    %90 = vector.shape_cast %89 : vector<4x256xf32> to vector<4x1x256xf32>
    %91 = vector.broadcast %90 : vector<4x1x256xf32> to vector<4x32x256xf32>
    %92 = arith.subf %84, %91 : vector<4x32x256xf32>
    %93 = math.exp %92 : vector<4x32x256xf32>
    %cst_32 = arith.constant dense<0.000000e+00> : vector<4x256xf32>
    %94 = vector.multi_reduction <add>, %93, %cst_32 [1] : vector<4x32x256xf32> to vector<4x256xf32>
    %95 = vector.shape_cast %94 : vector<4x256xf32> to vector<4x1x256xf32>
    %96 = tpu.reciprocal %95 {approx = true} : vector<4x1x256xf32> -> vector<4x1x256xf32>
    %cst_33 = arith.constant 0.176776692 : f32
    %97 = vector.broadcast %cst_33 : f32 to vector<4x1x256xf32>
    %98 = arith.mulf %96, %97 : vector<4x1x256xf32>
    %99 = vector.broadcast %98 : vector<4x1x256xf32> to vector<4x32x256xf32>
    %100 = arith.mulf %93, %99 : vector<4x32x256xf32>
    %cst_34 = arith.constant dense<0xFF800000> : vector<4x32xf32>
    %101 = vector.multi_reduction <maximumf>, %86, %cst_34 [2] : vector<4x32x256xf32> to vector<4x32xf32>
    %102 = vector.shape_cast %101 : vector<4x32xf32> to vector<4x32x1xf32>
    %103 = vector.broadcast %102 : vector<4x32x1xf32> to vector<4x32x256xf32>
    %104 = arith.subf %86, %103 : vector<4x32x256xf32>
    %105 = math.exp %104 : vector<4x32x256xf32>
    %cst_35 = arith.constant dense<0.000000e+00> : vector<4x32xf32>
    %106 = vector.multi_reduction <add>, %105, %cst_35 [2] : vector<4x32x256xf32> to vector<4x32xf32>
    %107 = vector.shape_cast %106 : vector<4x32xf32> to vector<4x32x1xf32>
    %108 = tpu.reciprocal %107 {approx = true} : vector<4x32x1xf32> -> vector<4x32x1xf32>
    %109 = vector.broadcast %108 : vector<4x32x1xf32> to vector<4x32x256xf32>
    %110 = arith.mulf %105, %109 : vector<4x32x256xf32>
    %111 = arith.truncf %100 : vector<4x32x256xf32> to vector<4x32x256xbf16>
    %112 = arith.truncf %110 : vector<4x32x256xf32> to vector<4x32x256xbf16>
    %113 = tpu.transpose %88, [0, 2, 1] : vector<4x32x256xf32> -> vector<4x256x32xf32>
    %114 = arith.truncf %113 : vector<4x256x32xf32> to vector<4x256x32xbf16>
    "tpu.trace_start"() <{level = 10 : i32, message = "hdn,hne->hde"}> : () -> ()
    %cst_36 = arith.constant dense<0.000000e+00> : vector<4x32x32xf32>
    %115 = tpu.matmul %112, %114, %cst_36 {dimension_numbers = #tpu.dot_dimension_numbers<[2], [1], [1], [2], [0, 0, 0, 1, 1, 2], [0], [0]>} : vector<4x32x256xbf16>, vector<4x256x32xbf16>, vector<4x32x32xf32> -> vector<4x32x32xf32>
    "tpu.trace_stop"() : () -> ()
    %116 = arith.truncf %115 : vector<4x32x32xf32> to vector<4x32x32xbf16>
    "tpu.trace_start"() <{level = 10 : i32, message = "hde,hdn->hen"}> : () -> ()
    %cst_37 = arith.constant dense<0.000000e+00> : vector<4x32x256xf32>
    %117 = tpu.matmul %116, %111, %cst_37 {dimension_numbers = #tpu.dot_dimension_numbers<[1], [1], [2], [2], [0, 0, 0, 2, 1, 2], [0], [0]>} : vector<4x32x32xbf16>, vector<4x32x256xbf16>, vector<4x32x256xf32> -> vector<4x32x256xf32>
    "tpu.trace_stop"() : () -> ()
    %118 = vector.shape_cast %117 : vector<4x32x256xf32> to vector<128x256xf32>
    %119 = arith.truncf %118 : vector<128x256xf32> to vector<128x256xbf16>
    "tpu.trace_start"() <{level = 10 : i32, message = "ch,hn->cn"}> : () -> ()
    %cst_38 = arith.constant dense<0.000000e+00> : vector<4x256xf32>
    %120 = tpu.matmul %1, %119, %cst_38 {dimension_numbers = #tpu.dot_dimension_numbers<[1], [0], [0], [1], [0, 0, 1, 1], [], []>} : vector<4x128xbf16>, vector<128x256xbf16>, vector<4x256xf32> -> vector<4x256xf32>
    "tpu.trace_stop"() : () -> ()
    %121 = vector.broadcast %2 : vector<4x1xf32> to vector<4x256xf32>
    %122 = arith.addf %120, %121 : vector<4x256xf32>
    %123 = vector.shape_cast %122 : vector<4x256xf32> to vector<1x4x256xf32>
    %cst_39 = arith.constant dense<0.000000e+00> : vector<1xf32>
    %124 = vector.multi_reduction <add>, %123, %cst_39 [1, 2] : vector<1x4x256xf32> to vector<1xf32>
    %125 = vector.shape_cast %124 : vector<1xf32> to vector<1x1x1xf32>
    %126 = vector.extract %125[0, 0, 0] : f32 from vector<1x1x1xf32>
    %127 = vector.broadcast %126 : f32 to vector<1x1xf32>
    %128 = arith.mulf %122, %122 : vector<4x256xf32>
    %129 = vector.shape_cast %128 : vector<4x256xf32> to vector<1x4x256xf32>
    %cst_40 = arith.constant dense<0.000000e+00> : vector<1xf32>
    %130 = vector.multi_reduction <add>, %129, %cst_40 [1, 2] : vector<1x4x256xf32> to vector<1xf32>
    %131 = vector.shape_cast %130 : vector<1xf32> to vector<1x1x1xf32>
    %132 = vector.extract %131[0, 0, 0] : f32 from vector<1x1x1xf32>
    %133 = vector.broadcast %132 : f32 to vector<1x1xf32>
    %cst_41 = arith.constant 9.765625E-4 : f32
    %134 = vector.broadcast %cst_41 : f32 to vector<1x1xf32>
    %135 = arith.mulf %127, %134 : vector<1x1xf32>
    %cst_42 = arith.constant 9.765625E-4 : f32
    %136 = vector.broadcast %cst_42 : f32 to vector<1x1xf32>
    %137 = arith.mulf %133, %136 : vector<1x1xf32>
    %138 = arith.mulf %135, %135 : vector<1x1xf32>
    %139 = arith.subf %137, %138 : vector<1x1xf32>
    %cst_43 = arith.constant 9.99999974E-6 : f32
    %140 = vector.broadcast %cst_43 : f32 to vector<1x1xf32>
    %141 = arith.addf %139, %140 : vector<1x1xf32>
    %142 = math.rsqrt %141 : vector<1x1xf32>
    %143 = vector.broadcast %142 : vector<1x1xf32> to vector<4x1xf32>
    %144 = arith.mulf %3, %143 : vector<4x1xf32>
    %145 = vector.broadcast %144 : vector<4x1xf32> to vector<4x256xf32>
    %146 = arith.mulf %122, %145 : vector<4x256xf32>
    %147 = vector.broadcast %135 : vector<1x1xf32> to vector<4x1xf32>
    %148 = arith.mulf %147, %144 : vector<4x1xf32>
    %149 = arith.subf %4, %148 : vector<4x1xf32>
    %150 = vector.broadcast %149 : vector<4x1xf32> to vector<4x256xf32>
    %151 = arith.addf %146, %150 : vector<4x256xf32>
    %c1_44 = arith.constant 1 : index
    %c0_45 = arith.constant 0 : index
    %c0_46 = arith.constant 0 : index
    %152 = vector.load %arg7[%c1_44, %c0_45, %c0_46] : memref<2x4x256xf32, #tpu.memory_space<vmem>>, vector<1x4x256xf32>
    %153 = vector.shape_cast %152 : vector<1x4x256xf32> to vector<4x256xf32>
    %154 = vector.shape_cast %151 : vector<4x256xf32> to vector<1x4x256xf32>
    tpu.vector_store %arg7[%c1_44, %c0_45, %c0_46], %154 {strides = array<i32>} : memref<2x4x256xf32, #tpu.memory_space<vmem>>, vector<1x4x256xf32>,
    return
  }
  func.func @transform_0(%arg0: i32) -> (i32, i32, i32) {
    %c0_i32 = arith.constant 0 : i32
    %c0_i32_0 = arith.constant 0 : i32
    %c0_i32_1 = arith.constant 0 : i32
    return %arg0, %c0_i32, %c0_i32_0 : i32, i32, i32
  }
  func.func @transform_1(%arg0: i32) -> (i32, i32) {
    %c0_i32 = arith.constant 0 : i32
    %c0_i32_0 = arith.constant 0 : i32
    %c0_i32_1 = arith.constant 0 : i32
    return %c0_i32, %c0_i32_0 : i32, i32
  }
  func.func @transform_2(%arg0: i32) -> (i32, i32) {
    %c0_i32 = arith.constant 0 : i32
    %c0_i32_0 = arith.constant 0 : i32
    %c0_i32_1 = arith.constant 0 : i32
    return %c0_i32, %c0_i32_0 : i32, i32
  }
  func.func @transform_3(%arg0: i32) -> (i32, i32) {
    %c0_i32 = arith.constant 0 : i32
    %c0_i32_0 = arith.constant 0 : i32
    %c0_i32_1 = arith.constant 0 : i32
    return %c0_i32, %c0_i32_0 : i32, i32
  }
  func.func @transform_4(%arg0: i32) -> (i32, i32) {
    %c0_i32 = arith.constant 0 : i32
    %c0_i32_0 = arith.constant 0 : i32
    %c0_i32_1 = arith.constant 0 : i32
    return %c0_i32, %c0_i32_0 : i32, i32
  }
  func.func @transform_5(%arg0: i32) -> (i32, i32) {
    %c0_i32 = arith.constant 0 : i32
    %c0_i32_0 = arith.constant 0 : i32
    %c0_i32_1 = arith.constant 0 : i32
    return %c0_i32, %c0_i32_0 : i32, i32
  }
  func.func @transform_6(%arg0: i32) -> (i32, i32, i32) {
    %c0_i32 = arith.constant 0 : i32
    %c0_i32_0 = arith.constant 0 : i32
    %c0_i32_1 = arith.constant 0 : i32
    return %arg0, %c0_i32, %c0_i32_0 : i32, i32, i32
  }
}

</mosaic_0001>

<bundles_post_ra>
// kernel: tpu_custom_call.1
= control target key start
LH: loop header
LB: loop body
LE: loop exit
PB: predicated region body
PF: predicated region fallthrough
CT: control target
= control target key end

     0   :  { %11 = vsyncpa [#allocation3], 0  ;;  %s7785_s0 = inlined_call_operand.hbm [shape: bf16[4,4,256], index: 0, kind: input, shape index: {}]   ;;  %s7786_s1 = inlined_call_operand.vmem [shape: bf16[4,384], index: 1, kind: input, shape index: {}]   ;;  %s7787_s2 = inlined_call_operand.vmem [shape: bf16[4,128], index: 2, kind: input, shape index: {}]   ;;  %s7788_s3 = inlined_call_operand.vmem [shape: f32[4,1], index: 3, kind: input, shape index: {}]   ;;  %s7789_s4 = inlined_call_operand.vmem [shape: f32[4,1], index: 4, kind: input, shape index: {}]   ;;  %s7790_s5 = inlined_call_operand.vmem [shape: f32[4,1], index: 5, kind: input, shape index: {}]   ;;  %s7791_s6 = inlined_call_operand.hbm [shape: f32[4,4,256], index: 6, kind: output, shape index: {}]  }
   0x1   :  { %13 = vsyncpa [#allocation3 + $0x1], 0 }
   0x2   :  { %14 = vsyncpa [#allocation4], 0 }
   0x3   :  { %16 = vsyncpa [#allocation4 + $0x1], 0  ;;  %s5666_s21 = smov 0   ;;  %s5668_s22 = smov 0  }
   0x4   :  { %s5670_s23 = smov 0   ;;  %s5672_s24 = smov 0  }
   0x5 LB: > { %s5687_s25 = sadd.s32 4294967295, %s5621_s24   ;;  %s4090_s26 = sadd.s32 4294967294, %s5621_s24   ;;  %s5621_s24 = sphi %s5672_s24, %s8196_s24   ;;  %s5617_s23 = sphi %s5670_s23, %s8195_s23   ;;  %s5613_s22 = sphi %s5668_s22, %s8194_s22   ;;  %s5609_s21 = sphi %s5666_s21, %s8193_s21  }
   0x6   : > { %s5691_s27 = sadd.s32 1, %s5621_s24   ;;  %s29_s28 = sadd.s32 1, %s5617_s23 }
   0x7   : > { %s26_s29 = ssub.s32 %s5621_s24, %s5691_s27  ;;  %p36_p0 = scmp.ne.s32.totalorder %s5617_s23, %s5613_s22 }
   0x8   : > { %p27_p1 = scmp.eq.s32.totalorder %s26_s29, 0  ;;  %p37_p2 = scmp.eq.s32.totalorder %s5621_s24, 0 }
   0x9   : > { %p42_p3 = scmp.ne.s32.totalorder %s5613_s22, %s5609_s21  ;;  %p43_p4 = scmp.eq.s32.totalorder %s5687_s25, 0 }
   0xa   : > { %s5703_s30 = scalar_select %p27_p1, %s5617_s23, %s29_s28  }
   0xb   : > { %p5705_p5 = por %p37_p2, %p36_p0  ;;  %p5709_p6 = por %p43_p4, %p42_p3 }
   0xc   : > { %p171_p7 = scmp.eq.s32.totalorder %s5687_s25, 1  ;;  %p177_p8 = scmp.eq.s32.totalorder %s4090_s26, 1 }
   0xd   : > { %s7913_s8 = scalar_select %p5709_p6, 1, 0 }
   0xe   : > { %p4424_p10 = scmp.lt.s32.totalorder %s5621_s24, 2  ;;  %p5716_p11 = por %p171_p7, %p36_p0 }
   0xf   : > { %p5720_p12 = por %p177_p8, %p42_p3  ;;  %s212_s11 = sand.u32 1, %s5617_s23  }
  0x10   : > { %s7914_s9 = scalar_select %p5716_p11, 1, 0 }
  0x11   : > { %s7915_s10 = scalar_select %p5720_p12, 1, 0 }
  0x12   : > { %s4177_s12 = sshll.u32 %s5621_s24, 7  ;;  %s4093_s13 = sshll.u32 %s212_s11, 3 }
  0x13   : > { %s5729_s16 = scalar_lea.hbm %s7785_s0, %s4177_s12  ;;  %s216_s17 = scalar_lea.vmem [#allocation2], %s4093_s13 }
  0x14   : > { %s224_s18 = sshll.u32 %s216_s17, 4  ;;  %p5733_p13 = pnand %p4424_p10, %p5705_p5  ;;  %s5737_s18 = int_to_ptr.vmem [resolvable:$true] %s224_s18 }
  0x15   : > { %s5739_s20 = scalar_lea.sflag [#allocation3], %s212_s11  ;;  %s5529_s26 = scalar_lea.hbm %s5729_s16, 128 }
  0x16   : > { %p5530_p0 = scmp.ne.s32.totalorder %s5729_s16, %s5529_s26  ;;  %p5531_p1 = pneg %p5733_p13 }
  0x17   : > { %s5534_s12 = scalar_lea.hbm %s7785_s0, 256  ;;  %p5535_p4 = scmp.lt.s32.totalorder %s5729_s16, %s7785_s0 }
  0x18   : > { %p5532_p2 = pnand %p5531_p1, %p5530_p0  ;;  %p5536_p5 = scmp.lt.s32.totalorder %s5534_s12, %s5529_s26 }
  0x1a   : > { %p5533_p3 = pneg %p5532_p2  ;;  %p5537_p7 = por %p5536_p5, %p5535_p4 }
  0x1c   : > { %p5538_p8 = pnand %p5537_p7, %p5533_p3 }
  0x1e   : > { %5541 = shalt.err (!%p5538_p8)
}
  0x1f   : > { %s5542_s11 = scalar_lea.vmem %s5737_s18, 128  ;;  %s5623_s14 = smov [#allocation2]  }
  0x20   : > { %p5543_p10 = scmp.ne.s32.totalorder %s5737_s18, %s5542_s11  ;;  %s5547_s15 = sshll.u32 %s5623_s14, 4  ;;  %s5548_s15 = int_to_ptr.vmem [resolvable:$false] %s5547_s15 }
  0x21   : > { %s5549_s17 = scalar_lea.vmem %s5548_s15, 256  ;;  %p5550_p2 = scmp.lt.s32.totalorder %s5737_s18, %s5548_s15 }
  0x22   : > { %p5545_p9 = pnand %p5543_p10, %p5531_p1  ;;  %p5551_p12 = scmp.lt.s32.totalorder %s5549_s17, %s5542_s11 }
  0x24   : > { %p5546_p0 = pneg %p5545_p9  ;;  %p5552_p11 = por %p5551_p12, %p5550_p2 }
  0x26   : > { %p5553_p6 = pnand %p5552_p11, %p5546_p0 }
  0x28   : > { %5556 = shalt.err (!%p5553_p6)
}
  0x29   : > { %s5624_s26 = smov 64   ;;  %s5625_s28 = smov 4  }
  0x2a   : > { %4419 = dma.hbm_to_vmem [thread:$0]  (!%p5733_p13), %s5729_s16, 128, %s5737_s18, %s5739_s20, %s5624_s26, %s5624_s26, %s5625_s28  }
  0x2b   : > { %p4097_p9 = scmp.ge.s32.totalorder %s5621_s24, 1  ;;  %p232_p1 = scmp.lt.s32.totalorder %s5621_s24, 3 }
  0x2d   : > { %p233_p3 = pnand %p4097_p9, %p232_p1 }
  0x2f   : > { %236 = sbr.rel (%p233_p3) target bundleno = 3458 (0xd82), region = 44 }
  0x34   : > { %s5763_s29 = sand.u32 1, %s5613_s22   ;;  %p7917_p6 = scmp.ne.s32.totalorder %s7913_s8, 0 }
  0x35   : > { %s4098_s12 = sshll.u32 %s5763_s29, 3  ;;  %s239_s7 = scalar_lea.sflag [#allocation3], %s5763_s29 }
  0x36   : > { %s5767_s13 = scalar_lea.vmem [#allocation2], %s4098_s12 }
  0x37   : > { %5600 = dma.done.wait (%p7917_p6), %s239_s7, 128  }
  0x38   : > { %5602 = vsyncadd (%p7917_p6), %s239_s7, 4294967168  ;;  %v285_v0 = vlaneseq  ;;  %v5626_v1 = vmov 1983009808   ;;  %v7794_v3 = vmov 0   ;;  %vm430_vm0 = vcmask 1041408   ;;  %s4099_s16 = sshll.u32 %s5763_s29, 4 }
  0x39   : > { %v283_v2 = vunpack.c.l.s4 %v5626_v1  ;;  %469 = vmatprep.mubr.bf16.mxu0 %v7794_v3  ;;  %v274_v7 = vld [vmem:[%s7786_s1] sm:$0x3f]  ;;  %vm357_vm1 = vcmask 31744   ;;  %vm1810_vm2 = vcmask 261120   ;;  %vm2157_vm3 = vcmask 1043456   ;;  %s7729_s18 = scalar_lea.vmem [#allocation5], %s4099_s16 }
  0x3a   : > { %v286_v4 = vshrl.u32 %v285_v0, 7  ;;  %v4100_v8 = vld.sshfl [vmem:[%s5767_s13] sm:$0x33 pattern:$0x76325410]  ;;  %v281_v12 = vcombine.high %v274_v7, %v274_v7  ;;  %s4017_s20 = sshll.u32 %s7729_s18, 4  ;;  %s7736_s20 = int_to_ptr.vmem [resolvable:$true] %s4017_s20 }
  0x3b   : > { %v284_v5 = vunpack.c.0.s8 %v283_v2  ;;  %v356_v10 = vcombine.high %v4100_v8, %v4100_v8  ;;  %v432_v11 = vsel %vm430_vm0, %v4100_v8, 0  ;;  %s4179_s11 = sshll.u32 %s5687_s25, 8  ;;  %s5557_s28 = scalar_lea.vmem %s7736_s20, 256 }
  0x3c   : > { %p5558_p11 = scmp.ne.s32.totalorder %s7736_s20, %s5557_s28  ;;  %p8190_p12 = scmp.ne.s32.totalorder %s7914_s9, 0 }
  0x3d   : > { %v287_v6 = vsub.s32 %v284_v5, %v286_v4  ;;  %4101 = vmatprep.subr.msk.bf16.mxu0 %vm430_vm0, %v356_v10  ;;  %s5628_s25 = smov [#allocation5]  }
  0x3e   : > { %452 = vmatpush1.bf16.msra.mxu0 %v432_v11  ;;  %p5559_p13 = pnand %p5558_p11, %p8190_p12  ;;  %s5561_s12 = sshll.u32 %s5628_s25, 4  ;;  %s5562_s12 = int_to_ptr.vmem [resolvable:$false] %s5561_s12 }
  0x3f   : > { %v288_v9 = vrot.slane %v274_v7, %v287_v6  ;;  %v295_v13 = vrot.slane %v281_v12, %v287_v6  ;;  %s5563_s7 = scalar_lea.vmem %s5562_s12, 512  ;;  %p5564_p5 = scmp.lt.s32.totalorder %s7736_s20, %s5562_s12 }
  0x40   : > { %p5560_p4 = pneg %p5559_p13  ;;  %p5565_p7 = scmp.lt.s32.totalorder %s5563_s7, %s5557_s28 }
  0x41   : > { %300 = vxpose.xlu0.c.b16.start.end [1/1] (short) %v288_v9, 128  ;;  %332 = vxpose.xlu1.c.b16.start.end [1/1] (short) %v295_v13, 128  ;;  %v296_v14 = vcombine.high %v288_v9, %v288_v9 }
  0x42   : > { %p5566_p8 = por %p5565_p7, %p5564_p5 }
  0x44   : > { %p5567_p10 = pnand %p5566_p8, %p5560_p4 }
  0x5e   : > { %316 = vxpose.xlu0.c.b16.start.end [1/1] (short) %v296_v14, 128 }
  0xa3   : > { %v5780_v15 = vpop.trf.xlu0  ;;  %v5860_v31 = vpop.trf.xlu1 }
  0xa4   : > { %7918 = vst [vmem:[#allocation8_spill] sm:$0xff] %v5780_v15  ;;  %4102 = vmatmul.mubr.msk.bf16.vlgmr.msra.gmra.mxu0 %vm357_vm1, %v5780_v15  ;;  %7934 = vst [vmem:[#allocation24_spill] sm:$0xff] %v5860_v31 }
  0xa5   : > { %479 = vmatprep.mubr.bf16.mxu0 %v7794_v3 }
  0xa7   : > { %v5785_v16 = vpop.trf.xlu0  ;;  %v5865_v32 = vpop.trf.xlu1 }
  0xa8   : > { %7919 = vst [vmem:[#allocation9_spill] sm:$0xff] %v5785_v16  ;;  %7935 = vst [vmem:[#allocation25_spill] sm:$0xff] %v5865_v32 }
  0xab   : > { %v5790_v17 = vpop.trf.xlu0  ;;  %v5870_v33 = vpop.trf.xlu1 }
  0xac   : > { %4103 = vmatmul.mubr.msk.bf16.gmra.mxu0 %vm357_vm1, %v5785_v16  ;;  %7920 = vst [vmem:[#allocation10_spill] sm:$0xff] %v5790_v17  ;;  %7936 = vst [vmem:[#allocation26_spill] sm:$0xff] %v5870_v33 }
  0xad   : > { %489 = vmatprep.mubr.bf16.mxu0 %v7794_v3 }
  0xaf   : > { %v5795_v18 = vpop.trf.xlu0  ;;  %v5875_v34 = vpop.trf.xlu1 }
  0xb0   : > { %7921 = vst [vmem:[#allocation11_spill] sm:$0xff] %v5795_v18  ;;  %7937 = vst [vmem:[#allocation27_spill] sm:$0xff] %v5875_v34 }
  0xb3   : > { %v5800_v19 = vpop.trf.xlu0  ;;  %v5880_v35 = vpop.trf.xlu1 }
  0xb4   : > { %4104 = vmatmul.mubr.msk.bf16.gmra.mxu0 %vm357_vm1, %v5790_v17  ;;  %7922 = vst [vmem:[#allocation12_spill] sm:$0xff] %v5800_v19  ;;  %7938 = vst [vmem:[#allocation28_spill] sm:$0xff] %v5880_v35 }
  0xb5   : > { %499 = vmatprep.mubr.bf16.mxu0 %v7794_v3 }
  0xb7   : > { %v5805_v20 = vpop.trf.xlu0  ;;  %v5885_v36 = vpop.trf.xlu1 }
  0xb8   : > { %7923 = vst [vmem:[#allocation13_spill] sm:$0xff] %v5805_v20  ;;  %7939 = vst [vmem:[#allocation29_spill] sm:$0xff] %v5885_v36 }
  0xbb   : > { %v5810_v21 = vpop.trf.xlu0  ;;  %v5892_v55 = vpop.trf.xlu1 }
  0xbc   : > { %4105 = vmatmul.mubr.msk.bf16.gmra.mxu0 %vm357_vm1, %v5795_v18  ;;  %7924 = vst [vmem:[#allocation14_spill] sm:$0xff] %v5810_v21  ;;  %7940 = vst [vmem:[#allocation30_spill] sm:$0xff] %v5892_v55 }
  0xbd   : > { %509 = vmatprep.mubr.bf16.mxu0 %v7794_v3 }
  0xbf   : > { %v5815_v22 = vpop.trf.xlu0  ;;  %v5905_v2 = vpop.trf.xlu1 }
  0xc0   : > { %7925 = vst [vmem:[#allocation15_spill] sm:$0xff] %v5815_v22  ;;  %7941 = vst [vmem:[#allocation31_spill] sm:$0xff] %v5905_v2 }
  0xc3   : > { %v5820_v23 = vpop.trf.xlu0 }
  0xc4   : > { %4106 = vmatmul.mubr.msk.bf16.gmra.mxu0 %vm357_vm1, %v5800_v19  ;;  %7926 = vst [vmem:[#allocation16_spill] sm:$0xff] %v5820_v23 }
  0xc5   : > { %519 = vmatprep.mubr.bf16.mxu0 %v7794_v3 }
  0xc7   : > { %v5825_v24 = vpop.trf.xlu0 }
  0xc8   : > { %7927 = vst [vmem:[#allocation17_spill] sm:$0xff] %v5825_v24 }
  0xcb   : > { %v5830_v25 = vpop.trf.xlu0 }
  0xcc   : > { %4107 = vmatmul.mubr.msk.bf16.gmra.mxu0 %vm357_vm1, %v5805_v20  ;;  %7928 = vst [vmem:[#allocation18_spill] sm:$0xff] %v5830_v25 }
  0xcd   : > { %529 = vmatprep.mubr.bf16.mxu0 %v7794_v3 }
  0xcf   : > { %v5835_v26 = vpop.trf.xlu0 }
  0xd0   : > { %7929 = vst [vmem:[#allocation19_spill] sm:$0xff] %v5835_v26 }
  0xd3   : > { %v5840_v27 = vpop.trf.xlu0 }
  0xd4   : > { %4108 = vmatmul.mubr.msk.bf16.gmra.mxu0 %vm357_vm1, %v5810_v21  ;;  %7930 = vst [vmem:[#allocation20_spill] sm:$0xff] %v5840_v27 }
  0xd5   : > { %539 = vmatprep.mubr.bf16.mxu0 %v7794_v3 }
  0xd7   : > { %v5845_v28 = vpop.trf.xlu0 }
  0xd8   : > { %7931 = vst [vmem:[#allocation21_spill] sm:$0xff] %v5845_v28 }
  0xdb   : > { %v5850_v29 = vpop.trf.xlu0 }
  0xdc   : > { %4109 = vmatmul.mubr.msk.bf16.gmra.mxu0 %vm357_vm1, %v5815_v22  ;;  %7932 = vst [vmem:[#allocation22_spill] sm:$0xff] %v5850_v29 }
  0xdd   : > { %549 = vmatprep.mubr.bf16.mxu0 %v7794_v3 }
  0xdf   : > { %v5855_v30 = vpop.trf.xlu0 }
  0xe0   : > { %7933 = vst [vmem:[#allocation23_spill] sm:$0xff] %v5855_v30 }
  0xe4   : > { %4110 = vmatmul.mubr.msk.bf16.gmra.mxu0 %vm357_vm1, %v5820_v23 }
  0xe5   : > { %559 = vmatprep.mubr.bf16.mxu0 %v7794_v3 }
  0xec   : > { %4111 = vmatmul.mubr.msk.bf16.gmra.mxu0 %vm357_vm1, %v5825_v24 }
  0xed   : > { %569 = vmatprep.mubr.bf16.mxu0 %v7794_v3 }
  0xf4   : > { %4112 = vmatmul.mubr.msk.bf16.gmra.mxu0 %vm357_vm1, %v5830_v25 }
  0xf5   : > { %579 = vmatprep.mubr.bf16.mxu0 %v7794_v3 }
  0xfc   : > { %4113 = vmatmul.mubr.msk.bf16.gmra.mxu0 %vm357_vm1, %v5835_v26 }
  0xfd   : > { %589 = vmatprep.mubr.bf16.mxu0 %v7794_v3 }
 0x104   : > { %4114 = vmatmul.mubr.msk.bf16.gmra.mxu0 %vm357_vm1, %v5840_v27 }
 0x105   : > { %599 = vmatprep.mubr.bf16.mxu0 %v7794_v3 }
 0x10c   : > { %4115 = vmatmul.mubr.msk.bf16.gmra.mxu0 %vm357_vm1, %v5845_v28 }
 0x10d   : > { %609 = vmatprep.mubr.bf16.mxu0 %v7794_v3 }
 0x114   : > { %4116 = vmatmul.mubr.msk.bf16.gmra.mxu0 %vm357_vm1, %v5850_v29 }
 0x115   : > { %619 = vmatprep.mubr.bf16.mxu0 %v7794_v3 }
 0x11c   : > { %4117 = vmatmul.mubr.msk.bf16.gmra.mxu0 %vm357_vm1, %v5855_v30 }
 0x11d   : > { %629 = vmatprep.mubr.bf16.mxu0 %v7794_v3 }
 0x124   : > { %4118 = vmatmul.mubr.msk.bf16.gmra.mxu0 %vm357_vm1, %v5860_v31 }
 0x125   : > { %639 = vmatprep.mubr.bf16.mxu0 %v7794_v3 }
 0x12c   : > { %4119 = vmatmul.mubr.msk.bf16.gmra.mxu0 %vm357_vm1, %v5865_v32 }
 0x12d   : > { %649 = vmatprep.mubr.bf16.mxu0 %v7794_v3 }
 0x134   : > { %4120 = vmatmul.mubr.msk.bf16.gmra.mxu0 %vm357_vm1, %v5870_v33 }
 0x135   : > { %659 = vmatprep.mubr.bf16.mxu0 %v7794_v3 }
 0x13c   : > { %4121 = vmatmul.mubr.msk.bf16.gmra.mxu0 %vm357_vm1, %v5875_v34 }
 0x13d   : > { %669 = vmatprep.mubr.bf16.mxu0 %v7794_v3 }
 0x144   : > { %4122 = vmatmul.mubr.msk.bf16.gmra.mxu0 %vm357_vm1, %v5880_v35 }
 0x145   : > { %679 = vmatprep.mubr.bf16.mxu0 %v7794_v3 }
 0x14c   : > { %4123 = vmatmul.mubr.msk.bf16.gmra.mxu0 %vm357_vm1, %v5885_v36 }
 0x14d   : > { %689 = vmatprep.mubr.bf16.mxu0 %v7794_v3 }
 0x154   : > { %4124 = vmatmul.mubr.msk.bf16.gmra.mxu0 %vm357_vm1, %v5892_v55 }
 0x155   : > { %699 = vmatprep.mubr.bf16.mxu0 %v7794_v3 }
 0x15c   : > { %4125 = vmatmul.mubr.msk.bf16.gmra.mxu0 %vm357_vm1, %v5905_v2 }
 0x15d   : > { %2148 = vmatprep.mubr.bf16.mxu0 %v7794_v3 }
 0x164   : > { %v471_v37 = vpop.f32.mrf.mxu0 }
 0x166   : > { %v473_v38 = vpop.f32.mrf.mxu0 }
 0x168   : > { %v475_v39 = vpop.f32.mrf.mxu0 }
 0x169   : > { %v710_v40 = vmax.f32 %v471_v37, %v475_v39 }
 0x16a   : > { %v477_v41 = vpop.f32.mrf.mxu0 }
 0x16b   : > { %v719_v43 = vmax.f32 %v473_v38, %v477_v41 }
 0x16c   : > { %v481_v42 = vpop.f32.mrf.mxu0 }
 0x16d   : > { %v711_v44 = vmax.f32 %v710_v40, %v481_v42 }
 0x16e   : > { %v483_v45 = vpop.f32.mrf.mxu0 }
 0x16f   : > { %v720_v46 = vmax.f32 %v719_v43, %v483_v45 }
 0x170   : > { %v485_v47 = vpop.f32.mrf.mxu0 }
 0x171   : > { %v712_v48 = vmax.f32 %v711_v44, %v485_v47 }
 0x172   : > { %v487_v49 = vpop.f32.mrf.mxu0 }
 0x173   : > { %v713_v50 = vrot.slane %v712_v48, 4  ;;  %v721_v51 = vmax.f32 %v720_v46, %v487_v49 }
 0x174   : > { %v5890_v52 = vpop.f32.mrf.mxu0 }
 0x175   : > { %v714_v53 = vmax.f32 %v712_v48, %v713_v50  ;;  %v722_v54 = vrot.slane %v721_v51, 4 }
 0x176   : > { %v5894_v56 = vpop.f32.mrf.mxu0 }
 0x177   : > { %v715_v57 = vrot.slane %v714_v53, 2  ;;  %v723_v58 = vmax.f32 %v721_v51, %v722_v54 }
 0x178   : > { %v5899_v59 = vpop.f32.mrf.mxu0 }
 0x179   : > { %v716_v60 = vmax.f32 %v714_v53, %v715_v57  ;;  %v724_v61 = vrot.slane %v723_v58, 2  ;;  %v728_v62 = vmax.f32 %v5890_v52, %v5899_v59 }
 0x17a   : > { %v5903_v63 = vpop.f32.mrf.mxu0 }
 0x17b   : > { %v717_v0 = vrot.slane %v716_v60, 1  ;;  %v725_v1 = vmax.f32 %v723_v58, %v724_v61  ;;  %v737_v8 = vmax.f32 %v5894_v56, %v5903_v63 }
 0x17c   : > { %v5907_v4 = vpop.f32.mrf.mxu0 }
 0x17d   : > { %v718_v5 = vmax.f32 %v716_v60, %v717_v0  ;;  %v726_v6 = vrot.slane %v725_v1, 1  ;;  %v729_v7 = vmax.f32 %v728_v62, %v5907_v4 }
 0x17e   : > { %v5912_v9 = vpop.f32.mrf.mxu0 }
 0x17f   : > { %v782_v10 = vsub.f32 %v471_v37, %v718_v5  ;;  %v784_v11 = vsub.f32 %v475_v39, %v718_v5  ;;  %v786_v12 = vsub.f32 %v481_v42, %v718_v5  ;;  %v788_v13 = vsub.f32 %v485_v47, %v718_v5 }
 0x180   : > { %v727_v14 = vmax.f32 %v725_v1, %v726_v6  ;;  %v738_v40 = vmax.f32 %v737_v8, %v5912_v9  ;;  %v505_v43 = vpop.f32.mrf.mxu0 }
 0x181   : > { %v814_v44 = vmul.f32 1.442695, %v782_v10  ;;  %v818_v46 = vmul.f32 1.442695, %v784_v11  ;;  %v822_v48 = vmul.f32 1.442695, %v786_v12  ;;  %v730_v50 = vmax.f32 %v729_v7, %v505_v43 }
 0x182   : > { %v826_v51 = vmul.f32 1.442695, %v788_v13  ;;  %v783_v53 = vsub.f32 %v473_v38, %v727_v14  ;;  %v785_v54 = vsub.f32 %v477_v41, %v727_v14  ;;  %v787_v57 = vsub.f32 %v483_v45, %v727_v14  ;;  %v5918_v58 = vpop.f32.mrf.mxu0 }
 0x183   : > { %5172 = vpow2.f32 %v814_v44  ;;  %v731_v37 = vrot.slane %v730_v50, 4  ;;  %v739_v39 = vmax.f32 %v738_v40, %v5918_v58  ;;  %v789_v42 = vsub.f32 %v487_v49, %v727_v14 }
 0x184   : > { %5174 = vpow2.f32 %v818_v46  ;;  %v816_v47 = vmul.f32 1.442695, %v783_v53  ;;  %v820_v60 = vmul.f32 1.442695, %v785_v54  ;;  %v5921_v61 = vpop.f32.mrf.mxu0  ;;  %v824_v1 = vmul.f32 1.442695, %v787_v57 }
 0x185   : > { %5176 = vpow2.f32 %v822_v48  ;;  %v732_v62 = vmax.f32 %v730_v50, %v731_v37  ;;  %v740_v0 = vrot.slane %v739_v39, 4  ;;  %v828_v5 = vmul.f32 1.442695, %v789_v42 }
 0x186   : > { %5178 = vpow2.f32 %v826_v51  ;;  %v5923_v38 = vpop.f32.mrf.mxu0 }
 0x187   : > { %5180 = vpow2.f32 %v816_v47  ;;  %v733_v41 = vrot.slane %v732_v62, 2  ;;  %v741_v45 = vmax.f32 %v739_v39, %v740_v0 }
 0x188   : > { %5182 = vpow2.f32 %v820_v60  ;;  %v5925_v6 = vpop.f32.mrf.mxu0 }
 0x189   : > { %v734_v7 = vmax.f32 %v732_v62, %v733_v41  ;;  %v742_v49 = vrot.slane %v741_v45, 2  ;;  %v746_v8 = vmax.f32 %v5921_v61, %v5925_v6  ;;  %5184 = vpow2.f32 %v824_v1 }
 0x18a   : > { %v5929_v10 = vpop.f32.mrf.mxu0  ;;  %5186 = vpow2.f32 %v828_v5 }
 0x18b   : > { %v735_v11 = vrot.slane %v734_v7, 1  ;;  %v743_v12 = vmax.f32 %v741_v45, %v742_v49  ;;  %v755_v46 = vmax.f32 %v5923_v38, %v5929_v10 }
 0x18c   : > { %v5931_v13 = vpop.f32.mrf.mxu0 }
 0x18d   : > { %v736_v14 = vmax.f32 %v734_v7, %v735_v11  ;;  %v744_v40 = vrot.slane %v743_v12, 1  ;;  %v747_v44 = vmax.f32 %v746_v8, %v5931_v13 }
 0x18e   : > { %v5936_v48 = vpop.f32.mrf.mxu0 }
 0x18f   : > { %v790_v50 = vsub.f32 %v5890_v52, %v736_v14  ;;  %v792_v51 = vsub.f32 %v5899_v59, %v736_v14  ;;  %v794_v53 = vsub.f32 %v5907_v4, %v736_v14  ;;  %v796_v54 = vsub.f32 %v505_v43, %v736_v14 }
 0x190   : > { %v5941_v57 = vpop.eup %5172  ;;  %v745_v37 = vmax.f32 %v743_v12, %v744_v40  ;;  %v756_v39 = vmax.f32 %v755_v46, %v5936_v48  ;;  %v5944_v42 = vpop.f32.mrf.mxu0 }
 0x191   : > { %v5946_v47 = vpop.eup %5174  ;;  %v830_v60 = vmul.f32 1.442695, %v790_v50  ;;  %v834_v62 = vmul.f32 1.442695, %v792_v51  ;;  %v838_v0 = vmul.f32 1.442695, %v794_v53  ;;  %v748_v1 = vmax.f32 %v747_v44, %v5944_v42 }
 0x192   : > { %v5949_v52 = vpop.eup %5176  ;;  %v878_v59 = vadd.f32 %v5946_v47, %v5941_v57  ;;  %v842_v4 = vmul.f32 1.442695, %v796_v54  ;;  %v791_v43 = vsub.f32 %v5894_v56, %v745_v37  ;;  %v793_v41 = vsub.f32 %v5903_v63, %v745_v37  ;;  %v5955_v45 = vpop.f32.mrf.mxu0 }
 0x193   : > { %v5957_v5 = vpop.eup %5178  ;;  %5188 = vpow2.f32 %v830_v60  ;;  %v795_v7 = vsub.f32 %v5912_v9, %v745_v37  ;;  %v797_v49 = vsub.f32 %v5918_v58, %v745_v37  ;;  %v749_v8 = vrot.slane %v748_v1, 4 }
 0x194   : > { %v5961_v11 = vpop.eup %5180  ;;  %v879_v12 = vadd.f32 %v5949_v52, %v878_v59  ;;  %5190 = vpow2.f32 %v834_v62  ;;  %v832_v14 = vmul.f32 1.442695, %v791_v43  ;;  %v836_v40 = vmul.f32 1.442695, %v793_v41  ;;  %v5964_v56 = vpop.f32.mrf.mxu0 }
 0x195   : > { %v5966_v63 = vpop.eup %5182  ;;  %5192 = vpow2.f32 %v838_v0  ;;  %v840_v44 = vmul.f32 1.442695, %v795_v7  ;;  %v750_v46 = vmax.f32 %v748_v1, %v749_v8  ;;  %v757_v58 = vmax.f32 %v756_v39, %v5955_v45 }
 0x196   : > { %v880_v50 = vadd.f32 %v5957_v5, %v879_v12  ;;  %v887_v9 = vadd.f32 %v5966_v63, %v5961_v11  ;;  %5194 = vpow2.f32 %v842_v4  ;;  %v5972_v51 = vpop.f32.mrf.mxu0  ;;  %v5974_v53 = vpop.eup %5184  ;;  %v844_v54 = vmul.f32 1.442695, %v797_v49 }
 0x197   : > { %5196 = vpow2.f32 %v832_v14  ;;  %v751_v37 = vrot.slane %v750_v46, 2  ;;  %v758_v0 = vrot.slane %v757_v58, 4  ;;  %v5979_v59 = vpop.eup %5186 }
 0x198   : > { %v881_v60 = vrot.slane %v880_v50, 4  ;;  %v888_v62 = vadd.f32 %v5974_v53, %v887_v9  ;;  %5198 = vpow2.f32 %v836_v40  ;;  %v5977_v1 = vpop.f32.mrf.mxu0 }
 0x199   : > { %v752_v43 = vmax.f32 %v750_v46, %v751_v37  ;;  %v764_v39 = vmax.f32 %v5964_v56, %v5977_v1  ;;  %5200 = vpow2.f32 %v840_v44  ;;  %v759_v7 = vmax.f32 %v757_v58, %v758_v0 }
 0x19a   : > { %v882_v4 = vadd.f32 %v881_v60, %v880_v50  ;;  %v889_v41 = vadd.f32 %v5979_v59, %v888_v62  ;;  %v5984_v49 = vpop.f32.mrf.mxu0  ;;  %5202 = vpow2.f32 %v844_v54 }
 0x19b   : > { %v753_v8 = vrot.slane %v752_v43, 1  ;;  %v760_v40 = vrot.slane %v759_v7, 2  ;;  %v773_v50 = vmax.f32 %v5972_v51, %v5984_v49 }
 0x19c   : > { %v883_v12 = vrot.slane %v882_v4, 2  ;;  %v890_v14 = vrot.slane %v889_v41, 4  ;;  %v5986_v9 = vpop.f32.mrf.mxu0 }
 0x19d   : > { %v754_v3 = vmax.f32 %v752_v43, %v753_v8  ;;  %v765_v46 = vmax.f32 %v764_v39, %v5986_v9  ;;  %v761_v55 = vmax.f32 %v759_v7, %v760_v40 }
 0x19e   : > { %v884_v37 = vadd.f32 %v883_v12, %v882_v4  ;;  %v891_v2 = vadd.f32 %v890_v14, %v889_v41  ;;  %v5991_v44 = vpop.f32.mrf.mxu0 }
 0x19f   : > { %v798_v58 = vsub.f32 %v5921_v61, %v754_v3  ;;  %v800_v60 = vsub.f32 %v5925_v6, %v754_v3  ;;  %v802_v54 = vsub.f32 %v5931_v13, %v754_v3  ;;  %v804_v62 = vsub.f32 %v5944_v42, %v754_v3 }
 0x1a0   : > { %v5997_v0 = vpop.eup %5188  ;;  %v885_v43 = vrot.slane %v884_v37, 1  ;;  %v762_v39 = vrot.slane %v761_v55, 1  ;;  %v774_v4 = vmax.f32 %v773_v50, %v5991_v44  ;;  %v6000_v41 = vpop.f32.mrf.mxu0  ;;  %v892_v7 = vrot.slane %v891_v2, 2 }
 0x1a1   : > { %v6002_v8 = vpop.eup %5190  ;;  %v846_v12 = vmul.f32 1.442695, %v798_v58  ;;  %v850_v14 = vmul.f32 1.442695, %v800_v60  ;;  %v854_v61 = vmul.f32 1.442695, %v802_v54  ;;  %v766_v6 = vmax.f32 %v765_v46, %v6000_v41 }
 0x1a2   : > { %v6005_v40 = vpop.eup %5192  ;;  %v896_v3 = vadd.f32 %v6002_v8, %v5997_v0  ;;  %v858_v13 = vmul.f32 1.442695, %v804_v62  ;;  %v763_v42 = vmax.f32 %v761_v55, %v762_v39  ;;  %v6009_v36 = vpop.f32.mrf.mxu0  ;;  %v893_v50 = vadd.f32 %v892_v7, %v891_v2 }
 0x1a3   : > { %v6011_v35 = vpop.eup %5194  ;;  %5204 = vpow2.f32 %v846_v12  ;;  %v767_v34 = vrot.slane %v766_v6, 4  ;;  %v775_v58 = vmax.f32 %v774_v4, %v6009_v36  ;;  %v886_v60 = vadd.f32 %v885_v43, %v884_v37 }
 0x1a4   : > { %v6014_v54 = vpop.eup %5196  ;;  %v897_v46 = vadd.f32 %v6005_v40, %v896_v3  ;;  %5206 = vpow2.f32 %v850_v14  ;;  %v799_v33 = vsub.f32 %v5923_v38, %v763_v42  ;;  %v801_v62 = vsub.f32 %v5929_v10, %v763_v42  ;;  %v6019_v55 = vpop.f32.mrf.mxu0 }
 0x1a5   : > { %v6021_v39 = vpop.eup %5198  ;;  %5208 = vpow2.f32 %v854_v61  ;;  %v803_v2 = vsub.f32 %v5936_v48, %v763_v42  ;;  %v805_v7 = vsub.f32 %v5955_v45, %v763_v42  ;;  %v768_v4 = vmax.f32 %v766_v6, %v767_v34 }
 0x1a6   : > { %v898_v37 = vadd.f32 %v6011_v35, %v897_v46  ;;  %v905_v43 = vadd.f32 %v6021_v39, %v6014_v54  ;;  %5210 = vpow2.f32 %v858_v13  ;;  %v848_v12 = vmul.f32 1.442695, %v799_v33  ;;  %v6028_v38 = vpop.f32.mrf.mxu0  ;;  %v6030_v10 = vpop.eup %5200 }
 0x1a7   : > { %v852_v14 = vmul.f32 1.442695, %v801_v62  ;;  %v856_v3 = vmul.f32 1.442695, %v803_v2  ;;  %v860_v32 = vmul.f32 1.442695, %v805_v7  ;;  %v998_v48 = vmax.f32 %v6019_v55, %v6028_v38  ;;  %v6037_v42 = vpop.eup %5202 }
 0x1a8   : > { %v899_v61 = vrot.slane %v898_v37, 4  ;;  %v906_v34 = vadd.f32 %v6030_v10, %v905_v43  ;;  %5212 = vpow2.f32 %v848_v12  ;;  %v769_v45 = vrot.slane %v768_v4, 2  ;;  %v6035_v6 = vpop.f32.mrf.mxu0 }
 0x1a9   : > { %5214 = vpow2.f32 %v852_v14  ;;  %v776_v33 = vrot.slane %v775_v58, 4  ;;  %999 = vmax.xlane.f32.xlu1 %v998_v48  ;;  %v894_v13 = vrot.slane %v893_v50, 1 }
 0x1aa   : > { %v900_v46 = vadd.f32 %v899_v61, %v898_v37  ;;  %v907_v62 = vadd.f32 %v6037_v42, %v906_v34  ;;  %5216 = vpow2.f32 %v856_v3  ;;  %v770_v2 = vmax.f32 %v768_v4, %v769_v45  ;;  %v6040_v7 = vpop.f32.mrf.mxu0 }
 0x1ab   : > { %5218 = vpow2.f32 %v860_v32  ;;  %v777_v31 = vmax.f32 %v775_v58, %v776_v33  ;;  %v1001_v43 = vmax.f32 %v6035_v6, %v6040_v7  ;;  %v895_v12 = vadd.f32 %v894_v13, %v893_v50 }
 0x1ac   : > { %v901_v30 = vrot.slane %v900_v46, 2  ;;  %v908_v29 = vrot.slane %v907_v62, 4  ;;  %v771_v28 = vrot.slane %v770_v2, 1  ;;  %v6044_v14 = vpop.f32.mrf.mxu0  ;;  %5220 = vrcp.f32 %v886_v60 }
 0x1ad   : > { %v778_v48 = vrot.slane %v777_v31, 2  ;;  %1002 = vmax.xlane.f32.xlu0 %v1001_v43  ;;  %5222 = vrcp.f32 %v895_v12 }
 0x1ae   : > { %v909_v37 = vadd.f32 %v908_v29, %v907_v62  ;;  %v772_v3 = vmax.f32 %v770_v2, %v771_v28  ;;  %v6046_v4 = vpop.f32.mrf.mxu0  ;;  %v902_v50 = vadd.f32 %v901_v30, %v900_v46 }
 0x1af   : > { %v779_v61 = vmax.f32 %v777_v31, %v778_v48  ;;  %v1004_v32 = vmax.f32 %v6044_v14, %v6046_v4 }
 0x1b0   : > { %v6050_v58 = vpop.eup %5204  ;;  %v806_v34 = vsub.f32 %v5964_v56, %v772_v3  ;;  %v808_v45 = vsub.f32 %v5977_v1, %v772_v3  ;;  %v810_v60 = vsub.f32 %v5986_v9, %v772_v3  ;;  %v6055_v33 = vpop.f32.mrf.mxu0  ;;  %v812_v28 = vsub.f32 %v6000_v41, %v772_v3 }
 0x1b1   : > { %v6057_v13 = vpop.eup %5206  ;;  %v780_v29 = vrot.slane %v779_v61, 1  ;;  %1005 = vmax.xlane.f32.xlu1 %v1004_v32  ;;  %v910_v31 = vrot.slane %v909_v37, 2  ;;  %v903_v3 = vrot.slane %v902_v50, 1 }
 0x1b2   : > { %v6060_v62 = vpop.eup %5208  ;;  %v914_v30 = vadd.f32 %v6057_v13, %v6050_v58  ;;  %v862_v46 = vmul.f32 1.442695, %v806_v34  ;;  %v866_v56 = vmul.f32 1.442695, %v808_v45  ;;  %v870_v2 = vmul.f32 1.442695, %v810_v60  ;;  %v6064_v1 = vpop.f32.mrf.mxu0 }
 0x1b3   : > { %v6066_v9 = vpop.eup %5210  ;;  %v874_v43 = vmul.f32 1.442695, %v812_v28  ;;  %v781_v12 = vmax.f32 %v779_v61, %v780_v29  ;;  %v1007_v41 = vmax.f32 %v6055_v33, %v6064_v1  ;;  %v911_v48 = vadd.f32 %v910_v31, %v909_v37 }
 0x1b4   : > { %v915_v32 = vadd.f32 %v6060_v62, %v914_v30  ;;  %5224 = vpow2.f32 %v862_v46  ;;  %v6071_v27 = vpop.f32.mrf.mxu0  ;;  %v904_v24 = vadd.f32 %v903_v3, %v902_v50 }
 0x1b5   : > { %v6073_v26 = vpop.eup %5212  ;;  %5226 = vpow2.f32 %v866_v56  ;;  %v807_v34 = vsub.f32 %v5972_v51, %v781_v12  ;;  %v809_v45 = vsub.f32 %v5984_v49, %v781_v12  ;;  %v811_v60 = vsub.f32 %v5991_v44, %v781_v12  ;;  %1008 = vmax.xlane.f32.xlu1 %v1007_v41 }
 0x1b6   : > { %v6078_v61 = vpop.eup %5214  ;;  %v916_v37 = vadd.f32 %v6066_v9, %v915_v32  ;;  %5228 = vpow2.f32 %v870_v2  ;;  %v813_v28 = vsub.f32 %v6009_v36, %v781_v12  ;;  %v6082_v29 = vpop.f32.mrf.mxu0  ;;  %v912_v31 = vrot.slane %v911_v48, 1 }
 0x1b7   : > { %v6084_v30 = vpop.eup %5216  ;;  %v923_v51 = vadd.f32 %v6078_v61, %v6073_v26  ;;  %5230 = vpow2.f32 %v874_v43  ;;  %v864_v49 = vmul.f32 1.442695, %v807_v34  ;;  %v868_v46 = vmul.f32 1.442695, %v809_v45 }
 0x1b8   : > { %v6088_v44 = vpop.eup %5218  ;;  %v917_v56 = vrot.slane %v916_v37, 4  ;;  %v872_v41 = vmul.f32 1.442695, %v811_v60  ;;  %v876_v25 = vmul.f32 1.442695, %v813_v28  ;;  %v6090_v32 = vpop.f32.mrf.mxu0  ;;  %v1010_v36 = vmax.f32 %v6071_v27, %v6082_v29 }
 0x1b9   : > { %v5221_v2 = vpop.eup %5220  ;;  %v924_v12 = vadd.f32 %v6084_v30, %v923_v51  ;;  %5232 = vpow2.f32 %v864_v49  ;;  %v913_v45 = vadd.f32 %v912_v31, %v911_v48 }
 0x1ba   : > { %v5223_v23 = vpop.eup %5222  ;;  %v918_v22 = vadd.f32 %v917_v56, %v916_v37  ;;  %5234 = vpow2.f32 %v868_v46  ;;  %1011 = vmax.xlane.f32.xlu1 %v1010_v36  ;;  %v6095_v43 = vpop.f32.mrf.mxu0  ;;  %v958_v34 = vmul.f32 0.17677669, %v5221_v2 }
 0x1bb   : > { %v925_v60 = vadd.f32 %v6088_v44, %v924_v12  ;;  %5236 = vpow2.f32 %v872_v41  ;;  %v1013_v28 = vmax.f32 %v6090_v32, %v6095_v43  ;;  %v959_v21 = vmul.f32 0.17677669, %v5223_v23 }
 0x1bc   : > { %v919_v20 = vrot.slane %v918_v22, 2  ;;  %5238 = vpow2.f32 %v876_v25  ;;  %v6100_v51 = vpop.f32.mrf.mxu0  ;;  %v6103_v50 = vmul.f32 %v5949_v52, %v958_v34  ;;  %v6106_v3 = vmul.f32 %v5957_v5, %v958_v34 }
 0x1bd   : > { %v926_v37 = vrot.slane %v925_v60, 4  ;;  %v6109_v48 = vmul.f32 %v5974_v53, %v959_v21  ;;  %v6112_v31 = vmul.f32 %v5979_v59, %v959_v21  ;;  %v6115_v49 = vmul.f32 %v5961_v11, %v959_v21 }
 0x1be   : > { %7942 = vst [vmem:[#allocation32_spill] sm:$0xff] %v6103_v50  ;;  %7943 = vst [vmem:[#allocation33_spill] sm:$0xff] %v6106_v3  ;;  %v920_v23 = vadd.f32 %v919_v20, %v918_v22  ;;  %1014 = vmax.xlane.f32.xlu1 %v1013_v28  ;;  %v6117_v25 = vpop.f32.mrf.mxu0  ;;  %v6122_v5 = vmul.f32 %v5966_v63, %v959_v21  ;;  %v6125_v46 = vmul.f32 %v5941_v57, %v958_v34 }
 0x1bf   : > { %7944 = vst [vmem:[#allocation34_spill] sm:$0xff] %v6109_v48  ;;  %7945 = vst [vmem:[#allocation35_spill] sm:$0xff] %v6112_v31  ;;  %v927_v53 = vadd.f32 %v926_v37, %v925_v60  ;;  %v1016_v59 = vmax.f32 %v6100_v51, %v6117_v25  ;;  %v6132_v20 = vmul.f32 %v5946_v47, %v958_v34  ;;  %5240 = vrcp.f32 %v913_v45 }
 0x1c0   : > { %7946 = vst [vmem:[#allocation36_spill] sm:$0xff] %v6115_v49  ;;  %7947 = vst [vmem:[#allocation37_spill] sm:$0xff] %v6122_v5  ;;  %v921_v22 = vrot.slane %v920_v23, 1  ;;  %v6134_v56 = vpop.f32.mrf.mxu0  ;;  %5242 = vrcp.f32 %v904_v24 }
 0x1c1   : > { %7948 = vst [vmem:[#allocation38_spill] sm:$0xff] %v6125_v46  ;;  %7949 = vst [vmem:[#allocation39_spill] sm:$0xff] %v6132_v20  ;;  %v6138_v63 = vpop.eup %5224  ;;  %v928_v41 = vrot.slane %v927_v53, 2 }
 0x1c2   : > { %v6142_v36 = vpop.eup %5226  ;;  %1017 = vmax.xlane.f32.xlu1 %v1016_v59  ;;  %v6144_v2 = vpop.f32.mrf.mxu0  ;;  %v922_v47 = vadd.f32 %v921_v22, %v920_v23 }
 0x1c3   : > { %v6146_v12 = vpop.eup %5228  ;;  %v932_v34 = vadd.f32 %v6142_v36, %v6138_v63  ;;  %v1019_v45 = vmax.f32 %v6134_v56, %v6144_v2  ;;  %v929_v60 = vadd.f32 %v928_v41, %v927_v53 }
 0x1c4   : > { %v6152_v28 = vpop.eup %5230  ;;  %v6154_v37 = vpop.f32.mrf.mxu0  ;;  %5244 = vrcp.f32 %v922_v47 }
 0x1c5   : > { %v933_v24 = vadd.f32 %v6146_v12, %v932_v34  ;;  %v930_v59 = vrot.slane %v929_v60, 1 }
 0x1c6   : > { %v6157_v57 = vpop.eup %5232  ;;  %1020 = vmax.xlane.f32.xlu1 %v1019_v45  ;;  %v6159_v23 = vpop.f32.mrf.mxu0 }
 0x1c7   : > { %v6161_v22 = vpop.eup %5234  ;;  %v934_v21 = vadd.f32 %v6152_v28, %v933_v24  ;;  %v1022_v53 = vmax.f32 %v6154_v37, %v6159_v23  ;;  %v931_v41 = vadd.f32 %v930_v59, %v929_v60 }
 0x1c8   : > { %v6166_v52 = vpop.eup %5236  ;;  %v941_v47 = vadd.f32 %v6161_v22, %v6157_v57  ;;  %v6170_v34 = vpop.f32.mrf.mxu0 }
 0x1c9   : > { %v6172_v11 = vpop.eup %5238  ;;  %v935_v45 = vrot.slane %v934_v21, 4  ;;  %5246 = vrcp.f32 %v931_v41 }
 0x1ca   : > { %v942_v19 = vadd.f32 %v6166_v52, %v941_v47  ;;  %1023 = vmax.xlane.f32.xlu1 %v1022_v53  ;;  %v6175_v18 = vpop.f32.mrf.mxu0 }
 0x1cb   : > { %v936_v24 = vadd.f32 %v935_v45, %v934_v21  ;;  %v1025_v60 = vmax.f32 %v6170_v34, %v6175_v18 }
 0x1cc   : > { %v943_v59 = vadd.f32 %v6172_v11, %v942_v19  ;;  %v6180_v17 = vpop.f32.mrf.mxu0  ;;  %v5241_v16 = vpop.eup %5240 }
 0x1cd   : > { %v937_v15 = vrot.slane %v936_v24, 2  ;;  %v5243_v46 = vpop.eup %5242  ;;  %v961_v41 = vmul.f32 0.17677669, %v5241_v16 }
 0x1ce   : > { %v944_v20 = vrot.slane %v943_v59, 4  ;;  %1026 = vmax.xlane.f32.xlu1 %v1025_v60  ;;  %v6182_v49 = vpop.f32.mrf.mxu0  ;;  %v960_v21 = vmul.f32 0.17677669, %v5243_v46 }
 0x1cf   : > { %v938_v47 = vadd.f32 %v937_v15, %v936_v24  ;;  %v1028_v53 = vmax.f32 %v6180_v17, %v6182_v49  ;;  %v6189_v19 = vmul.f32 %v6030_v10, %v961_v41  ;;  %v6192_v50 = vmul.f32 %v6037_v42, %v961_v41 }
 0x1d0   : > { %v945_v45 = vadd.f32 %v944_v20, %v943_v59  ;;  %v6186_v5 = vpop.f32.mrf.mxu0  ;;  %v6195_v3 = vmul.f32 %v6014_v54, %v961_v41  ;;  %v6198_v15 = vmul.f32 %v6005_v40, %v960_v21  ;;  %v6201_v16 = vmul.f32 %v6011_v35, %v960_v21 }
 0x1d1   : > { %7950 = vst [vmem:[#allocation40_spill] sm:$0xff] %v6189_v19  ;;  %7951 = vst [vmem:[#allocation41_spill] sm:$0xff] %v6192_v50  ;;  %v5245_v60 = vpop.eup %5244  ;;  %v939_v48 = vrot.slane %v938_v47, 1  ;;  %v6204_v46 = vmul.f32 %v6021_v39, %v961_v41  ;;  %v6211_v54 = vmul.f32 %v5997_v0, %v960_v21  ;;  %v6214_v20 = vmul.f32 %v6002_v8, %v960_v21 }
 0x1d2   : > { %7952 = vst [vmem:[#allocation42_spill] sm:$0xff] %v6195_v3  ;;  %7953 = vst [vmem:[#allocation43_spill] sm:$0xff] %v6198_v15  ;;  %1029 = vmax.xlane.f32.xlu1 %v1028_v53  ;;  %v6206_v10 = vpop.f32.mrf.mxu0  ;;  %v962_v40 = vmul.f32 0.17677669, %v5245_v60  ;;  %v946_v59 = vrot.slane %v945_v45, 2 }
 0x1d3   : > { %7954 = vst [vmem:[#allocation44_spill] sm:$0xff] %v6201_v16  ;;  %7955 = vst [vmem:[#allocation45_spill] sm:$0xff] %v6204_v46  ;;  %v1031_v35 = vmax.f32 %v6186_v5, %v6206_v10  ;;  %v940_v24 = vadd.f32 %v939_v48, %v938_v47 }
 0x1d4   : > { %7956 = vst [vmem:[#allocation46_spill] sm:$0xff] %v6211_v54  ;;  %7957 = vst [vmem:[#allocation47_spill] sm:$0xff] %v6214_v20  ;;  %v6222_v41 = vpop.f32.mrf.mxu0  ;;  %v6227_v53 = vmul.f32 %v6060_v62, %v962_v40  ;;  %v6230_v8 = vmul.f32 %v6066_v9, %v962_v40  ;;  %v6233_v21 = vmul.f32 %v6050_v58, %v962_v40 }
 0x1d5   : > { %v6236_v60 = vmul.f32 %v6057_v13, %v962_v40  ;;  %v947_v39 = vadd.f32 %v946_v59, %v945_v45  ;;  %5248 = vrcp.f32 %v940_v24 }
 0x1d6   : > { %7958 = vst [vmem:[#allocation48_spill] sm:$0xff] %v6227_v53  ;;  %7959 = vst [vmem:[#allocation49_spill] sm:$0xff] %v6230_v8  ;;  %v5247_v42 = vpop.eup %5246  ;;  %1032 = vmax.xlane.f32.xlu1 %v1031_v35  ;;  %v6238_v3 = vpop.f32.mrf.mxu0 }
 0x1d7   : > { %7960 = vst [vmem:[#allocation50_spill] sm:$0xff] %v6233_v21  ;;  %7961 = vst [vmem:[#allocation51_spill] sm:$0xff] %v6236_v60  ;;  %v1034_v62 = vmax.f32 %v6222_v41, %v6238_v3  ;;  %v963_v9 = vmul.f32 0.17677669, %v5247_v42  ;;  %v948_v54 = vrot.slane %v947_v39, 1 }
 0x1d8   : > { %v6246_v20 = vpop.f32.mrf.mxu0 }
 0x1d9   : > { %v6249_v13 = vmul.f32 %v6084_v30, %v963_v9  ;;  %v6252_v48 = vmul.f32 %v6088_v44, %v963_v9  ;;  %v6255_v47 = vmul.f32 %v6073_v26, %v963_v9  ;;  %v6258_v45 = vmul.f32 %v6078_v61, %v963_v9 }
 0x1da   : > { %1035 = vmax.xlane.f32.xlu1 %v1034_v62  ;;  %v6260_v42 = vpop.f32.mrf.mxu0  ;;  %v949_v40 = vadd.f32 %v948_v54, %v947_v39 }
 0x1db   : > { %7962 = vst [vmem:[#allocation52_spill] sm:$0xff] %v6249_v13  ;;  %7963 = vst [vmem:[#allocation53_spill] sm:$0xff] %v6252_v48  ;;  %v1037_v35 = vmax.f32 %v6246_v20, %v6260_v42 }
 0x1dc   : > { %7964 = vst [vmem:[#allocation54_spill] sm:$0xff] %v6255_v47  ;;  %7965 = vst [vmem:[#allocation55_spill] sm:$0xff] %v6258_v45  ;;  %v6268_v24 = vpop.f32.mrf.mxu0  ;;  %5250 = vrcp.f32 %v949_v40 }
 0x1de   : > { %1038 = vmax.xlane.f32.xlu1 %v1037_v35  ;;  %v6270_v26 = vpop.f32.mrf.mxu0 }
 0x1df   : > { %v1040_v61 = vmax.f32 %v6268_v24, %v6270_v26 }
 0x1e0   : > { %v6274_v59 = vpop.f32.mrf.mxu0 }
 0x1e2   : > { %1041 = vmax.xlane.f32.xlu1 %v1040_v61  ;;  %v6276_v54 = vpop.f32.mrf.mxu0  ;;  %v5249_v9 = vpop.eup %5248 }
 0x1e3   : > { %v1043_v39 = vmax.f32 %v6274_v59, %v6276_v54  ;;  %v964_v44 = vmul.f32 0.17677669, %v5249_v9 }
 0x1e4   : > { %v631_v62 = vpop.f32.mrf.mxu0 }
 0x1e5   : > { %v6281_v0 = vmul.f32 %v6146_v12, %v964_v44  ;;  %v6284_v30 = vmul.f32 %v6152_v28, %v964_v44  ;;  %v6287_v61 = vmul.f32 %v6138_v63, %v964_v44  ;;  %v6290_v21 = vmul.f32 %v6142_v36, %v964_v44 }
 0x1e6   : > { %1044 = vmax.xlane.f32.xlu1 %v1043_v39  ;;  %v633_v58 = vpop.f32.mrf.mxu0 }
 0x1e7   : > { %v4465_v40 = vpack.i.bf16 %v631_v62, %v633_v58  ;;  %7966 = vst [vmem:[#allocation56_spill] sm:$0xff] %v6281_v0  ;;  %7967 = vst [vmem:[#allocation57_spill] sm:$0xff] %v6284_v30 }
 0x1e8   : > { %v635_v35 = vpop.f32.mrf.mxu0  ;;  %7968 = vst [vmem:[#allocation58_spill] sm:$0xff] %v6287_v61  ;;  %7969 = vst [vmem:[#allocation59_spill] sm:$0xff] %v6290_v21 }
 0x1e9   : > { %v5251_v60 = vpop.eup %5250  ;;  %4466 = vxpose.xlu0.b32.start [1/4] (short) %v4465_v40, 128 }
 0x1ea   : > { %v637_v47 = vpop.f32.mrf.mxu0  ;;  %v965_v39 = vmul.f32 0.17677669, %v5251_v60 }
 0x1eb   : > { %v4467_v62 = vpack.i.bf16 %v635_v35, %v637_v47 }
 0x1ec   : > { %v641_v9 = vpop.f32.mrf.mxu0  ;;  %v6297_v28 = vmul.f32 %v6166_v52, %v965_v39  ;;  %v6300_v63 = vmul.f32 %v6172_v11, %v965_v39  ;;  %v6303_v36 = vmul.f32 %v6157_v57, %v965_v39  ;;  %v6306_v44 = vmul.f32 %v6161_v22, %v965_v39 }
 0x1ed   : > { %4468 = vxpose.xlu0.b32.cont [2/4] (short) %v4467_v62, 128 }
 0x1ee   : > { %7970 = vst [vmem:[#allocation60_spill] sm:$0xff] %v6297_v28  ;;  %7971 = vst [vmem:[#allocation61_spill] sm:$0xff] %v6300_v63  ;;  %v643_v60 = vpop.f32.mrf.mxu0 }
 0x1ef   : > { %7972 = vst [vmem:[#allocation62_spill] sm:$0xff] %v6303_v36  ;;  %7973 = vst [vmem:[#allocation63_spill] sm:$0xff] %v6306_v44  ;;  %v4469_v35 = vpack.i.bf16 %v641_v9, %v643_v60 }
 0x1f0   : > { %v645_v52 = vpop.f32.mrf.mxu0 }
 0x1f1   : > { %4470 = vxpose.xlu0.b32.cont [3/4] (short) %v4469_v35, 128 }
 0x1f2   : > { %v647_v12 = vpop.f32.mrf.mxu0 }
 0x1f3   : > { %v4471_v11 = vpack.i.bf16 %v645_v52, %v647_v12 }
 0x1f4   : > { %v651_v58 = vpop.f32.mrf.mxu0 }
 0x1f5   : > { %4472 = vxpose.xlu0.b32.end [4/4] (short) %v4471_v11, 128 }
 0x1f6   : > { %v653_v57 = vpop.f32.mrf.mxu0 }
 0x1f7   : > { %v4553_v39 = vpack.i.bf16 %v651_v58, %v653_v57 }
 0x1f8   : > { %v655_v61 = vpop.f32.mrf.mxu0 }
 0x1fa   : > { %v657_v21 = vpop.f32.mrf.mxu0 }
 0x1fb   : > { %v4555_v0 = vpack.i.bf16 %v655_v61, %v657_v21 }
 0x1fc   : > { %v661_v22 = vpop.f32.mrf.mxu0 }
 0x1fe   : > { %v663_v62 = vpop.f32.mrf.mxu0 }
 0x1ff   : > { %v4557_v40 = vpack.i.bf16 %v661_v22, %v663_v62 }
 0x200   : > { %v665_v30 = vpop.f32.mrf.mxu0 }
 0x202   : > { %v667_v28 = vpop.f32.mrf.mxu0 }
 0x203   : > { %v4559_v9 = vpack.i.bf16 %v665_v30, %v667_v28 }
 0x219   : > { %4554 = vxpose.xlu1.b32.start [1/4] (short) %v4553_v39, 128 }
 0x21d   : > { %4556 = vxpose.xlu1.b32.cont [2/4] (short) %v4555_v0, 128 }
 0x221   : > { %4558 = vxpose.xlu1.b32.cont [3/4] (short) %v4557_v40, 128 }
 0x225   : > { %4560 = vxpose.xlu1.b32.end [4/4] (short) %v4559_v9, 128 }
 0x232   : > { %v1000_v60 = vpop.xlane.xlu1 %999 }
 0x23a   : > { %v1006_v35 = vpop.xlane.xlu1 %1005 }
 0x23b   : > { %v1050_v12 = vsub.f32 %v6044_v14, %v1006_v35  ;;  %v1051_v52 = vsub.f32 %v6046_v4, %v1006_v35 }
 0x23d   : > { %v1086_v11 = vmul.f32 1.442695, %v1050_v12  ;;  %v1088_v47 = vmul.f32 1.442695, %v1051_v52  ;;  %v1046_v12 = vsub.f32 %v6019_v55, %v1000_v60  ;;  %v1047_v52 = vsub.f32 %v6028_v38, %v1000_v60 }
 0x23e   : > { %v1009_v36 = vpop.xlane.xlu1 %1008 }
 0x23f   : > { %5252 = vpow2.f32 %v1086_v11  ;;  %v1003_v11 = vpop.xlane.xlu0 %1002  ;;  %v1053_v55 = vsub.f32 %v6064_v1, %v1009_v36 }
 0x240   : > { %5254 = vpow2.f32 %v1088_v47 }
 0x243   : > { %v1012_v58 = vpop.xlane.xlu1 %1011 }
 0x244   : > { %v1054_v21 = vsub.f32 %v6071_v27, %v1012_v58  ;;  %v1055_v0 = vsub.f32 %v6082_v29, %v1012_v58 }
 0x246   : > { %v1094_v61 = vmul.f32 1.442695, %v1054_v21  ;;  %v1096_v40 = vmul.f32 1.442695, %v1055_v0  ;;  %v1078_v21 = vmul.f32 1.442695, %v1046_v12  ;;  %v1048_v0 = vsub.f32 %v6035_v6, %v1003_v11 }
 0x247   : > { %v1015_v30 = vpop.xlane.xlu1 %1014 }
 0x248   : > { %5256 = vpow2.f32 %v1094_v61  ;;  %v1056_v28 = vsub.f32 %v6090_v32, %v1015_v30  ;;  %v1057_v14 = vsub.f32 %v6095_v43, %v1015_v30  ;;  %v1080_v61 = vmul.f32 1.442695, %v1047_v52 }
 0x249   : > { %5258 = vpow2.f32 %v1096_v40  ;;  %v1049_v40 = vsub.f32 %v6040_v7, %v1003_v11 }
 0x24a   : > { %v1098_v4 = vmul.f32 1.442695, %v1056_v28  ;;  %v1100_v57 = vmul.f32 1.442695, %v1057_v14  ;;  %v1082_v14 = vmul.f32 1.442695, %v1048_v0 }
 0x24b   : > { %v1018_v9 = vpop.xlane.xlu1 %1017 }
 0x24c   : > { %v6318_v22 = vpop.eup %5252  ;;  %5260 = vpow2.f32 %v1098_v4  ;;  %v1052_v4 = vsub.f32 %v6055_v33, %v1009_v36  ;;  %v1058_v6 = vsub.f32 %v6100_v51, %v1018_v9  ;;  %v1059_v7 = vsub.f32 %v6117_v25, %v1018_v9 }
 0x24d   : > { %v6320_v47 = vpop.eup %5254  ;;  %5262 = vpow2.f32 %v1100_v57  ;;  %v1084_v57 = vmul.f32 1.442695, %v1049_v40 }
 0x24e   : > { %v1148_v27 = vadd.f32 %v6320_v47, %v6318_v22  ;;  %5264 = vpow2.f32 %v1078_v21  ;;  %v1090_v60 = vmul.f32 1.442695, %v1052_v4  ;;  %v1102_v12 = vmul.f32 1.442695, %v1058_v6  ;;  %v6354_v21 = vpop.f32.mrf.mxu0 }
 0x24f   : > { %v1021_v58 = vpop.xlane.xlu1 %1020  ;;  %5266 = vpow2.f32 %v1080_v61  ;;  %v1104_v33 = vmul.f32 1.442695, %v1059_v7 }
 0x250   : > { %5268 = vpow2.f32 %v1082_v14  ;;  %v1060_v52 = vsub.f32 %v6134_v56, %v1021_v58  ;;  %v1061_v36 = vsub.f32 %v6144_v2, %v1021_v58  ;;  %v673_v14 = vpop.f32.mrf.mxu0 }
 0x251   : > { %5270 = vpow2.f32 %v1084_v57 }
 0x252   : > { %1149 = vadd.xlane.f32.xlu0 %v1148_v27  ;;  %v1092_v27 = vmul.f32 1.442695, %v1053_v55  ;;  %5272 = vpow2.f32 %v1090_v60  ;;  %v1106_v25 = vmul.f32 1.442695, %v1060_v52  ;;  %v1108_v40 = vmul.f32 1.442695, %v1061_v36 }
 0x253   : > { %v1024_v28 = vpop.xlane.xlu1 %1023 }
 0x254   : > { %5274 = vpow2.f32 %v1092_v27  ;;  %v1062_v9 = vsub.f32 %v6154_v37, %v1024_v28  ;;  %v1063_v56 = vsub.f32 %v6159_v23, %v1024_v28  ;;  %v675_v23 = vpop.f32.mrf.mxu0 }
 0x255   : > { %v6324_v29 = vpop.eup %5256  ;;  %5276 = vpow2.f32 %v1102_v12 }
 0x256   : > { %7974 = vst [vmem:[#allocation64_spill] sm:$0xff] %v6324_v29  ;;  %v6326_v39 = vpop.eup %5258  ;;  %5278 = vpow2.f32 %v1104_v33  ;;  %v1110_v4 = vmul.f32 1.442695, %v1062_v9  ;;  %v1112_v27 = vmul.f32 1.442695, %v1063_v56 }
 0x257   : > { %v1154_v32 = vadd.f32 %v6326_v39, %v6324_v29  ;;  %5280 = vpow2.f32 %v1106_v25  ;;  %v677_v25 = vpop.f32.mrf.mxu0 }
 0x258   : > { %5282 = vpow2.f32 %v1108_v40 }
 0x259   : > { %v6330_v43 = vpop.eup %5260  ;;  %1155 = vadd.xlane.f32.xlu0 %v1154_v32  ;;  %v1027_v32 = vpop.xlane.xlu1 %1026  ;;  %5284 = vpow2.f32 %v1110_v4 }
 0x25a   : > { %v6332_v62 = vpop.eup %5262  ;;  %v1064_v2 = vsub.f32 %v6170_v34, %v1027_v32  ;;  %v1065_v57 = vsub.f32 %v6175_v18, %v1027_v32  ;;  %5286 = vpow2.f32 %v1112_v27 }
 0x25b   : > { %v1157_v35 = vadd.f32 %v6332_v62, %v6330_v43  ;;  %v6356_v51 = vpop.eup %5264 }
 0x25c   : > { %v6361_v61 = vpop.eup %5266  ;;  %v1114_v28 = vmul.f32 1.442695, %v1064_v2  ;;  %v1116_v7 = vmul.f32 1.442695, %v1065_v57 }
 0x25d   : > { %1158 = vadd.xlane.f32.xlu0 %v1157_v35  ;;  %v1030_v11 = vpop.xlane.xlu1 %1029  ;;  %v6365_v58 = vpop.eup %5268  ;;  %v1142_v37 = vadd.f32 %v6361_v61, %v6356_v51 }
 0x25e   : > { %v6372_v6 = vpop.eup %5270  ;;  %v1066_v12 = vsub.f32 %v6180_v17, %v1030_v11  ;;  %v1067_v52 = vsub.f32 %v6182_v49, %v1030_v11  ;;  %5288 = vpow2.f32 %v1114_v28  ;;  %v681_v11 = vpop.f32.mrf.mxu0  ;;  %v4641_v28 = vpack.i.bf16 %v6354_v21, %v673_v14 }
 0x25f   : > { %v6374_v34 = vpop.eup %5272  ;;  %v1145_v18 = vadd.f32 %v6372_v6, %v6365_v58  ;;  %5290 = vpow2.f32 %v1116_v7 }
 0x260   : > { %v1118_v40 = vmul.f32 1.442695, %v1066_v12  ;;  %v1120_v57 = vmul.f32 1.442695, %v1067_v52 }
 0x261   : > { %v1033_v55 = vpop.xlane.xlu1 %1032  ;;  %v6381_v33 = vpop.eup %5274 }
 0x262   : > { %v6386_v9 = vpop.eup %5276  ;;  %v1068_v17 = vsub.f32 %v6186_v5, %v1033_v55  ;;  %v1151_v56 = vadd.f32 %v6381_v33, %v6374_v34  ;;  %v1069_v49 = vsub.f32 %v6206_v10, %v1033_v55  ;;  %5292 = vpow2.f32 %v1118_v40  ;;  %v683_v10 = vpop.f32.mrf.mxu0 }
 0x263   : > { %7975 = vst [vmem:[#allocation65_spill] sm:$0xff] %v6386_v9  ;;  %v6393_v4 = vpop.eup %5278  ;;  %5294 = vpow2.f32 %v1120_v57  ;;  %v4643_v55 = vpack.i.bf16 %v675_v23, %v677_v25  ;;  %v4645_v23 = vpack.i.bf16 %v681_v11, %v683_v10 }
 0x264   : > { %7976 = vst [vmem:[#allocation66_spill] sm:$0xff] %v6393_v4  ;;  %v1160_v5 = vadd.f32 %v6393_v4, %v6386_v9  ;;  %v6403_v12 = vpop.eup %5280  ;;  %v685_v57 = vpop.f32.mrf.mxu0 }
 0x265   : > { %v6340_v30 = vpop.trf.xlu0  ;;  %v6384_v36 = vpop.xlane.xlu1 %1035  ;;  %7977 = vst [vmem:[#allocation67_spill] sm:$0xff] %v6403_v12 }
 0x266   : > { %v6405_v52 = vpop.eup %5282 }
 0x267   : > { %7978 = vst [vmem:[#allocation68_spill] sm:$0xff] %v6405_v52  ;;  %v1163_v21 = vadd.f32 %v6405_v52, %v6403_v12 }
 0x269   : > { %v6344_v38 = vpop.trf.xlu0  ;;  %v6396_v27 = vpop.xlane.xlu1 %1038 }
 0x26d   : > { %v6348_v35 = vpop.trf.xlu0 }
 0x271   : > { %v6351_v1 = vpop.trf.xlu0 }
 0x275   : > { %v6359_v0 = vpop.trf.xlu0 }
 0x279   : > { %v6370_v60 = vpop.trf.xlu0 }
 0x27c   : > { %1143 = vadd.xlane.f32.xlu1 %v1142_v37  ;;  %v1122_v37 = vmul.f32 1.442695, %v1068_v17  ;;  %v6409_v17 = vpop.eup %5284 }
 0x27d   : > { %v6379_v32 = vpop.trf.xlu0  ;;  %7979 = vst [vmem:[#allocation69_spill] sm:$0xff] %v6409_v17  ;;  %v6413_v14 = vpop.eup %5286 }
 0x27e   : > { %5296 = vpow2.f32 %v1122_v37  ;;  %7980 = vst [vmem:[#allocation70_spill] sm:$0xff] %v6413_v14  ;;  %v1166_v25 = vadd.f32 %v6413_v14, %v6409_v17 }
 0x280   : > { %1146 = vadd.xlane.f32.xlu1 %v1145_v18  ;;  %v1124_v18 = vmul.f32 1.442695, %v1069_v49  ;;  %v6417_v49 = vpop.eup %5288 }
 0x281   : > { %v6391_v2 = vpop.trf.xlu0  ;;  %7981 = vst [vmem:[#allocation71_spill] sm:$0xff] %v6417_v49  ;;  %v6419_v37 = vpop.eup %5290 }
 0x282   : > { %5298 = vpow2.f32 %v1124_v18  ;;  %7982 = vst [vmem:[#allocation72_spill] sm:$0xff] %v6419_v37  ;;  %v6425_v63 = vpop.eup %5292 }
 0x283   : > { %7983 = vst [vmem:[#allocation73_spill] sm:$0xff] %v6425_v63  ;;  %v6429_v53 = vpop.eup %5294 }
 0x284   : > { %1152 = vadd.xlane.f32.xlu1 %v1151_v56  ;;  %v6415_v56 = vpop.xlane.xlu1 %1041  ;;  %7984 = vst [vmem:[#allocation74_spill] sm:$0xff] %v6429_v53 }
 0x285   : > { %v6401_v7 = vpop.trf.xlu0 }
 0x288   : > { %1161 = vadd.xlane.f32.xlu1 %v1160_v5  ;;  %v6423_v18 = vpop.xlane.xlu1 %1044 }
 0x289   : > { %v6407_v40 = vpop.trf.xlu0 }
 0x28a   : > { %4642 = vxpose.xlu0.b32.start [1/4] (short) %v4641_v28, 128  ;;  %v687_v28 = vpop.f32.mrf.mxu0  ;;  %v4519_v29 = vunpack.i.l.bf16 %v6407_v40 }
 0x28b   : > { %v4647_v45 = vpack.i.bf16 %v685_v57, %v687_v28  ;;  %v6433_v10 = vpop.eup %5296 }
 0x28c   : > { %1164 = vadd.xlane.f32.xlu1 %v1163_v21  ;;  %v1169_v21 = vadd.f32 %v6419_v37, %v6417_v49  ;;  %7985 = vst [vmem:[#allocation75_spill] sm:$0xff] %v6433_v10 }
 0x28d   : > { %v4523_v5 = vpop.trf.xlu0 }
 0x28e   : > { %4644 = vxpose.xlu0.b32.cont [2/4] (short) %v4643_v55, 128 }
 0x28f   : > { %v6437_v8 = vpop.eup %5298 }
 0x290   : > { %1167 = vadd.xlane.f32.xlu1 %v1166_v25  ;;  %v1172_v25 = vadd.f32 %v6429_v53, %v6425_v63  ;;  %7986 = vst [vmem:[#allocation76_spill] sm:$0xff] %v6437_v8  ;;  %v1175_v28 = vadd.f32 %v6437_v8, %v6433_v10  ;;  %v4527_v8 = vunpack.i.h.bf16 %v4523_v5 }
 0x291   : > { %v4528_v44 = vpop.trf.xlu0 }
 0x292   : > { %4646 = vxpose.xlu0.b32.cont [3/4] (short) %v4645_v23, 128  ;;  %v4529_v17 = vunpack.i.l.bf16 %v4528_v44  ;;  %v4532_v37 = vunpack.i.h.bf16 %v4528_v44 }
 0x294   : > { %1170 = vadd.xlane.f32.xlu1 %v1169_v21 }
 0x295   : > { %v6431_v55 = vpop.trf.xlu1  ;;  %v4533_v11 = vpop.trf.xlu0 }
 0x296   : > { %4648 = vxpose.xlu0.b32.end [4/4] (short) %v4647_v45, 128  ;;  %v4534_v48 = vunpack.i.l.bf16 %v4533_v11  ;;  %v4537_v63 = vunpack.i.h.bf16 %v4533_v11 }
 0x298   : > { %1173 = vadd.xlane.f32.xlu1 %v1172_v25  ;;  %v4524_v25 = vunpack.i.l.bf16 %v4523_v5 }
 0x299   : > { %v6439_v23 = vpop.trf.xlu1  ;;  %v4538_v57 = vpop.trf.xlu0 }
 0x29a   : > { %v4539_v46 = vunpack.i.l.bf16 %v4538_v57  ;;  %v4542_v53 = vunpack.i.h.bf16 %v4538_v57  ;;  %v1539_v11 = vpack.c.bf16 %v4529_v17, %v4524_v25  ;;  %v4507_v17 = vunpack.i.h.bf16 %v6379_v32 }
 0x29b   : > { %v4489_v25 = vunpack.i.l.bf16 %v6351_v1 }
 0x29c   : > { %1176 = vadd.xlane.f32.xlu1 %v1175_v28  ;;  %v1540_v28 = vpack.c.bf16 %v4539_v46, %v4534_v48  ;;  %v1532_v4 = vpack.c.bf16 %v4542_v53, %v4537_v63  ;;  %v4504_v53 = vunpack.i.l.bf16 %v6379_v32  ;;  %v4509_v63 = vunpack.i.l.bf16 %v6391_v2 }
 0x29d   : > { %v6443_v21 = vpop.trf.xlu1  ;;  %v4543_v13 = vpop.trf.xlu0 }
 0x29e   : > { %v4544_v45 = vunpack.i.l.bf16 %v4543_v13  ;;  %v4547_v16 = vunpack.i.h.bf16 %v4543_v13  ;;  %v4514_v13 = vunpack.i.l.bf16 %v6401_v7 }
 0x2a1   : > { %v6445_v15 = vpop.trf.xlu1  ;;  %v4548_v19 = vpop.trf.xlu0 }
 0x2a2   : > { %v4549_v50 = vunpack.i.l.bf16 %v4548_v19  ;;  %v4552_v31 = vunpack.i.h.bf16 %v4548_v19 }
 0x2a4   : > { %v1541_v14 = vpack.c.bf16 %v4549_v50, %v4544_v45  ;;  %v1533_v10 = vpack.c.bf16 %v4552_v31, %v4547_v16  ;;  %v4517_v50 = vunpack.i.h.bf16 %v6401_v7  ;;  %v4522_v31 = vunpack.i.h.bf16 %v6407_v40 }
 0x2a5   : > { %v4581_v49 = vpop.trf.xlu1  ;;  %v1531_v16 = vpack.c.bf16 %v4532_v37, %v4527_v8  ;;  %v4494_v8 = vunpack.i.l.bf16 %v6359_v0 }
 0x2a6   : > { %4180 = vmatprep.subr.bf16.mxu1 %v1541_v14  ;;  %v4585_v9 = vunpack.i.h.bf16 %v4581_v49  ;;  %v4582_v12 = vunpack.i.l.bf16 %v4581_v49  ;;  %v1538_v14 = vpack.c.bf16 %v4519_v29, %v4514_v13  ;;  %v4512_v49 = vunpack.i.h.bf16 %v6391_v2 }
 0x2a7   : > { %4181 = vmatpush3.bf16.msra.mxu1 %v1533_v10  ;;  %v4497_v10 = vunpack.i.h.bf16 %v6359_v0  ;;  %v4502_v29 = vunpack.i.h.bf16 %v6370_v60 }
 0x2a8   : > { %4182 = vmatprep.subr.bf16.mxu1 %v1540_v28  ;;  %v1529_v32 = vpack.c.bf16 %v4512_v49, %v4507_v17 }
 0x2a9   : > { %v4586_v19 = vpop.trf.xlu1 }
 0x2aa   : > { %v4590_v57 = vunpack.i.h.bf16 %v4586_v19  ;;  %v4587_v52 = vunpack.i.l.bf16 %v4586_v19  ;;  %v4484_v19 = vunpack.i.l.bf16 %v6348_v35 }
 0x2ab   : > { %4183 = vmatpush3.bf16.msra.mxu1 %v1532_v4  ;;  %v1530_v4 = vpack.c.bf16 %v4522_v31, %v4517_v50 }
 0x2ac   : > { %v6451_v46 = vpack.c.bf16 %v4587_v52, %v4582_v12  ;;  %v6453_v48 = vpack.c.bf16 %v4590_v57, %v4585_v9  ;;  %4184 = vmatprep.subr.bf16.mxu1 %v1539_v11  ;;  %v4499_v9 = vunpack.i.l.bf16 %v6370_v60  ;;  %v1537_v52 = vpack.c.bf16 %v4509_v63, %v4504_v53 }
 0x2ad   : > { %v4591_v44 = vpop.trf.xlu1  ;;  %v4492_v11 = vunpack.i.h.bf16 %v6351_v1  ;;  %v4487_v57 = vunpack.i.h.bf16 %v6348_v35  ;;  %v1528_v60 = vpack.c.bf16 %v4502_v29, %v4497_v10  ;;  %v4479_v53 = vunpack.i.l.bf16 %v6344_v38 }
 0x2ae   : > { %v4595_v7 = vunpack.i.h.bf16 %v4591_v44  ;;  %v4592_v5 = vunpack.i.l.bf16 %v4591_v44  ;;  %v1536_v13 = vpack.c.bf16 %v4499_v9, %v4494_v8  ;;  %v4474_v63 = vunpack.i.l.bf16 %v6340_v30  ;;  %v691_v44 = vpop.f32.mrf.mxu0 }
 0x2af   : > { %4185 = vmatpush3.bf16.msra.mxu1 %v1531_v16  ;;  %v1535_v16 = vpack.c.bf16 %v4489_v25, %v4484_v19  ;;  %v1527_v49 = vpack.c.bf16 %v4492_v11, %v4487_v57  ;;  %v4482_v1 = vunpack.i.h.bf16 %v6344_v38  ;;  %v4477_v35 = vunpack.i.h.bf16 %v6340_v30 }
 0x2b0   : > { %4186 = vmatprep.subr.bf16.mxu1 %v1538_v14  ;;  %v1534_v8 = vpack.c.bf16 %v4479_v53, %v4474_v63  ;;  %v693_v9 = vpop.f32.mrf.mxu0 }
 0x2b1   : > { %v4596_v12 = vpop.trf.xlu1 }
 0x2b2   : > { %v4600_v40 = vunpack.i.h.bf16 %v4596_v12  ;;  %v4597_v37 = vunpack.i.l.bf16 %v4596_v12  ;;  %v695_v10 = vpop.f32.mrf.mxu0 }
 0x2b3   : > { %4187 = vmatpush3.bf16.msra.mxu1 %v1530_v4 }
 0x2b4   : > { %v6463_v2 = vpack.c.bf16 %v4597_v37, %v4592_v5  ;;  %v6465_v45 = vpack.c.bf16 %v4600_v40, %v4595_v7  ;;  %4188 = vmatprep.subr.bf16.mxu1 %v1537_v52  ;;  %v1526_v40 = vpack.c.bf16 %v4482_v1, %v4477_v35 }
 0x2b5   : > { %v4601_v28 = vpop.trf.xlu1 }
 0x2b6   : > { %v4605_v0 = vunpack.i.h.bf16 %v4601_v28  ;;  %v4602_v50 = vunpack.i.l.bf16 %v4601_v28  ;;  %v697_v28 = vpop.f32.mrf.mxu0 }
 0x2b7   : > { %4189 = vmatpush3.bf16.msra.mxu1 %v1529_v32 }
 0x2b8   : > { %4190 = vmatprep.subr.bf16.mxu1 %v1536_v13  ;;  %v701_v57 = vpop.f32.mrf.mxu0 }
 0x2b9   : > { %v4606_v31 = vpop.trf.xlu1 }
 0x2ba   : > { %v4610_v14 = vunpack.i.h.bf16 %v4606_v31  ;;  %v4607_v17 = vunpack.i.l.bf16 %v4606_v31  ;;  %v703_v63 = vpop.f32.mrf.mxu0 }
 0x2bb   : > { %4191 = vmatpush3.bf16.msra.mxu1 %v1528_v60 }
 0x2bc   : > { %v6475_v7 = vpack.c.bf16 %v4607_v17, %v4602_v50  ;;  %v6477_v5 = vpack.c.bf16 %v4610_v14, %v4605_v0  ;;  %4192 = vmatprep.subr.bf16.mxu1 %v1535_v16  ;;  %v4729_v16 = vpack.i.bf16 %v691_v44, %v693_v9  ;;  %v705_v35 = vpop.f32.mrf.mxu0  ;;  %v1070_v44 = vsub.f32 %v6222_v41, %v6384_v36 }
 0x2bd   : > { %v4611_v4 = vpop.trf.xlu1  ;;  %v1071_v9 = vsub.f32 %v6238_v3, %v6384_v36  ;;  %v1077_v3 = vsub.f32 %v6276_v54, %v6423_v18 }
 0x2be   : > { %v4615_v12 = vunpack.i.h.bf16 %v4611_v4  ;;  %v4612_v52 = vunpack.i.l.bf16 %v4611_v4 }
 0x2bf   : > { %4193 = vmatpush3.bf16.msra.mxu1 %v1527_v49  ;;  %v4731_v49 = vpack.i.bf16 %v695_v10, %v697_v28  ;;  %v1126_v10 = vmul.f32 1.442695, %v1070_v44  ;;  %v1075_v28 = vsub.f32 %v6270_v26, %v6415_v56  ;;  %v1072_v44 = vsub.f32 %v6246_v20, %v6396_v27 }
 0x2c0   : > { %4194 = vmatprep.subr.bf16.mxu1 %v1534_v8 }
 0x2c1   : > { %v4616_v37 = vpop.trf.xlu1  ;;  %5300 = vpow2.f32 %v1126_v10  ;;  %v1136_v41 = vmul.f32 1.442695, %v1075_v28 }
 0x2c2   : > { %v4620_v29 = vunpack.i.h.bf16 %v4616_v37  ;;  %v4617_v32 = vunpack.i.l.bf16 %v4616_v37  ;;  %v707_v37 = vpop.f32.mrf.mxu0 }
 0x2c3   : > { %4195 = vmatpush3.bf16.msra.mxu1 %v1526_v40  ;;  %v4733_v40 = vpack.i.bf16 %v701_v57, %v703_v63 }
 0x2c4   : > { %v6479_v38 = vpack.c.bf16 %v4617_v32, %v4612_v52  ;;  %v6481_v30 = vpack.c.bf16 %v4620_v29, %v4615_v12  ;;  %v4735_v29 = vpack.i.bf16 %v705_v35, %v707_v37  ;;  %v1074_v32 = vsub.f32 %v6268_v24, %v6415_v56 }
 0x2c5   : > { %v4621_v25 = vpop.trf.xlu1 }
 0x2c6   : > { %v4625_v13 = vunpack.i.h.bf16 %v4621_v25  ;;  %v4622_v19 = vunpack.i.l.bf16 %v4621_v25  ;;  %v1128_v25 = vmul.f32 1.442695, %v1071_v9  ;;  %v1073_v9 = vsub.f32 %v6260_v42, %v6396_v27 }
 0x2c8   : > { %5302 = vpow2.f32 %v1128_v25  ;;  %v1132_v20 = vmul.f32 1.442695, %v1073_v9 }
 0x2c9   : > { %v4626_v11 = vpop.trf.xlu1 }
 0x2ca   : > { %v4630_v0 = vunpack.i.h.bf16 %v4626_v11  ;;  %v4627_v50 = vunpack.i.l.bf16 %v4626_v11  ;;  %v1140_v11 = vmul.f32 1.442695, %v1077_v3 }
 0x2cc   : > { %v6483_v60 = vpack.c.bf16 %v4627_v50, %v4622_v19  ;;  %v6485_v31 = vpack.c.bf16 %v4630_v0, %v4625_v13  ;;  %v1134_v13 = vmul.f32 1.442695, %v1074_v32  ;;  %v1076_v19 = vsub.f32 %v6274_v59, %v6423_v18 }
 0x2cd   : > { %v4631_v53 = vpop.trf.xlu1 }
 0x2ce   : > { %v4635_v14 = vunpack.i.h.bf16 %v4631_v53  ;;  %v4632_v17 = vunpack.i.l.bf16 %v4631_v53  ;;  %5304 = vpow2.f32 %v1134_v13  ;;  %v1138_v36 = vmul.f32 1.442695, %v1076_v19  ;;  %v6501_v24 = vpop.eup %5300 }
 0x2cf   : > { %4730 = vxpose.xlu1.b32.start [1/4] (short) %v4729_v16, 128  ;;  %5306 = vpow2.f32 %v1136_v41 }
 0x2d0   : > { %5308 = vpow2.f32 %v1138_v36  ;;  %v1130_v36 = vmul.f32 1.442695, %v1072_v44 }
 0x2d1   : > { %v4636_v1 = vpop.trf.xlu1  ;;  %5310 = vpow2.f32 %v1140_v11 }
 0x2d2   : > { %v4640_v4 = vunpack.i.h.bf16 %v4636_v1  ;;  %v4637_v8 = vunpack.i.l.bf16 %v4636_v1 }
 0x2d3   : > { %4732 = vxpose.xlu1.b32.cont [2/4] (short) %v4731_v49, 128 }
 0x2d4   : > { %v1557_v12 = vpack.c.bf16 %v4637_v8, %v4632_v17  ;;  %v6487_v52 = vpack.c.bf16 %v4640_v4, %v4635_v14 }
 0x2d5   : > { %v6503_v57 = vpop.eup %5302 }
 0x2d6   : > { %4208 = vmatprep.subr.bf16.mxu1 %v1557_v12  ;;  %v1178_v59 = vadd.f32 %v6503_v57, %v6501_v24 }
 0x2d7   : > { %4734 = vxpose.xlu1.b32.cont [3/4] (short) %v4733_v40, 128 }
 0x2db   : > { %4736 = vxpose.xlu1.b32.end [4/4] (short) %v4735_v29, 128  ;;  %v6505_v26 = vpop.eup %5304  ;;  %v1150_v50 = vpop.xlane.xlu0 %1149 }
 0x2dc   : > { %v6509_v56 = vpop.eup %5306 }
 0x2dd   : > { %v6511_v0 = vpop.eup %5308  ;;  %v1184_v54 = vadd.f32 %v6509_v56, %v6505_v26 }
 0x2de   : > { %v6515_v18 = vpop.eup %5310 }
 0x2df   : > { %v1187_v16 = vadd.f32 %v6515_v18, %v6511_v0 }
 0x2e2   : > { %v1156_v53 = vpop.xlane.xlu0 %1155 }
 0x2e6   : > { %v1159_v63 = vpop.xlane.xlu0 %1158 }
 0x2f3   : > { %1179 = vadd.xlane.f32.xlu0 %v1178_v59 }
 0x2f7   : > { %1185 = vadd.xlane.f32.xlu0 %v1184_v54 }
 0x2fb   : > { %1188 = vadd.xlane.f32.xlu0 %v1187_v16 }
 0x305   : > { %v1144_v14 = vpop.xlane.xlu1 %1143 }
 0x306   : > { %v6519_v17 = vpop.trf.xlu0  ;;  %5312 = vrcp.f32 %v1144_v14 }
 0x309   : > { %v1147_v49 = vpop.xlane.xlu1 %1146 }
 0x30a   : > { %v6521_v1 = vpop.trf.xlu0  ;;  %5314 = vrcp.f32 %v1147_v49  ;;  %v4567_v49 = vunpack.i.l.bf16 %v6439_v23 }
 0x30b   : > { %5316 = vrcp.f32 %v1150_v50 }
 0x30d   : > { %v1153_v35 = vpop.xlane.xlu1 %1152 }
 0x30e   : > { %v6523_v4 = vpop.trf.xlu0  ;;  %5318 = vrcp.f32 %v1153_v35  ;;  %v4562_v35 = vunpack.i.l.bf16 %v6431_v55 }
 0x30f   : > { %5320 = vrcp.f32 %v1159_v63 }
 0x310   : > { %5322 = vrcp.f32 %v1156_v53 }
 0x311   : > { %v1162_v11 = vpop.xlane.xlu1 %1161  ;;  %5324 = vpow2.f32 %v1130_v36 }
 0x312   : > { %v6525_v8 = vpop.trf.xlu0  ;;  %5326 = vpow2.f32 %v1132_v20  ;;  %v7990_v20 = vld [vmem:[#allocation67_spill] sm:$0xff] }
 0x313   : > { %v5313_v12 = vpop.eup %5312 }
 0x314   : > { %v1207_v29 = vmul.f32 %v5313_v12, %v6361_v61  ;;  %v1206_v32 = vmul.f32 %v5313_v12, %v6356_v51 }
 0x316   : > { %v6527_v40 = vpop.trf.xlu0 }
 0x317   : > { %v5315_v37 = vpop.eup %5314 }
 0x318   : > { %v1209_v10 = vmul.f32 %v5315_v37, %v6372_v6  ;;  %v1208_v25 = vmul.f32 %v5315_v37, %v6365_v58  ;;  %v5317_v28 = vpop.eup %5316  ;;  %v1550_v37 = vpack.c.bf16 %v4567_v49, %v4562_v35 }
 0x319   : > { %v1211_v42 = vmul.f32 %v5317_v28, %v6320_v47  ;;  %v1165_v47 = vpop.xlane.xlu1 %1164 }
 0x31a   : > { %v6537_v13 = vpop.trf.xlu0  ;;  %v1255_v19 = vpack.c.bf16 %v1209_v10, %v1207_v29  ;;  %v1254_v41 = vpack.c.bf16 %v1208_v25, %v1206_v32  ;;  %5328 = vrcp.f32 %v1165_v47  ;;  %v7987_v32 = vld [vmem:[#allocation68_spill] sm:$0xff] }
 0x31b   : > { %v5319_v3 = vpop.eup %5318  ;;  %5330 = vrcp.f32 %v1162_v11 }
 0x31c   : > { %1622 = vmatprep.mubr.bf16.mxu1 %v1255_v19  ;;  %v1213_v61 = vmul.f32 %v5319_v3, %v6381_v33  ;;  %v5321_v27 = vpop.eup %5320  ;;  %v1212_v59 = vmul.f32 %v5319_v3, %v6374_v34  ;;  %v1210_v33 = vmul.f32 %v5317_v28, %v6318_v22  ;;  %v7988_v28 = vld [vmem:[#allocation64_spill] sm:$0xff] }
 0x31d   : > { %1623 = vmatmul.mubr.bf16.vlgmr.msra.gmra.mxu1 %v1254_v41  ;;  %v5323_v58 = vpop.eup %5322  ;;  %v1217_v54 = vmul.f32 %v5321_v27, %v6332_v62  ;;  %v1168_v62 = vpop.xlane.xlu1 %1167  ;;  %v1216_v29 = vmul.f32 %v5321_v27, %v6330_v43  ;;  %v7989_v41 = vld [vmem:[#allocation66_spill] sm:$0xff]  ;;  %v7991_v43 = vld [vmem:[#allocation65_spill] sm:$0xff] }
 0x31e   : > { %v6541_v6 = vpop.trf.xlu0  ;;  %4209 = vmatpush3.bf16.msra.mxu1 %v6487_v52  ;;  %v1257_v51 = vpack.c.bf16 %v1213_v61, %v1211_v42  ;;  %v1215_v52 = vmul.f32 %v5323_v58, %v6326_v39  ;;  %v1256_v16 = vpack.c.bf16 %v1212_v59, %v1210_v33  ;;  %v6561_v39 = vpop.eup %5324 }
 0x31f   : > { %4210 = vmatprep.subr.bf16.mxu1 %v6483_v60  ;;  %v6563_v34 = vpop.eup %5326 }
 0x320   : > { %1630 = vmatprep.mubr.bf16.mxu1 %v1257_v51  ;;  %v1259_v53 = vpack.c.bf16 %v1217_v54, %v1215_v52  ;;  %v7992_v51 = vld [vmem:[#allocation72_spill] sm:$0xff] }
 0x322   : > { %v6548_v50 = vpop.trf.xlu0  ;;  %4211 = vmatpush3.bf16.msra.mxu1 %v6485_v31  ;;  %v1171_v31 = vpop.xlane.xlu1 %1170 }
 0x323   : > { %4212 = vmatprep.subr.bf16.mxu1 %v6479_v38  ;;  %v4577_v38 = vunpack.i.l.bf16 %v6445_v15  ;;  %5332 = vrcp.f32 %v1171_v31 }
 0x324   : > { %5334 = vrcp.f32 %v1168_v62  ;;  %v7993_v62 = vld [vmem:[#allocation70_spill] sm:$0xff] }
 0x325   : > { %1631 = vmatmul.mubr.bf16.gmra.mxu1 %v1256_v16 }
 0x326   : > { %v6553_v60 = vpop.trf.xlu0  ;;  %4213 = vmatpush3.bf16.msra.mxu1 %v6481_v30  ;;  %1671 = vmatprep.mubr.bf16.mxu1 %v1259_v53  ;;  %v4572_v30 = vunpack.i.l.bf16 %v6443_v21  ;;  %v1174_v59 = vpop.xlane.xlu1 %1173 }
 0x327   : > { %4214 = vmatprep.subr.bf16.mxu1 %v6475_v7  ;;  %v4575_v7 = vunpack.i.h.bf16 %v6443_v21  ;;  %v4565_v21 = vunpack.i.h.bf16 %v6431_v55 }
 0x328   : > { %v1551_v14 = vpack.c.bf16 %v4577_v38, %v4572_v30 }
 0x32a   : > { %v6557_v22 = vpop.trf.xlu0  ;;  %4215 = vmatpush3.bf16.msra.mxu1 %v6477_v5  ;;  %v4580_v5 = vunpack.i.h.bf16 %v6445_v15  ;;  %v4570_v15 = vunpack.i.h.bf16 %v6439_v23 }
 0x32b   : > { %4216 = vmatprep.subr.bf16.mxu1 %v6463_v2  ;;  %v1181_v2 = vadd.f32 %v6563_v34, %v6561_v39 }
 0x32c   : > { %v1542_v10 = vpack.c.bf16 %v4570_v15, %v4565_v21 }
 0x32e   : > { %v6567_v63 = vpop.trf.xlu0  ;;  %4217 = vmatpush3.bf16.msra.mxu1 %v6465_v45  ;;  %v5329_v45 = vpop.eup %5328 }
 0x32f   : > { %4218 = vmatprep.subr.bf16.mxu1 %v6451_v46  ;;  %v1543_v46 = vpack.c.bf16 %v4580_v5, %v4575_v7  ;;  %v5331_v9 = vpop.eup %5330  ;;  %v1221_v25 = vmul.f32 %v5329_v45, %v7987_v32  ;;  %v1220_v42 = vmul.f32 %v5329_v45, %v7990_v20  ;;  %v4700_v7 = vunpack.i.l.bf16 %v6567_v63 }
 0x330   : > { %v1219_v55 = vmul.f32 %v5331_v9, %v7989_v41  ;;  %v6586_v36 = vpop.eup %5332  ;;  %v1218_v27 = vmul.f32 %v5331_v9, %v7991_v43  ;;  %v4703_v45 = vunpack.i.h.bf16 %v6567_v63  ;;  %v4693_v32 = vunpack.i.h.bf16 %v6553_v60 }
 0x331   : > { %v6589_v61 = vpop.eup %5334  ;;  %v4680_v63 = vunpack.i.l.bf16 %v6541_v6  ;;  %v4683_v41 = vunpack.i.h.bf16 %v6541_v6  ;;  %v4673_v20 = vunpack.i.h.bf16 %v6527_v40 }
 0x332   : > { %v6577_v12 = vpop.trf.xlu0  ;;  %4219 = vmatpush3.bf16.msra.mxu1 %v6453_v48  ;;  %1182 = vadd.xlane.f32.xlu1 %v1181_v2  ;;  %v1214_v48 = vmul.f32 %v5323_v58, %v7988_v28  ;;  %v1261_v23 = vpack.c.bf16 %v1221_v25, %v1219_v55  ;;  %v1225_v58 = vmul.f32 %v6586_v36, %v7992_v51  ;;  %v4698_v28 = vunpack.i.h.bf16 %v6557_v22 }
 0x333   : > { %4220 = vmatprep.subr.bf16.mxu1 %v1551_v14  ;;  %v1260_v53 = vpack.c.bf16 %v1220_v42, %v1218_v27  ;;  %v1223_v38 = vmul.f32 %v6589_v61, %v7993_v62  ;;  %v4705_v49 = vunpack.i.l.bf16 %v6577_v12  ;;  %v4678_v42 = vunpack.i.h.bf16 %v6537_v13 }
 0x334   : > { %v1258_v3 = vpack.c.bf16 %v1216_v29, %v1214_v48  ;;  %v4690_v29 = vunpack.i.l.bf16 %v6553_v60  ;;  %v1562_v60 = vpack.c.bf16 %v4698_v28, %v4693_v32  ;;  %v4660_v51 = vunpack.i.l.bf16 %v6523_v4 }
 0x335   : > { %v1263_v14 = vpack.c.bf16 %v1225_v58, %v1223_v38 }
 0x336   : > { %v4709_v44 = vpop.trf.xlu0  ;;  %4221 = vmatpush3.bf16.msra.mxu1 %v1543_v46  ;;  %v1177_v46 = vpop.xlane.xlu1 %1176 }
 0x337   : > { %4222 = vmatprep.subr.bf16.mxu1 %v1550_v37  ;;  %v4710_v54 = vunpack.i.l.bf16 %v4709_v44  ;;  %v4713_v5 = vunpack.i.h.bf16 %v4709_v44  ;;  %v4708_v37 = vunpack.i.h.bf16 %v6577_v12  ;;  %v4695_v44 = vunpack.i.l.bf16 %v6557_v22 }
 0x338   : > { %v4685_v12 = vunpack.i.l.bf16 %v6548_v50  ;;  %v4675_v22 = vunpack.i.l.bf16 %v6537_v13  ;;  %5336 = vrcp.f32 %v1177_v46  ;;  %v4668_v13 = vunpack.i.h.bf16 %v6525_v8 }
 0x339   : > { %v1563_v48 = vpack.c.bf16 %v4708_v37, %v4703_v45  ;;  %5338 = vrcp.f32 %v1174_v59  ;;  %v4655_v59 = vunpack.i.l.bf16 %v6521_v1  ;;  %v7998_v37 = vld [vmem:[#allocation75_spill] sm:$0xff] }
 0x33a   : > { %v4714_v19 = vpop.trf.xlu0  ;;  %4223 = vmatpush3.bf16.msra.mxu1 %v1542_v10  ;;  %v1571_v10 = vpack.c.bf16 %v4705_v49, %v4700_v7 }
 0x33b   : > { %v4715_v47 = vunpack.i.l.bf16 %v4714_v19  ;;  %v4718_v2 = vunpack.i.h.bf16 %v4714_v19  ;;  %v1570_v19 = vpack.c.bf16 %v4695_v44, %v4690_v29 }
 0x33d   : > { %1672 = vmatmul.mubr.bf16.vlgmr.msra.gmra.mxu1 %v1258_v3  ;;  %v1572_v15 = vpack.c.bf16 %v4715_v47, %v4710_v54  ;;  %v1564_v9 = vpack.c.bf16 %v4718_v2, %v4713_v5  ;;  %v4688_v3 = vunpack.i.h.bf16 %v6548_v50  ;;  %v4665_v50 = vunpack.i.l.bf16 %v6525_v8  ;;  %v7994_v8 = vld [vmem:[#allocation71_spill] sm:$0xff]  ;;  %v7995_v2 = vld [vmem:[#allocation76_spill] sm:$0xff] }
 0x33e   : > { %v4719_v11 = vpop.trf.xlu0  ;;  %1679 = vmatprep.mubr.bf16.mxu1 %v1261_v23  ;;  %v4670_v23 = vunpack.i.l.bf16 %v6527_v40  ;;  %v1560_v54 = vpack.c.bf16 %v4678_v42, %v4673_v20  ;;  %v4663_v40 = vunpack.i.h.bf16 %v6523_v4  ;;  %v1224_v7 = vmul.f32 %v6586_v36, %v7994_v8  ;;  %v7999_v36 = vld [vmem:[#allocation73_spill] sm:$0xff] }
 0x33f   : > { %v4723_v33 = vunpack.i.h.bf16 %v4719_v11  ;;  %v4720_v52 = vunpack.i.l.bf16 %v4719_v11  ;;  %v1569_v11 = vpack.c.bf16 %v4685_v12, %v4680_v63  ;;  %v1561_v6 = vpack.c.bf16 %v4688_v3, %v4683_v41 }
 0x340   : > { %v1568_v27 = vpack.c.bf16 %v4675_v22, %v4670_v23  ;;  %v1567_v47 = vpack.c.bf16 %v4665_v50, %v4660_v51  ;;  %v1559_v62 = vpack.c.bf16 %v4668_v13, %v4663_v40 }
 0x342   : > { %v4724_v16 = vpop.trf.xlu0 }
 0x343   : > { %v4728_v31 = vunpack.i.h.bf16 %v4724_v16  ;;  %v4725_v30 = vunpack.i.l.bf16 %v4724_v16  ;;  %v4653_v16 = vunpack.i.h.bf16 %v6519_v17 }
 0x345   : > { %1680 = vmatmul.mubr.bf16.gmra.mxu1 %v1260_v53  ;;  %v1573_v35 = vpack.c.bf16 %v4725_v30, %v4720_v52  ;;  %v1565_v21 = vpack.c.bf16 %v4728_v31, %v4723_v33  ;;  %v4650_v52 = vunpack.i.l.bf16 %v6519_v17  ;;  %v4658_v53 = vunpack.i.h.bf16 %v6521_v1  ;;  %v5337_v38 = vpop.eup %5336  ;;  %v7997_v1 = vld [vmem:[#allocation74_spill] sm:$0xff] }
 0x346   : > { %1720 = vmatprep.mubr.bf16.mxu1 %v1263_v14  ;;  %v5339_v4 = vpop.eup %5338  ;;  %v1229_v14 = vmul.f32 %v5337_v38, %v7995_v2 }
 0x347   : > { %4236 = vmatprep.subr.bf16.mxu1 %v1573_v35  ;;  %v1566_v30 = vpack.c.bf16 %v4655_v59, %v4650_v52  ;;  %v1558_v5 = vpack.c.bf16 %v4658_v53, %v4653_v16  ;;  %v7996_v35 = vld [vmem:[#allocation69_spill] sm:$0xff]  ;;  %v1226_v44 = vmul.f32 %v5339_v4, %v7999_v36 }
 0x348   : > { %4237 = vmatpush3.bf16.msra.mxu1 %v1565_v21  ;;  %v1222_v17 = vmul.f32 %v6589_v61, %v7996_v35  ;;  %v1227_v21 = vmul.f32 %v5339_v4, %v7997_v1 }
 0x349   : > { %4238 = vmatprep.subr.bf16.mxu1 %v1572_v15 }
 0x34a   : > { %v1262_v15 = vpack.c.bf16 %v1224_v7, %v1222_v17  ;;  %v1265_v46 = vpack.c.bf16 %v1229_v14, %v1227_v21 }
 0x34b   : > { %v6603_v25 = vpop.trf.xlu1 }
 0x34c   : > { %4239 = vmatpush3.bf16.msra.mxu1 %v1564_v9  ;;  %v1228_v9 = vmul.f32 %v5337_v38, %v7998_v37 }
 0x34d   : > { %4240 = vmatprep.subr.bf16.mxu1 %v1571_v10 }
 0x34e   : > { %v1264_v10 = vpack.c.bf16 %v1228_v9, %v1226_v44 }
 0x34f   : > { %v6609_v55 = vpop.trf.xlu1 }
 0x350   : > { %4241 = vmatpush3.bf16.msra.mxu1 %v1563_v48  ;;  %v4743_v44 = vunpack.i.l.bf16 %v6609_v55 }
 0x351   : > { %4242 = vmatprep.subr.bf16.mxu1 %v1570_v19 }
 0x353   : > { %v6616_v43 = vpop.trf.xlu1 }
 0x354   : > { %4243 = vmatpush3.bf16.msra.mxu1 %v1562_v60  ;;  %v4748_v9 = vunpack.i.l.bf16 %v6616_v43 }
 0x355   : > { %4244 = vmatprep.subr.bf16.mxu1 %v1569_v11 }
 0x357   : > { %v6620_v58 = vpop.trf.xlu1 }
 0x358   : > { %4245 = vmatpush3.bf16.msra.mxu1 %v1561_v6 }
 0x359   : > { %4246 = vmatprep.subr.bf16.mxu1 %v1568_v27 }
 0x35b   : > { %v6624_v33 = vpop.trf.xlu1 }
 0x35c   : > { %4247 = vmatpush3.bf16.msra.mxu1 %v1560_v54  ;;  %v4758_v14 = vunpack.i.l.bf16 %v6624_v33  ;;  %v4761_v1 = vunpack.i.h.bf16 %v6624_v33  ;;  %v4738_v33 = vunpack.i.l.bf16 %v6603_v25 }
 0x35d   : > { %4248 = vmatprep.subr.bf16.mxu1 %v1567_v47 }
 0x35f   : > { %v6630_v31 = vpop.trf.xlu1 }
 0x360   : > { %4249 = vmatpush3.bf16.msra.mxu1 %v1559_v62  ;;  %v4763_v35 = vunpack.i.l.bf16 %v6630_v31  ;;  %v4766_v21 = vunpack.i.h.bf16 %v6630_v31  ;;  %v4741_v31 = vunpack.i.h.bf16 %v6603_v25 }
 0x361   : > { %4250 = vmatprep.subr.bf16.mxu1 %v1566_v30 }
 0x362   : > { %v1584_v37 = vpack.c.bf16 %v4763_v35, %v4758_v14 }
 0x363   : > { %v6635_v49 = vpop.trf.xlu1 }
 0x364   : > { %4251 = vmatpush3.bf16.msra.mxu1 %v1558_v5  ;;  %v4768_v30 = vunpack.i.l.bf16 %v6635_v49  ;;  %v4771_v7 = vunpack.i.h.bf16 %v6635_v49  ;;  %v4751_v49 = vunpack.i.h.bf16 %v6616_v43  ;;  %v8000_v43 = vld [vmem:[#allocation35_spill] sm:$0xff] }
 0x367   : > { %1721 = vmatmul.mubr.bf16.vlgmr.msra.gmra.mxu1 %v1262_v15  ;;  %v4772_v45 = vpop.trf.xlu1 }
 0x368   : > { %1728 = vmatprep.mubr.bf16.mxu1 %v1265_v46  ;;  %v4773_v4 = vunpack.i.l.bf16 %v4772_v45  ;;  %v4776_v5 = vunpack.i.h.bf16 %v4772_v45  ;;  %v4753_v46 = vunpack.i.l.bf16 %v6620_v58  ;;  %v4756_v45 = vunpack.i.h.bf16 %v6620_v58  ;;  %v8001_v58 = vld [vmem:[#allocation34_spill] sm:$0xff] }
 0x36a   : > { %v1585_v17 = vpack.c.bf16 %v4773_v4, %v4768_v30  ;;  %v1577_v15 = vpack.c.bf16 %v4776_v5, %v4771_v7  ;;  %v1583_v36 = vpack.c.bf16 %v4753_v46, %v4748_v9 }
 0x36b   : > { %v4777_v29 = vpop.trf.xlu1 }
 0x36c   : > { %v4778_v52 = vunpack.i.l.bf16 %v4777_v29  ;;  %v4781_v62 = vunpack.i.h.bf16 %v4777_v29  ;;  %v1576_v29 = vpack.c.bf16 %v4766_v21, %v4761_v1 }
 0x36f   : > { %1729 = vmatmul.mubr.bf16.gmra.mxu1 %v1264_v10  ;;  %v4782_v32 = vpop.trf.xlu1  ;;  %v4746_v10 = vunpack.i.h.bf16 %v6609_v55 }
 0x370   : > { %v4783_v16 = vunpack.i.l.bf16 %v4782_v32  ;;  %v4786_v38 = vunpack.i.h.bf16 %v4782_v32  ;;  %v1575_v32 = vpack.c.bf16 %v4756_v45, %v4751_v49 }
 0x372   : > { %v1586_v8 = vpack.c.bf16 %v4783_v16, %v4778_v52  ;;  %v1578_v2 = vpack.c.bf16 %v4786_v38, %v4781_v62  ;;  %v8013_v16 = vld [vmem:[#allocation40_spill] sm:$0xff]  ;;  %v8015_v38 = vmov 0  }
 0x373   : > { %v4787_v28 = vpop.trf.xlu1 }
 0x374   : > { %v4788_v20 = vunpack.i.l.bf16 %v4787_v28  ;;  %v4791_v47 = vunpack.i.h.bf16 %v4787_v28  ;;  %v1582_v28 = vpack.c.bf16 %v4743_v44, %v4738_v33 }
 0x377   : > { %v4792_v48 = vpop.trf.xlu1 }
 0x378   : > { %v4793_v50 = vunpack.i.l.bf16 %v4792_v48  ;;  %v4796_v40 = vunpack.i.h.bf16 %v4792_v48  ;;  %v1574_v48 = vpack.c.bf16 %v4746_v10, %v4741_v31 }
 0x37a   : > { %v1587_v59 = vpack.c.bf16 %v4793_v50, %v4788_v20  ;;  %v1579_v53 = vpack.c.bf16 %v4796_v40, %v4791_v47  ;;  %v8004_v47 = vld [vmem:[#allocation32_spill] sm:$0xff] }
 0x37b   : > { %v4797_v63 = vpop.trf.xlu1 }
 0x37c   : > { %v4798_v19 = vunpack.i.l.bf16 %v4797_v63  ;;  %v4801_v42 = vunpack.i.h.bf16 %v4797_v63  ;;  %v8002_v63 = vpack.c.bf16 %v8000_v43, %v8001_v58 }
 0x37f   : > { %v4802_v61 = vpop.trf.xlu1 }
 0x380   : > { %v4803_v41 = vunpack.i.l.bf16 %v4802_v61  ;;  %v4806_v6 = vunpack.i.h.bf16 %v4802_v61  ;;  %v1180_v61 = vpop.xlane.xlu0 %1179 }
 0x381   : > { %5340 = vrcp.f32 %v1180_v61 }
 0x382   : > { %v1588_v54 = vpack.c.bf16 %v4803_v41, %v4798_v19  ;;  %v1580_v13 = vpack.c.bf16 %v4806_v6, %v4801_v42 }
 0x383   : > { %v4807_v12 = vpop.trf.xlu1 }
 0x384   : > { %v4811_v3 = vunpack.i.h.bf16 %v4807_v12  ;;  %v4808_v60 = vunpack.i.l.bf16 %v4807_v12  ;;  %v1186_v12 = vpop.xlane.xlu0 %1185 }
 0x387   : > { %v4812_v23 = vpop.trf.xlu1 }
 0x388   : > { %v4816_v22 = vunpack.i.h.bf16 %v4812_v23  ;;  %v4813_v11 = vunpack.i.l.bf16 %v4812_v23  ;;  %v1189_v19 = vpop.xlane.xlu0 %1188 }
 0x389   : > { %5342 = vrcp.f32 %v1189_v19 }
 0x38a   : > { %v1589_v27 = vpack.c.bf16 %v4813_v11, %v4808_v60  ;;  %v1581_v51 = vpack.c.bf16 %v4816_v22, %v4811_v3  ;;  %5344 = vrcp.f32 %v1186_v12 }
 0x38c   : > { %4264 = vmatprep.subr.bf16.mxu1 %v1589_v27 }
 0x38d   : > { %4265 = vmatpush3.bf16.msra.mxu1 %v1581_v51 }
 0x38e   : > { %4266 = vmatprep.subr.bf16.mxu1 %v1588_v54  ;;  %v5341_v25 = vpop.eup %5340  ;;  %v8003_v54 = vld [vmem:[#allocation33_spill] sm:$0xff] }
 0x38f   : > { %v1231_v23 = vmul.f32 %v5341_v25, %v6503_v57  ;;  %v1230_v11 = vmul.f32 %v5341_v25, %v6501_v24  ;;  %v8005_v40 = vpack.c.bf16 %v8003_v54, %v8004_v47  ;;  %v8006_v57 = vld [vmem:[#allocation37_spill] sm:$0xff]  ;;  %v8022_v47 = vld [vmem:[#allocation47_spill] sm:$0xff] }
 0x391   : > { %4267 = vmatpush3.bf16.msra.mxu1 %v1580_v13 }
 0x392   : > { %4268 = vmatprep.subr.bf16.mxu1 %v1587_v59  ;;  %v8010_v59 = vld [vmem:[#allocation38_spill] sm:$0xff] }
 0x395   : > { %4269 = vmatpush3.bf16.msra.mxu1 %v1579_v53 }
 0x396   : > { %4270 = vmatprep.subr.bf16.mxu1 %v1586_v8  ;;  %v5343_v55 = vpop.eup %5342 }
 0x397   : > { %v5345_v3 = vpop.eup %5344  ;;  %v1237_v42 = vmul.f32 %v5343_v55, %v6515_v18  ;;  %v1236_v24 = vmul.f32 %v5343_v55, %v6511_v0 }
 0x398   : > { %v1235_v27 = vmul.f32 %v5345_v3, %v6509_v56  ;;  %v1234_v18 = vmul.f32 %v5345_v3, %v6505_v26  ;;  %v8012_v56 = vld [vmem:[#allocation41_spill] sm:$0xff] }
 0x399   : > { %4271 = vmatpush3.bf16.msra.mxu1 %v1578_v2  ;;  %v8014_v53 = vpack.c.bf16 %v8012_v56, %v8013_v16  ;;  %v8031_v16 = vld [vmem:[#allocation55_spill] sm:$0xff] }
 0x39a   : > { %4272 = vmatprep.subr.bf16.mxu1 %v1585_v17  ;;  %v1269_v51 = vpack.c.bf16 %v1237_v42, %v1235_v27  ;;  %v1268_v62 = vpack.c.bf16 %v1236_v24, %v1234_v18  ;;  %v8016_v42 = vld [vmem:[#allocation44_spill] sm:$0xff]  ;;  %v8019_v27 = vld [vmem:[#allocation45_spill] sm:$0xff] }
 0x39b   : > { %v8026_v24 = vld [vmem:[#allocation52_spill] sm:$0xff] }
 0x39d   : > { %4273 = vmatpush3.bf16.msra.mxu1 %v1577_v15 }
 0x39e   : > { %4274 = vmatprep.subr.bf16.mxu1 %v1584_v37 }
 0x3a1   : > { %4275 = vmatpush3.bf16.msra.mxu1 %v1576_v29 }
 0x3a2   : > { %4276 = vmatprep.subr.bf16.mxu1 %v1583_v36 }
 0x3a5   : > { %4277 = vmatpush3.bf16.msra.mxu1 %v1575_v32 }
 0x3a6   : > { %4278 = vmatprep.subr.bf16.mxu1 %v1582_v28 }
 0x3a9   : > { %4279 = vmatpush3.bf16.msra.mxu1 %v1574_v48 }
 0x3aa   : > { %1829 = vmatprep.subr.bf16.mxu1 %v8002_v63 }
 0x3bb   : > { %v1183_v41 = vpop.xlane.xlu1 %1182 }
 0x3bc   : > { %5346 = vrcp.f32 %v1183_v41 }
 0x3c9   : > { %v5347_v60 = vpop.eup %5346 }
 0x3ca   : > { %v1233_v22 = vmul.f32 %v5347_v60, %v6563_v34  ;;  %v1232_v20 = vmul.f32 %v5347_v60, %v6561_v39  ;;  %v8007_v34 = vld [vmem:[#allocation36_spill] sm:$0xff]  ;;  %v8009_v39 = vld [vmem:[#allocation39_spill] sm:$0xff] }
 0x3cb   : > { %v8008_v13 = vpack.c.bf16 %v8006_v57, %v8007_v34  ;;  %v8011_v52 = vpack.c.bf16 %v8009_v39, %v8010_v59  ;;  %v8028_v59 = vld [vmem:[#allocation49_spill] sm:$0xff] }
 0x3cc   : > { %v1267_v6 = vpack.c.bf16 %v1233_v22, %v1231_v23  ;;  %v1266_v50 = vpack.c.bf16 %v1232_v20, %v1230_v11 }
 0x3ce   : > { %1769 = vmatprep.mubr.bf16.mxu1 %v1267_v6  ;;  %v8017_v6 = vld [vmem:[#allocation43_spill] sm:$0xff] }
 0x3cf   : > { %1770 = vmatmul.mubr.bf16.vlgmr.msra.gmra.mxu1 %v1266_v50  ;;  %v8018_v50 = vpack.c.bf16 %v8016_v42, %v8017_v6 }
 0x3d0   : > { %1830 = vmatpush1.bf16.msra.mxu1 %v8005_v40  ;;  %1777 = vmatprep.mubr.bf16.mxu1 %v1269_v51  ;;  %v8020_v51 = vld [vmem:[#allocation42_spill] sm:$0xff] }
 0x3d1   : > { %1831 = vmatprep.subr.bf16.mxu1 %v8008_v13  ;;  %v8021_v54 = vpack.c.bf16 %v8019_v27, %v8020_v51  ;;  %v8023_v40 = vld [vmem:[#allocation46_spill] sm:$0xff]  ;;  %v8025_v13 = vld [vmem:[#allocation53_spill] sm:$0xff] }
 0x3d2   : > { %v8024_v57 = vpack.c.bf16 %v8022_v47, %v8023_v40  ;;  %v8027_v18 = vpack.c.bf16 %v8025_v13, %v8026_v24 }
 0x3d4   : > { %1832 = vmatpush1.bf16.msra.mxu1 %v8011_v52  ;;  %v8029_v52 = vld [vmem:[#allocation48_spill] sm:$0xff] }
 0x3d5   : > { %1904 = vmatprep.subr.bf16.mxu1 %v8014_v53  ;;  %v8030_v56 = vpack.c.bf16 %v8028_v59, %v8029_v52  ;;  %v8032_v53 = vld [vmem:[#allocation54_spill] sm:$0xff] }
 0x3d7   : > { %1778 = vmatmul.mubr.bf16.gmra.mxu1 %v1268_v62  ;;  %v8033_v62 = vpack.c.bf16 %v8031_v16, %v8032_v53 }
 0x3d8   : > { %1849 = vmatprep.mubr.bf16.mxu1 %v8015_v38 }
 0x3dd   : > { %v4196_v30 = vpop.f32.mrf.mxu1 }
 0x3df   : > { %v4197_v4 = vpop.f32.mrf.mxu1 }
 0x3e0   : > { %v4198_v5 = vadd.f32 %v4197_v4, %v4196_v30  ;;  %v8034_v30 = vld [vmem:[#allocation51_spill] sm:$0xff]  ;;  %v8035_v4 = vld [vmem:[#allocation50_spill] sm:$0xff] }
 0x3e1   : > { %v4199_v8 = vpop.f32.mrf.mxu1 }
 0x3e3   : > { %v4200_v7 = vpop.f32.mrf.mxu1 }
 0x3e4   : > { %v4201_v0 = vadd.f32 %v4200_v7, %v4199_v8  ;;  %v8036_v8 = vpack.c.bf16 %v8034_v30, %v8035_v4 }
 0x3e5   : > { %v4202_v2 = vpop.f32.mrf.mxu1 }
 0x3e6   : > { %v1786_v26 = vpack.c.bf16 %v4201_v0, %v4198_v5  ;;  %v8037_v5 = vld [vmem:[#allocation61_spill] sm:$0xff]  ;;  %v8038_v0 = vld [vmem:[#allocation60_spill] sm:$0xff] }
 0x3e7   : > { %v4203_v14 = vpop.f32.mrf.mxu1 }
 0x3e8   : > { %1794 = vxpose.xlu0.c.b16.start [1/2] (short) (narrow) %v1786_v26, 32  ;;  %v4204_v1 = vadd.f32 %v4203_v14, %v4202_v2  ;;  %v8039_v2 = vpack.c.bf16 %v8037_v5, %v8038_v0 }
 0x3e9   : > { %v4205_v35 = vpop.f32.mrf.mxu1 }
 0x3eb   : > { %v4206_v17 = vpop.f32.mrf.mxu1 }
 0x3ec   : > { %v4207_v21 = vadd.f32 %v4206_v17, %v4205_v35 }
 0x3ee   : > { %v1787_v15 = vpack.c.bf16 %v4207_v21, %v4204_v1 }
 0x3f0   : > { %1795 = vxpose.xlu0.c.b16.end [2/2] (short) (narrow) %v1787_v15, 32 }
 0x3fd   : > { %v4224_v46 = vpop.f32.mrf.mxu1 }
 0x3ff   : > { %v4225_v37 = vpop.f32.mrf.mxu1 }
 0x400   : > { %v4226_v45 = vadd.f32 %v4225_v37, %v4224_v46 }
 0x401   : > { %v4227_v9 = vpop.f32.mrf.mxu1 }
 0x403   : > { %v4228_v49 = vpop.f32.mrf.mxu1 }
 0x404   : > { %v4229_v29 = vadd.f32 %v4228_v49, %v4227_v9  ;;  %v8040_v49 = vld [vmem:[#allocation57_spill] sm:$0xff] }
 0x405   : > { %v4230_v36 = vpop.f32.mrf.mxu1 }
 0x406   : > { %v1788_v44 = vpack.c.bf16 %v4229_v29, %v4226_v45  ;;  %v8041_v45 = vld [vmem:[#allocation56_spill] sm:$0xff] }
 0x407   : > { %v4231_v33 = vpop.f32.mrf.mxu1  ;;  %v8042_v29 = vpack.c.bf16 %v8040_v49, %v8041_v45 }
 0x408   : > { %1870 = vxpose.xlu1.c.b16.start [1/2] (short) (narrow) %v1788_v44, 32  ;;  %v4232_v32 = vadd.f32 %v4231_v33, %v4230_v36  ;;  %v8043_v36 = vld [vmem:[#allocation63_spill] sm:$0xff]  ;;  %v8044_v44 = vld [vmem:[#allocation62_spill] sm:$0xff] }
 0x409   : > { %v4233_v31 = vpop.f32.mrf.mxu1  ;;  %v8045_v33 = vpack.c.bf16 %v8043_v36, %v8044_v44  ;;  %v275_v44 = vld [vmem:[%s7787_s2] sm:$0x3] }
 0x40b   : > { %v4234_v10 = vpop.f32.mrf.mxu1 }
 0x40c   : > { %v4235_v28 = vadd.f32 %v4234_v10, %v4233_v31 }
 0x40e   : > { %v1789_v48 = vpack.c.bf16 %v4235_v28, %v4232_v32  ;;  %v8046_v28 = vld [vmem:[#allocation59_spill] sm:$0xff] }
 0x410   : > { %1871 = vxpose.xlu1.c.b16.end [2/2] (short) (narrow) %v1789_v48, 32  ;;  %v8047_v48 = vld [vmem:[#allocation58_spill] sm:$0xff] }
 0x427   : > { %v4252_v43 = vpop.f32.mrf.mxu1 }
 0x429   : > { %v4253_v58 = vpop.f32.mrf.mxu1 }
 0x42a   : > { %v4254_v12 = vadd.f32 %v4253_v58, %v4252_v43  ;;  %v8048_v43 = vpack.c.bf16 %v8046_v28, %v8047_v48  ;;  %v8052_v28 = vld [vmem:[#allocation11_spill] sm:$0xff]  ;;  %v8053_v48 = vld [vmem:[#allocation12_spill] sm:$0xff] }
 0x42b   : > { %v4255_v63 = vpop.f32.mrf.mxu1 }
 0x42d   : > { %v4256_v61 = vpop.f32.mrf.mxu1 }
 0x42e   : > { %v4257_v19 = vadd.f32 %v4256_v61, %v4255_v63 }
 0x42f   : > { %v4258_v41 = vpop.f32.mrf.mxu1 }
 0x430   : > { %v1790_v25 = vpack.c.bf16 %v4257_v19, %v4254_v12 }
 0x431   : > { %v4259_v55 = vpop.f32.mrf.mxu1 }
 0x432   : > { %1945 = vxpose.xlu0.c.b16.start [1/2] (short) (narrow) %v1790_v25, 32  ;;  %v4260_v23 = vadd.f32 %v4259_v55, %v4258_v41 }
 0x433   : > { %v4261_v3 = vpop.f32.mrf.mxu1 }
 0x435   : > { %v4262_v60 = vpop.f32.mrf.mxu1 }
 0x436   : > { %v4263_v22 = vadd.f32 %v4262_v60, %v4261_v3 }
 0x438   : > { %v1791_v11 = vpack.c.bf16 %v4263_v22, %v4260_v23 }
 0x43a   : > { %1946 = vxpose.xlu0.c.b16.end [2/2] (short) (narrow) %v1791_v11, 32 }
 0x44e   : > { %v1802_v20 = vpop.trf.xlu0 }
 0x44f   : > { %4126 = vmatmul.mubr.msk.bf16.vlgmr.msra.gmra.mxu1 %vm1810_vm2, %v1802_v20 }
 0x450   : > { %1905 = vmatpush1.bf16.msra.mxu1 %v8018_v50  ;;  %1859 = vmatprep.mubr.bf16.mxu1 %v8015_v38 }
 0x451   : > { %1906 = vmatprep.subr.bf16.mxu1 %v8021_v54 }
 0x452   : > { %v1803_v34 = vpop.trf.xlu0 }
 0x454   : > { %1907 = vmatpush1.bf16.msra.mxu1 %v8024_v57 }
 0x455   : > { %1979 = vmatprep.subr.bf16.mxu1 %v8027_v18 }
 0x457   : > { %4127 = vmatmul.mubr.msk.bf16.gmra.mxu1 %vm1810_vm2, %v1803_v34 }
 0x458   : > { %1924 = vmatprep.mubr.bf16.mxu1 %v8015_v38 }
 0x46e   : > { %v1878_v39 = vpop.trf.xlu1 }
 0x46f   : > { %4128 = vmatmul.mubr.msk.bf16.vlgmr.msra.gmra.mxu1 %vm1810_vm2, %v1878_v39 }
 0x470   : > { %1980 = vmatpush1.bf16.msra.mxu1 %v8030_v56  ;;  %1934 = vmatprep.mubr.bf16.mxu1 %v8015_v38 }
 0x471   : > { %1981 = vmatprep.subr.bf16.mxu1 %v8033_v62 }
 0x472   : > { %v1879_v7 = vpop.trf.xlu1 }
 0x474   : > { %1982 = vmatpush1.bf16.msra.mxu1 %v8036_v8 }
 0x475   : > { %2054 = vmatprep.subr.bf16.mxu1 %v8039_v2 }
 0x477   : > { %4129 = vmatmul.mubr.msk.bf16.gmra.mxu1 %vm1810_vm2, %v1879_v7 }
 0x478   : > { %1999 = vmatprep.mubr.bf16.mxu1 %v8015_v38 }
 0x48f   : > { %v4280_v26 = vpop.f32.mrf.mxu1 }
 0x491   : > { %v4281_v14 = vpop.f32.mrf.mxu1 }
 0x492   : > { %v4282_v1 = vadd.f32 %v4281_v14, %v4280_v26 }
 0x493   : > { %v4283_v35 = vpop.f32.mrf.mxu1 }
 0x495   : > { %v4284_v17 = vpop.f32.mrf.mxu1 }
 0x496   : > { %v4285_v21 = vadd.f32 %v4284_v17, %v4283_v35 }
 0x497   : > { %v4286_v15 = vpop.f32.mrf.mxu1 }
 0x498   : > { %v1792_v46 = vpack.c.bf16 %v4285_v21, %v4282_v1  ;;  %v1953_v37 = vpop.trf.xlu0 }
 0x499   : > { %4130 = vmatmul.mubr.msk.bf16.vlgmr.msra.gmra.mxu1 %vm1810_vm2, %v1953_v37  ;;  %v4287_v9 = vpop.f32.mrf.mxu1 }
 0x49a   : > { %2055 = vmatpush1.bf16.msra.mxu1 %v8042_v29  ;;  %2020 = vxpose.xlu0.c.b16.start [1/2] (short) (narrow) %v1792_v46, 32  ;;  %v4288_v32 = vadd.f32 %v4287_v9, %v4286_v15  ;;  %v4135_v29 = vld.sshfl [vmem:[%s5767_s13 + $0x4] sm:$0x33 pattern:$0x76325410] }
 0x49b   : > { %2056 = vmatprep.subr.bf16.mxu1 %v8045_v33  ;;  %v4289_v31 = vpop.f32.mrf.mxu1  ;;  %2009 = vmatprep.mubr.bf16.mxu1 %v8015_v38  ;;  %v2224_v36 = vcombine.high %v4135_v29, %v4135_v29  ;;  %v2226_v33 = vsel %vm430_vm0, %v4135_v29, 0 }
 0x49c   : > { %v1954_v63 = vpop.trf.xlu0 }
 0x49d   : > { %v4290_v10 = vpop.f32.mrf.mxu1 }
 0x49e   : > { %2057 = vmatpush1.bf16.msra.mxu1 %v8048_v43  ;;  %v4291_v58 = vadd.f32 %v4290_v10, %v4289_v31  ;;  %v8049_v31 = vld [vmem:[#allocation8_spill] sm:$0xff]  ;;  %v8050_v10 = vld [vmem:[#allocation9_spill] sm:$0xff] }
 0x49f   : > { %v8054_v43 = vld [vmem:[#allocation13_spill] sm:$0xff] }
 0x4a0   : > { %v1793_v61 = vpack.c.bf16 %v4291_v58, %v4288_v32  ;;  %v8051_v32 = vld [vmem:[#allocation10_spill] sm:$0xff] }
 0x4a1   : > { %4131 = vmatmul.mubr.msk.bf16.gmra.mxu1 %vm1810_vm2, %v1954_v63  ;;  %v8055_v58 = vld [vmem:[#allocation14_spill] sm:$0xff]  ;;  %v8056_v63 = vld [vmem:[#allocation15_spill] sm:$0xff] }
 0x4a2   : > { %2021 = vxpose.xlu0.c.b16.end [2/2] (short) (narrow) %v1793_v61, 32  ;;  %2074 = vmatprep.mubr.bf16.mxu1 %v8015_v38  ;;  %v8057_v61 = vld [vmem:[#allocation16_spill] sm:$0xff] }
 0x500   : > { %v2028_v12 = vpop.trf.xlu0 }
 0x501   : > { %4132 = vmatmul.mubr.msk.bf16.vlgmr.msra.gmra.mxu1 %vm1810_vm2, %v2028_v12  ;;  %v8058_v12 = vld [vmem:[#allocation17_spill] sm:$0xff] }
 0x502   : > { %2084 = vmatprep.mubr.bf16.mxu1 %v8015_v38 }
 0x504   : > { %v2029_v19 = vpop.trf.xlu0 }
 0x509   : > { %4133 = vmatmul.mubr.msk.bf16.gmra.mxu1 %vm1810_vm2, %v2029_v19  ;;  %v8059_v19 = vld [vmem:[#allocation18_spill] sm:$0xff] }
 0x50f   : > { %v6728_v41 = vpop.f32.mrf.mxu1 }
 0x511   : > { %v1853_v25 = vpop.f32.mrf.mxu1 }
 0x513   : > { %v6730_v55 = vpop.f32.mrf.mxu1 }
 0x514   : > { %v2095_v3 = vpack.c.bf16 %v6730_v55, %v6728_v41  ;;  %v8060_v41 = vld [vmem:[#allocation19_spill] sm:$0xff]  ;;  %v8062_v55 = vld [vmem:[#allocation21_spill] sm:$0xff] }
 0x515   : > { %v1857_v60 = vpop.f32.mrf.mxu1 }
 0x516   : > { %v2096_v23 = vpack.c.bf16 %v1857_v60, %v1853_v25  ;;  %v8061_v25 = vld [vmem:[#allocation20_spill] sm:$0xff]  ;;  %v8064_v60 = vld [vmem:[#allocation23_spill] sm:$0xff] }
 0x517   : > { %v1861_v22 = vpop.f32.mrf.mxu1 }
 0x519   : > { %v1863_v11 = vpop.f32.mrf.mxu1 }
 0x51b   : > { %v1865_v20 = vpop.f32.mrf.mxu1 }
 0x51c   : > { %v2097_v42 = vpack.c.bf16 %v1865_v20, %v1861_v22  ;;  %v8066_v22 = vld [vmem:[#allocation25_spill] sm:$0xff]  ;;  %v8068_v20 = vld [vmem:[#allocation27_spill] sm:$0xff] }
 0x51d   : > { %v1867_v6 = vpop.f32.mrf.mxu1 }
 0x51e   : > { %v2098_v50 = vpack.c.bf16 %v1867_v6, %v1863_v11  ;;  %v8067_v11 = vld [vmem:[#allocation26_spill] sm:$0xff]  ;;  %v8070_v6 = vld [vmem:[#allocation29_spill] sm:$0xff] }
 0x52f   : > { %v1926_v27 = vpop.f32.mrf.mxu1 }
 0x531   : > { %v1928_v51 = vpop.f32.mrf.mxu1 }
 0x533   : > { %v1930_v54 = vpop.f32.mrf.mxu1 }
 0x534   : > { %v2099_v45 = vpack.c.bf16 %v1930_v54, %v1926_v27 }
 0x535   : > { %v1932_v47 = vpop.f32.mrf.mxu1 }
 0x536   : > { %v2100_v49 = vpack.c.bf16 %v1932_v47, %v1928_v51  ;;  %v8073_v51 = vld [vmem:[#allocation31_spill] sm:$0xff] }
 0x537   : > { %v1936_v40 = vpop.f32.mrf.mxu1 }
 0x539   : > { %v1938_v57 = vpop.f32.mrf.mxu1 }
 0x53b   : > { %v1940_v34 = vpop.f32.mrf.mxu1 }
 0x53c   : > { %v2101_v9 = vpack.c.bf16 %v1940_v34, %v1936_v40 }
 0x53d   : > { %v1942_v13 = vpop.f32.mrf.mxu1 }
 0x53e   : > { %v2102_v37 = vpack.c.bf16 %v1942_v13, %v1938_v57 }
 0x559   : > { %v2001_v24 = vpop.f32.mrf.mxu1 }
 0x55b   : > { %v2003_v18 = vpop.f32.mrf.mxu1 }
 0x55d   : > { %v2005_v39 = vpop.f32.mrf.mxu1 }
 0x55e   : > { %v2103_v46 = vpack.c.bf16 %v2005_v39, %v2001_v24 }
 0x55f   : > { %v2007_v59 = vpop.f32.mrf.mxu1 }
 0x560   : > { %v2104_v15 = vpack.c.bf16 %v2007_v59, %v2003_v18 }
 0x561   : > { %v2011_v52 = vpop.f32.mrf.mxu1 }
 0x563   : > { %v2013_v56 = vpop.f32.mrf.mxu1 }
 0x565   : > { %v2015_v16 = vpop.f32.mrf.mxu1 }
 0x566   : > { %v2105_v21 = vpack.c.bf16 %v2015_v16, %v2011_v52 }
 0x567   : > { %v2017_v53 = vpop.f32.mrf.mxu1 }
 0x568   : > { %v2106_v1 = vpack.c.bf16 %v2017_v53, %v2013_v56 }
 0x5c1   : > { %v2076_v62 = vpop.f32.mrf.mxu1 }
 0x5c3   : > { %v2078_v30 = vpop.f32.mrf.mxu1 }
 0x5c5   : > { %v2080_v4 = vpop.f32.mrf.mxu1 }
 0x5c6   : > { %v2107_v17 = vpack.c.bf16 %v2080_v4, %v2076_v62 }
 0x5c7   : > { %v2082_v8 = vpop.f32.mrf.mxu1 }
 0x5c8   : > { %v2108_v35 = vpack.c.bf16 %v2082_v8, %v2078_v30 }
 0x5c9   : > { %v2086_v7 = vpop.f32.mrf.mxu1 }
 0x5cb   : > { %v2088_v5 = vpop.f32.mrf.mxu1 }
 0x5cd   : > { %v2090_v0 = vpop.f32.mrf.mxu1 }
 0x5ce   : > { %v2109_v14 = vpack.c.bf16 %v2090_v0, %v2086_v7 }
 0x5cf   : > { %v2092_v2 = vpop.f32.mrf.mxu1 }
 0x5d0   : > { %v2110_v26 = vpack.c.bf16 %v2092_v2, %v2088_v5 }
 0x5d2   : > { %2116 = vmatprep.subr.bf16.mxu0 %v2110_v26 }
 0x5d3   : > { %2117 = vmatpush1.bf16.msra.mxu0 %v2109_v14 }
 0x5d4   : > { %2118 = vmatprep.subr.bf16.mxu0 %v2108_v35 }
 0x5d7   : > { %2119 = vmatpush1.bf16.msra.mxu0 %v2107_v17 }
 0x5d8   : > { %2120 = vmatprep.subr.bf16.mxu0 %v2106_v1 }
 0x5db   : > { %2121 = vmatpush1.bf16.msra.mxu0 %v2105_v21 }
 0x5dc   : > { %2122 = vmatprep.subr.bf16.mxu0 %v2104_v15 }
 0x5df   : > { %2123 = vmatpush1.bf16.msra.mxu0 %v2103_v46 }
 0x5e0   : > { %2124 = vmatprep.subr.bf16.mxu0 %v2102_v37 }
 0x5e3   : > { %2125 = vmatpush1.bf16.msra.mxu0 %v2101_v9 }
 0x5e4   : > { %2126 = vmatprep.subr.bf16.mxu0 %v2100_v49 }
 0x5e7   : > { %2127 = vmatpush1.bf16.msra.mxu0 %v2099_v45 }
 0x5e8   : > { %2128 = vmatprep.subr.bf16.mxu0 %v2098_v50  ;;  %v8071_v50 = vld [vmem:[#allocation30_spill] sm:$0xff] }
 0x5eb   : > { %2129 = vmatpush1.bf16.msra.mxu0 %v2097_v42  ;;  %v8069_v42 = vld [vmem:[#allocation28_spill] sm:$0xff] }
 0x5ec   : > { %2130 = vmatprep.subr.bf16.mxu0 %v2096_v23  ;;  %v8065_v23 = vld [vmem:[#allocation24_spill] sm:$0xff] }
 0x5ef   : > { %2131 = vmatpush1.bf16.msra.mxu0 %v2095_v3  ;;  %v8063_v3 = vld [vmem:[#allocation22_spill] sm:$0xff] }
 0x5f0   : > { %4136 = vmatprep.subr.msk.bf16.mxu0 %vm430_vm0, %v2224_v36 }
 0x5f2   : > { %2149 = vmatmul.mubr.bf16.vlgmr.msra.gmra.mxu0 %v275_v44 }
 0x5f3   : > { %2246 = vmatpush1.bf16.msra.mxu0 %v2226_v33  ;;  %2263 = vmatprep.mubr.bf16.mxu0 %v8015_v38 }
 0x5fa   : > { %4137 = vmatmul.mubr.msk.bf16.vlgmr.msra.gmra.mxu0 %vm357_vm1, %v8049_v31 }
 0x5fb   : > { %2273 = vmatprep.mubr.bf16.mxu0 %v8015_v38 }
 0x602   : > { %4138 = vmatmul.mubr.msk.bf16.gmra.mxu0 %vm357_vm1, %v8050_v10 }
 0x603   : > { %2283 = vmatprep.mubr.bf16.mxu0 %v8015_v38 }
 0x60a   : > { %4139 = vmatmul.mubr.msk.bf16.gmra.mxu0 %vm357_vm1, %v8051_v32 }
 0x60b   : > { %2293 = vmatprep.mubr.bf16.mxu0 %v8015_v38 }
 0x612   : > { %4140 = vmatmul.mubr.msk.bf16.gmra.mxu0 %vm357_vm1, %v8052_v28 }
 0x613   : > { %2303 = vmatprep.mubr.bf16.mxu0 %v8015_v38 }
 0x61a   : > { %4141 = vmatmul.mubr.msk.bf16.gmra.mxu0 %vm357_vm1, %v8053_v48 }
 0x61b   : > { %2313 = vmatprep.mubr.bf16.mxu0 %v8015_v38 }
 0x622   : > { %4142 = vmatmul.mubr.msk.bf16.gmra.mxu0 %vm357_vm1, %v8054_v43 }
 0x623   : > { %2323 = vmatprep.mubr.bf16.mxu0 %v8015_v38 }
 0x62a   : > { %4143 = vmatmul.mubr.msk.bf16.gmra.mxu0 %vm357_vm1, %v8055_v58 }
 0x62b   : > { %2333 = vmatprep.mubr.bf16.mxu0 %v8015_v38 }
 0x632   : > { %4144 = vmatmul.mubr.msk.bf16.gmra.mxu0 %vm357_vm1, %v8056_v63 }
 0x633   : > { %2343 = vmatprep.mubr.bf16.mxu0 %v8015_v38 }
 0x63a   : > { %4145 = vmatmul.mubr.msk.bf16.gmra.mxu0 %vm357_vm1, %v8057_v61 }
 0x63b   : > { %2353 = vmatprep.mubr.bf16.mxu0 %v8015_v38 }
 0x642   : > { %4146 = vmatmul.mubr.msk.bf16.gmra.mxu0 %vm357_vm1, %v8058_v12 }
 0x643   : > { %2363 = vmatprep.mubr.bf16.mxu0 %v8015_v38 }
 0x64a   : > { %4147 = vmatmul.mubr.msk.bf16.gmra.mxu0 %vm357_vm1, %v8059_v19 }
 0x64b   : > { %2373 = vmatprep.mubr.bf16.mxu0 %v8015_v38 }
 0x652   : > { %4148 = vmatmul.mubr.msk.bf16.gmra.mxu0 %vm357_vm1, %v8060_v41 }
 0x653   : > { %2383 = vmatprep.mubr.bf16.mxu0 %v8015_v38 }
 0x65a   : > { %4149 = vmatmul.mubr.msk.bf16.gmra.mxu0 %vm357_vm1, %v8061_v25 }
 0x65b   : > { %2393 = vmatprep.mubr.bf16.mxu0 %v8015_v38 }
 0x662   : > { %4150 = vmatmul.mubr.msk.bf16.gmra.mxu0 %vm357_vm1, %v8062_v55 }
 0x663   : > { %2403 = vmatprep.mubr.bf16.mxu0 %v8015_v38 }
 0x66a   : > { %4151 = vmatmul.mubr.msk.bf16.gmra.mxu0 %vm357_vm1, %v8063_v3 }
 0x66b   : > { %2413 = vmatprep.mubr.bf16.mxu0 %v8015_v38 }
 0x672   : > { %4152 = vmatmul.mubr.msk.bf16.gmra.mxu0 %vm357_vm1, %v8064_v60 }
 0x673   : > { %2423 = vmatprep.mubr.bf16.mxu0 %v8015_v38 }
 0x67a   : > { %4153 = vmatmul.mubr.msk.bf16.gmra.mxu0 %vm357_vm1, %v8065_v23 }
 0x67b   : > { %2433 = vmatprep.mubr.bf16.mxu0 %v8015_v38 }
 0x682   : > { %4154 = vmatmul.mubr.msk.bf16.gmra.mxu0 %vm357_vm1, %v8066_v22 }
 0x683   : > { %2443 = vmatprep.mubr.bf16.mxu0 %v8015_v38 }
 0x68a   : > { %4155 = vmatmul.mubr.msk.bf16.gmra.mxu0 %vm357_vm1, %v8067_v11 }
 0x68b   : > { %2453 = vmatprep.mubr.bf16.mxu0 %v8015_v38 }
 0x692   : > { %4156 = vmatmul.mubr.msk.bf16.gmra.mxu0 %vm357_vm1, %v8068_v20 }
 0x693   : > { %2463 = vmatprep.mubr.bf16.mxu0 %v8015_v38 }
 0x69a   : > { %4157 = vmatmul.mubr.msk.bf16.gmra.mxu0 %vm357_vm1, %v8069_v42 }
 0x69b   : > { %2473 = vmatprep.mubr.bf16.mxu0 %v8015_v38 }
 0x6a2   : > { %4158 = vmatmul.mubr.msk.bf16.gmra.mxu0 %vm357_vm1, %v8070_v6 }
 0x6a3   : > { %2483 = vmatprep.mubr.bf16.mxu0 %v8015_v38 }
 0x6aa   : > { %4159 = vmatmul.mubr.msk.bf16.gmra.mxu0 %vm357_vm1, %v8071_v50 }
 0x6ab   : > { %2493 = vmatprep.mubr.bf16.mxu0 %v8015_v38 }
 0x6b2   : > { %v6810_v27 = vpop.f32.mrf.mxu0  ;;  %4160 = vmatmul.mubr.msk.bf16.gmra.mxu0 %vm357_vm1, %v8073_v51 }
 0x6b3   : > { %8072 = vst [vmem:[#allocation68_spill] sm:$0xff] %v6810_v27  ;;  %3936 = vmatprep.mubr.bf16.mxu0 %v8015_v38 }
 0x6b4   : > { %v6815_v54 = vpop.f32.mrf.mxu0 }
 0x6b5   : > { %8074 = vst [vmem:[#allocation64_spill] sm:$0xff] %v6815_v54 }
 0x6b6   : > { %v2154_v47 = vpop.f32.mrf.mxu0 }
 0x6b8   : > { %v2155_v40 = vpop.f32.mrf.mxu0 }
 0x6ba   : > { %v2265_v57 = vpop.f32.mrf.mxu0 }
 0x6bc   : > { %v2267_v34 = vpop.f32.mrf.mxu0 }
 0x6be   : > { %v2269_v13 = vpop.f32.mrf.mxu0 }
 0x6bf   : > { %v2504_v24 = vmax.f32 %v2265_v57, %v2269_v13 }
 0x6c0   : > { %v2271_v18 = vpop.f32.mrf.mxu0 }
 0x6c1   : > { %v2513_v39 = vmax.f32 %v2267_v34, %v2271_v18 }
 0x6c2   : > { %v2275_v59 = vpop.f32.mrf.mxu0 }
 0x6c3   : > { %v2505_v52 = vmax.f32 %v2504_v24, %v2275_v59 }
 0x6c4   : > { %v2277_v56 = vpop.f32.mrf.mxu0 }
 0x6c5   : > { %v2514_v16 = vmax.f32 %v2513_v39, %v2277_v56 }
 0x6c6   : > { %v2279_v53 = vpop.f32.mrf.mxu0 }
 0x6c7   : > { %v2506_v62 = vmax.f32 %v2505_v52, %v2279_v53 }
 0x6c8   : > { %v2281_v30 = vpop.f32.mrf.mxu0 }
 0x6c9   : > { %v2507_v4 = vrot.slane %v2506_v62, 4  ;;  %v2515_v8 = vmax.f32 %v2514_v16, %v2281_v30 }
 0x6ca   : > { %v6817_v7 = vpop.f32.mrf.mxu0 }
 0x6cb   : > { %v2508_v5 = vmax.f32 %v2506_v62, %v2507_v4  ;;  %v2516_v0 = vrot.slane %v2515_v8, 4 }
 0x6cc   : > { %v6819_v2 = vpop.f32.mrf.mxu0 }
 0x6cd   : > { %v2509_v26 = vrot.slane %v2508_v5, 2  ;;  %v2517_v14 = vmax.f32 %v2515_v8, %v2516_v0 }
 0x6ce   : > { %v6821_v35 = vpop.f32.mrf.mxu0 }
 0x6cf   : > { %v2510_v17 = vmax.f32 %v2508_v5, %v2509_v26  ;;  %v2518_v1 = vrot.slane %v2517_v14, 2  ;;  %v2522_v21 = vmax.f32 %v6817_v7, %v6821_v35 }
 0x6d0   : > { %v6825_v15 = vpop.f32.mrf.mxu0 }
 0x6d1   : > { %v2511_v46 = vrot.slane %v2510_v17, 1  ;;  %v2519_v37 = vmax.f32 %v2517_v14, %v2518_v1  ;;  %v2531_v9 = vmax.f32 %v6819_v2, %v6825_v15 }
 0x6d2   : > { %v6829_v49 = vpop.f32.mrf.mxu0 }
 0x6d3   : > { %v2512_v45 = vmax.f32 %v2510_v17, %v2511_v46  ;;  %v2520_v29 = vrot.slane %v2519_v37, 1  ;;  %v2523_v36 = vmax.f32 %v2522_v21, %v6829_v49 }
 0x6d4   : > { %v6832_v44 = vpop.f32.mrf.mxu0 }
 0x6d5   : > { %v2576_v33 = vsub.f32 %v2265_v57, %v2512_v45  ;;  %v2578_v31 = vsub.f32 %v2269_v13, %v2512_v45  ;;  %v2580_v10 = vsub.f32 %v2275_v59, %v2512_v45  ;;  %v2582_v32 = vsub.f32 %v2279_v53, %v2512_v45 }
 0x6d6   : > { %v2521_v28 = vmax.f32 %v2519_v37, %v2520_v29  ;;  %v2532_v48 = vmax.f32 %v2531_v9, %v6832_v44  ;;  %v2299_v43 = vpop.f32.mrf.mxu0 }
 0x6d7   : > { %v2608_v58 = vmul.f32 1.442695, %v2576_v33  ;;  %v2612_v63 = vmul.f32 1.442695, %v2578_v31  ;;  %v2616_v61 = vmul.f32 1.442695, %v2580_v10  ;;  %v2524_v12 = vmax.f32 %v2523_v36, %v2299_v43 }
 0x6d8   : > { %v2620_v19 = vmul.f32 1.442695, %v2582_v32  ;;  %v2577_v41 = vsub.f32 %v2267_v34, %v2521_v28  ;;  %v2579_v25 = vsub.f32 %v2271_v18, %v2521_v28  ;;  %v2581_v55 = vsub.f32 %v2277_v56, %v2521_v28  ;;  %v6835_v3 = vpop.f32.mrf.mxu0 }
 0x6d9   : > { %5348 = vpow2.f32 %v2608_v58  ;;  %v2583_v60 = vsub.f32 %v2281_v30, %v2521_v28  ;;  %v2525_v23 = vrot.slane %v2524_v12, 4  ;;  %v2533_v22 = vmax.f32 %v2532_v48, %v6835_v3 }
 0x6da   : > { %5350 = vpow2.f32 %v2612_v63  ;;  %v2610_v11 = vmul.f32 1.442695, %v2577_v41  ;;  %v2614_v20 = vmul.f32 1.442695, %v2579_v25  ;;  %v6838_v42 = vpop.f32.mrf.mxu0  ;;  %v2618_v51 = vmul.f32 1.442695, %v2581_v55 }
 0x6db   : > { %5352 = vpow2.f32 %v2616_v61  ;;  %v2526_v6 = vmax.f32 %v2524_v12, %v2525_v23  ;;  %v2534_v50 = vrot.slane %v2533_v22, 4  ;;  %v2622_v34 = vmul.f32 1.442695, %v2583_v60 }
 0x6dc   : > { %5354 = vpow2.f32 %v2620_v19  ;;  %v6840_v47 = vpop.f32.mrf.mxu0 }
 0x6dd   : > { %5356 = vpow2.f32 %v2610_v11  ;;  %v2527_v40 = vrot.slane %v2526_v6, 2  ;;  %v2535_v57 = vmax.f32 %v2533_v22, %v2534_v50 }
 0x6de   : > { %5358 = vpow2.f32 %v2614_v20  ;;  %v6842_v13 = vpop.f32.mrf.mxu0 }
 0x6df   : > { %v2528_v24 = vmax.f32 %v2526_v6, %v2527_v40  ;;  %v2536_v18 = vrot.slane %v2535_v57, 2  ;;  %v2540_v39 = vmax.f32 %v6838_v42, %v6842_v13  ;;  %5360 = vpow2.f32 %v2618_v51 }
 0x6e0   : > { %v6846_v59 = vpop.f32.mrf.mxu0  ;;  %5362 = vpow2.f32 %v2622_v34 }
 0x6e1   : > { %v2529_v52 = vrot.slane %v2528_v24, 1  ;;  %v2537_v56 = vmax.f32 %v2535_v57, %v2536_v18  ;;  %v2549_v16 = vmax.f32 %v6840_v47, %v6846_v59 }
 0x6e2   : > { %v6850_v53 = vpop.f32.mrf.mxu0 }
 0x6e3   : > { %v2530_v62 = vmax.f32 %v2528_v24, %v2529_v52  ;;  %v2538_v30 = vrot.slane %v2537_v56, 1  ;;  %v2541_v4 = vmax.f32 %v2540_v39, %v6850_v53 }
 0x6e4   : > { %v6853_v8 = vpop.f32.mrf.mxu0 }
 0x6e5   : > { %v2584_v5 = vsub.f32 %v6817_v7, %v2530_v62  ;;  %v2586_v0 = vsub.f32 %v6821_v35, %v2530_v62  ;;  %v2588_v26 = vsub.f32 %v6829_v49, %v2530_v62  ;;  %v2590_v14 = vsub.f32 %v2299_v43, %v2530_v62 }
 0x6e6   : > { %v6858_v17 = vpop.eup %5348  ;;  %v2539_v1 = vmax.f32 %v2537_v56, %v2538_v30  ;;  %v2550_v21 = vmax.f32 %v2549_v16, %v6853_v8  ;;  %v6861_v46 = vpop.f32.mrf.mxu0 }
 0x6e7   : > { %v6863_v37 = vpop.eup %5350  ;;  %v2624_v9 = vmul.f32 1.442695, %v2584_v5  ;;  %v2628_v45 = vmul.f32 1.442695, %v2586_v0  ;;  %v2632_v29 = vmul.f32 1.442695, %v2588_v26  ;;  %v2542_v36 = vmax.f32 %v2541_v4, %v6861_v46 }
 0x6e8   : > { %v6866_v7 = vpop.eup %5352  ;;  %v2672_v35 = vadd.f32 %v6863_v37, %v6858_v17  ;;  %v2636_v49 = vmul.f32 1.442695, %v2590_v14  ;;  %v2585_v33 = vsub.f32 %v6819_v2, %v2539_v1  ;;  %v2587_v31 = vsub.f32 %v6825_v15, %v2539_v1  ;;  %v6872_v10 = vpop.f32.mrf.mxu0 }
 0x6e9   : > { %v6874_v32 = vpop.eup %5354  ;;  %5364 = vpow2.f32 %v2624_v9  ;;  %v2589_v28 = vsub.f32 %v6832_v44, %v2539_v1  ;;  %v2591_v48 = vsub.f32 %v6835_v3, %v2539_v1  ;;  %v2543_v43 = vrot.slane %v2542_v36, 4 }
 0x6ea   : > { %v6878_v58 = vpop.eup %5356  ;;  %v2673_v63 = vadd.f32 %v6866_v7, %v2672_v35  ;;  %5366 = vpow2.f32 %v2628_v45  ;;  %v2626_v61 = vmul.f32 1.442695, %v2585_v33  ;;  %v2630_v12 = vmul.f32 1.442695, %v2587_v31  ;;  %v6881_v2 = vpop.f32.mrf.mxu0 }
 0x6eb   : > { %v6883_v15 = vpop.eup %5358  ;;  %5368 = vpow2.f32 %v2632_v29  ;;  %v2634_v19 = vmul.f32 1.442695, %v2589_v28  ;;  %v2544_v41 = vmax.f32 %v2542_v36, %v2543_v43  ;;  %v2551_v55 = vmax.f32 %v2550_v21, %v6872_v10 }
 0x6ec   : > { %v2674_v25 = vadd.f32 %v6874_v32, %v2673_v63  ;;  %v2681_v44 = vadd.f32 %v6883_v15, %v6878_v58  ;;  %5370 = vpow2.f32 %v2636_v49  ;;  %v6889_v3 = vpop.f32.mrf.mxu0  ;;  %v6891_v60 = vpop.eup %5360  ;;  %v2638_v23 = vmul.f32 1.442695, %v2591_v48 }
 0x6ed   : > { %5372 = vpow2.f32 %v2626_v61  ;;  %v2545_v22 = vrot.slane %v2544_v41, 2  ;;  %v2552_v6 = vrot.slane %v2551_v55, 4  ;;  %v6896_v51 = vpop.eup %5362 }
 0x6ee   : > { %v2675_v11 = vrot.slane %v2674_v25, 4  ;;  %v2682_v20 = vadd.f32 %v6891_v60, %v2681_v44  ;;  %5374 = vpow2.f32 %v2630_v12  ;;  %v6894_v50 = vpop.f32.mrf.mxu0 }
 0x6ef   : > { %v2546_v40 = vmax.f32 %v2544_v41, %v2545_v22  ;;  %v2558_v57 = vmax.f32 %v6881_v2, %v6894_v50  ;;  %5376 = vpow2.f32 %v2634_v19  ;;  %v2553_v18 = vmax.f32 %v2551_v55, %v2552_v6 }
 0x6f0   : > { %v2676_v34 = vadd.f32 %v2675_v11, %v2674_v25  ;;  %v2683_v24 = vadd.f32 %v6896_v51, %v2682_v20  ;;  %v6901_v39 = vpop.f32.mrf.mxu0  ;;  %5378 = vpow2.f32 %v2638_v23 }
 0x6f1   : > { %v2547_v52 = vrot.slane %v2546_v40, 1  ;;  %v2567_v56 = vmax.f32 %v6889_v3, %v6901_v39  ;;  %v2554_v30 = vrot.slane %v2553_v18, 2 }
 0x6f2   : > { %v2677_v16 = vrot.slane %v2676_v34, 2  ;;  %v2684_v62 = vrot.slane %v2683_v24, 4  ;;  %v6905_v4 = vpop.f32.mrf.mxu0 }
 0x6f3   : > { %v2548_v5 = vmax.f32 %v2546_v40, %v2547_v52  ;;  %v2559_v0 = vmax.f32 %v2558_v57, %v6905_v4  ;;  %v2555_v1 = vmax.f32 %v2553_v18, %v2554_v30 }
 0x6f4   : > { %v2678_v26 = vadd.f32 %v2677_v16, %v2676_v34  ;;  %v2685_v14 = vadd.f32 %v2684_v62, %v2683_v24  ;;  %v6908_v21 = vpop.f32.mrf.mxu0 }
 0x6f5   : > { %v2592_v9 = vsub.f32 %v6838_v42, %v2548_v5  ;;  %v2594_v45 = vsub.f32 %v6842_v13, %v2548_v5  ;;  %v2596_v29 = vsub.f32 %v6850_v53, %v2548_v5  ;;  %v2598_v36 = vsub.f32 %v6861_v46, %v2548_v5 }
 0x6f6   : > { %v6914_v35 = vpop.eup %5364  ;;  %v2679_v49 = vrot.slane %v2678_v26, 1  ;;  %v2686_v33 = vrot.slane %v2685_v14, 2  ;;  %v2556_v31 = vrot.slane %v2555_v1, 1  ;;  %v2568_v28 = vmax.f32 %v2567_v56, %v6908_v21  ;;  %v6917_v48 = vpop.f32.mrf.mxu0 }
 0x6f7   : > { %v6919_v43 = vpop.eup %5366  ;;  %v2640_v63 = vmul.f32 1.442695, %v2592_v9  ;;  %v2644_v61 = vmul.f32 1.442695, %v2594_v45  ;;  %v2648_v42 = vmul.f32 1.442695, %v2596_v29  ;;  %v2560_v13 = vmax.f32 %v2559_v0, %v6917_v48 }
 0x6f8   : > { %v6922_v12 = vpop.eup %5368  ;;  %v2690_v53 = vadd.f32 %v6919_v43, %v6914_v35  ;;  %v2652_v46 = vmul.f32 1.442695, %v2598_v36  ;;  %v2557_v19 = vmax.f32 %v2555_v1, %v2556_v31  ;;  %v6926_v41 = vpop.f32.mrf.mxu0  ;;  %v2687_v25 = vadd.f32 %v2686_v33, %v2685_v14 }
 0x6f9   : > { %v6928_v44 = vpop.eup %5370  ;;  %5380 = vpow2.f32 %v2640_v63  ;;  %v2561_v55 = vrot.slane %v2560_v13, 4  ;;  %v2569_v23 = vmax.f32 %v2568_v28, %v6926_v41  ;;  %v2680_v22 = vadd.f32 %v2679_v49, %v2678_v26 }
 0x6fa   : > { %v6931_v11 = vpop.eup %5372  ;;  %v2691_v20 = vadd.f32 %v6922_v12, %v2690_v53  ;;  %5382 = vpow2.f32 %v2644_v61  ;;  %v2593_v6 = vsub.f32 %v6840_v47, %v2557_v19  ;;  %v2595_v40 = vsub.f32 %v6846_v59, %v2557_v19  ;;  %v6936_v57 = vpop.f32.mrf.mxu0 }
 0x6fb   : > { %v6938_v34 = vpop.eup %5374  ;;  %5384 = vpow2.f32 %v2648_v42  ;;  %v2597_v24 = vsub.f32 %v6853_v8, %v2557_v19  ;;  %v2599_v18 = vsub.f32 %v6872_v10, %v2557_v19  ;;  %v2562_v52 = vmax.f32 %v2560_v13, %v2561_v55 }
 0x6fc   : > { %v2692_v56 = vadd.f32 %v6928_v44, %v2691_v20  ;;  %v2699_v16 = vadd.f32 %v6938_v34, %v6931_v11  ;;  %5386 = vpow2.f32 %v2652_v46  ;;  %v2642_v62 = vmul.f32 1.442695, %v2593_v6  ;;  %v6945_v47 = vpop.f32.mrf.mxu0  ;;  %v6947_v59 = vpop.eup %5376 }
 0x6fd   : > { %v2646_v30 = vmul.f32 1.442695, %v2595_v40  ;;  %v2650_v5 = vmul.f32 1.442695, %v2597_v24  ;;  %v2654_v0 = vmul.f32 1.442695, %v2599_v18  ;;  %v2792_v8 = vmax.f32 %v6936_v57, %v6945_v47  ;;  %v6954_v9 = vpop.eup %5378 }
 0x6fe   : > { %v2693_v26 = vrot.slane %v2692_v56, 4  ;;  %v2700_v10 = vadd.f32 %v6947_v59, %v2699_v16  ;;  %5388 = vpow2.f32 %v2642_v62  ;;  %v2563_v14 = vrot.slane %v2562_v52, 2  ;;  %v6952_v1 = vpop.f32.mrf.mxu0 }
 0x6ff   : > { %5390 = vpow2.f32 %v2646_v30  ;;  %v2570_v45 = vrot.slane %v2569_v23, 4  ;;  %2793 = vmax.xlane.f32.xlu0 %v2792_v8  ;;  %v2688_v29 = vrot.slane %v2687_v25, 1 }
 0x700   : > { %v2694_v36 = vadd.f32 %v2693_v26, %v2692_v56  ;;  %v2701_v49 = vadd.f32 %v6954_v9, %v2700_v10  ;;  %5392 = vpow2.f32 %v2650_v5  ;;  %v2564_v33 = vmax.f32 %v2562_v52, %v2563_v14  ;;  %v6957_v31 = vpop.f32.mrf.mxu0 }
 0x701   : > { %5394 = vpow2.f32 %v2654_v0  ;;  %v2571_v28 = vmax.f32 %v2569_v23, %v2570_v45  ;;  %v2795_v63 = vmax.f32 %v6952_v1, %v6957_v31  ;;  %v2689_v61 = vadd.f32 %v2688_v29, %v2687_v25 }
 0x702   : > { %v2695_v42 = vrot.slane %v2694_v36, 2  ;;  %v2702_v13 = vrot.slane %v2701_v49, 4  ;;  %v2565_v53 = vrot.slane %v2564_v33, 1  ;;  %v6961_v46 = vpop.f32.mrf.mxu0  ;;  %5396 = vrcp.f32 %v2680_v22 }
 0x703   : > { %v2572_v19 = vrot.slane %v2571_v28, 2  ;;  %2796 = vmax.xlane.f32.xlu0 %v2795_v63  ;;  %5398 = vrcp.f32 %v2689_v61 }
 0x704   : > { %v2703_v55 = vadd.f32 %v2702_v13, %v2701_v49  ;;  %v2566_v20 = vmax.f32 %v2564_v33, %v2565_v53  ;;  %v6963_v6 = vpop.f32.mrf.mxu0  ;;  %v2696_v25 = vadd.f32 %v2695_v42, %v2694_v36 }
 0x705   : > { %v2573_v40 = vmax.f32 %v2571_v28, %v2572_v19  ;;  %v2798_v23 = vmax.f32 %v6961_v46, %v6963_v6 }
 0x706   : > { %v6967_v24 = vpop.eup %5380  ;;  %v2704_v18 = vrot.slane %v2703_v55, 2  ;;  %v2600_v52 = vsub.f32 %v6881_v2, %v2566_v20  ;;  %v2602_v56 = vsub.f32 %v6894_v50, %v2566_v20  ;;  %v6971_v22 = vpop.f32.mrf.mxu0  ;;  %v2604_v62 = vsub.f32 %v6905_v4, %v2566_v20 }
 0x707   : > { %v6973_v16 = vpop.eup %5382  ;;  %v2606_v30 = vsub.f32 %v6917_v48, %v2566_v20  ;;  %v2574_v5 = vrot.slane %v2573_v40, 1  ;;  %2799 = vmax.xlane.f32.xlu0 %v2798_v23  ;;  %v2697_v48 = vrot.slane %v2696_v25, 1 }
 0x708   : > { %v6977_v0 = vpop.eup %5384  ;;  %v2708_v8 = vadd.f32 %v6973_v16, %v6967_v24  ;;  %v2656_v26 = vmul.f32 1.442695, %v2600_v52  ;;  %v2660_v10 = vmul.f32 1.442695, %v2602_v56  ;;  %v6981_v2 = vpop.f32.mrf.mxu0  ;;  %v2705_v50 = vadd.f32 %v2704_v18, %v2703_v55 }
 0x709   : > { %v6983_v14 = vpop.eup %5386  ;;  %v2664_v45 = vmul.f32 1.442695, %v2604_v62  ;;  %v2668_v29 = vmul.f32 1.442695, %v2606_v30  ;;  %v2575_v36 = vmax.f32 %v2573_v40, %v2574_v5  ;;  %v2801_v4 = vmax.f32 %v6971_v22, %v6981_v2 }
 0x70a   : > { %v2709_v49 = vadd.f32 %v6977_v0, %v2708_v8  ;;  %5400 = vpow2.f32 %v2656_v26  ;;  %v6988_v33 = vpop.f32.mrf.mxu0  ;;  %v2706_v20 = vrot.slane %v2705_v50, 1  ;;  %v2698_v8 = vadd.f32 %v2697_v48, %v2696_v25 }
 0x70b   : > { %v6990_v28 = vpop.eup %5388  ;;  %5402 = vpow2.f32 %v2660_v10  ;;  %v2601_v63 = vsub.f32 %v6889_v3, %v2575_v36  ;;  %v2603_v61 = vsub.f32 %v6901_v39, %v2575_v36  ;;  %v2605_v42 = vsub.f32 %v6908_v21, %v2575_v36  ;;  %2802 = vmax.xlane.f32.xlu0 %v2801_v4 }
 0x70c   : > { %v6995_v13 = vpop.eup %5390  ;;  %v2710_v53 = vadd.f32 %v6983_v14, %v2709_v49  ;;  %5404 = vpow2.f32 %v2664_v45  ;;  %v2607_v19 = vsub.f32 %v6926_v41, %v2575_v36  ;;  %v6999_v55 = vpop.f32.mrf.mxu0  ;;  %v2707_v36 = vadd.f32 %v2706_v20, %v2705_v50 }
 0x70d   : > { %v7001_v40 = vpop.eup %5392  ;;  %v2717_v3 = vadd.f32 %v6995_v13, %v6990_v28  ;;  %5406 = vpow2.f32 %v2668_v29  ;;  %v2658_v39 = vmul.f32 1.442695, %v2601_v63  ;;  %v2662_v23 = vmul.f32 1.442695, %v2603_v61 }
 0x70e   : > { %v7005_v21 = vpop.eup %5394  ;;  %v2711_v18 = vrot.slane %v2710_v53, 4  ;;  %v2666_v52 = vmul.f32 1.442695, %v2605_v42  ;;  %v2670_v56 = vmul.f32 1.442695, %v2607_v19  ;;  %v2804_v62 = vmax.f32 %v6988_v33, %v6999_v55  ;;  %v7009_v41 = vpop.f32.mrf.mxu0 }
 0x70f   : > { %v5397_v30 = vpop.eup %5396  ;;  %v2718_v5 = vadd.f32 %v7001_v40, %v2717_v3  ;;  %5408 = vpow2.f32 %v2658_v39 }
 0x710   : > { %v5399_v26 = vpop.eup %5398  ;;  %v2712_v10 = vadd.f32 %v2711_v18, %v2710_v53  ;;  %5410 = vpow2.f32 %v2662_v23  ;;  %2805 = vmax.xlane.f32.xlu0 %v2804_v62  ;;  %v7012_v45 = vpop.f32.mrf.mxu0  ;;  %v2752_v29 = vmul.f32 0.17677669, %v5397_v30 }
 0x711   : > { %v2719_v4 = vadd.f32 %v7005_v21, %v2718_v5  ;;  %5412 = vpow2.f32 %v2666_v52  ;;  %v2807_v49 = vmax.f32 %v7009_v41, %v7012_v45  ;;  %v2753_v63 = vmul.f32 0.17677669, %v5399_v26 }
 0x712   : > { %v2713_v61 = vrot.slane %v2712_v10, 2  ;;  %5414 = vpow2.f32 %v2670_v56  ;;  %v7017_v42 = vpop.f32.mrf.mxu0  ;;  %v7020_v25 = vmul.f32 %v6866_v7, %v2752_v29  ;;  %v7023_v48 = vmul.f32 %v6874_v32, %v2752_v29 }
 0x713   : > { %v2720_v53 = vrot.slane %v2719_v4, 4  ;;  %2808 = vmax.xlane.f32.xlu1 %v2807_v49  ;;  %v7026_v50 = vmul.f32 %v6891_v60, %v2753_v63  ;;  %v7029_v19 = vmul.f32 %v6896_v51, %v2753_v63  ;;  %v7032_v20 = vmul.f32 %v6878_v58, %v2753_v63 }
 0x714   : > { %8075 = vst [vmem:[#allocation66_spill] sm:$0xff] %v7020_v25  ;;  %8076 = vst [vmem:[#allocation67_spill] sm:$0xff] %v7023_v48  ;;  %v2714_v3 = vadd.f32 %v2713_v61, %v2712_v10  ;;  %v7034_v39 = vpop.f32.mrf.mxu0  ;;  %v7039_v32 = vmul.f32 %v6883_v15, %v2753_v63  ;;  %v7042_v23 = vmul.f32 %v6858_v17, %v2752_v29  ;;  %5416 = vrcp.f32 %v2707_v36 }
 0x715   : > { %8077 = vst [vmem:[#allocation65_spill] sm:$0xff] %v7026_v50  ;;  %8078 = vst [vmem:[#allocation72_spill] sm:$0xff] %v7029_v19  ;;  %v2721_v60 = vadd.f32 %v2720_v53, %v2719_v4  ;;  %v2810_v51 = vmax.f32 %v7017_v42, %v7034_v39  ;;  %v7049_v18 = vmul.f32 %v6863_v37, %v2752_v29  ;;  %5418 = vrcp.f32 %v2698_v8 }
 0x716   : > { %8079 = vst [vmem:[#allocation70_spill] sm:$0xff] %v7032_v20  ;;  %8080 = vst [vmem:[#allocation71_spill] sm:$0xff] %v7039_v32  ;;  %v2715_v52 = vrot.slane %v2714_v3, 1  ;;  %v7051_v56 = vpop.f32.mrf.mxu0 }
 0x717   : > { %8081 = vst [vmem:[#allocation76_spill] sm:$0xff] %v7042_v23  ;;  %8082 = vst [vmem:[#allocation69_spill] sm:$0xff] %v7049_v18  ;;  %v7055_v62 = vpop.eup %5400  ;;  %v2722_v17 = vrot.slane %v2721_v60, 2  ;;  %2811 = vmax.xlane.f32.xlu0 %v2810_v51 }
 0x718   : > { %v7059_v5 = vpop.eup %5402  ;;  %v7061_v26 = vpop.f32.mrf.mxu0  ;;  %v2716_v37 = vadd.f32 %v2715_v52, %v2714_v3 }
 0x719   : > { %v7063_v10 = vpop.eup %5404  ;;  %v2726_v29 = vadd.f32 %v7059_v5, %v7055_v62  ;;  %v2813_v36 = vmax.f32 %v7051_v56, %v7061_v26  ;;  %v2723_v4 = vadd.f32 %v2722_v17, %v2721_v60 }
 0x71a   : > { %v7069_v49 = vpop.eup %5406  ;;  %v7071_v63 = vpop.f32.mrf.mxu0  ;;  %5420 = vrcp.f32 %v2716_v37 }
 0x71b   : > { %v2727_v8 = vadd.f32 %v7063_v10, %v2726_v29  ;;  %2814 = vmax.xlane.f32.xlu0 %v2813_v36  ;;  %v2724_v61 = vrot.slane %v2723_v4, 1 }
 0x71c   : > { %v7074_v53 = vpop.eup %5408  ;;  %v7076_v3 = vpop.f32.mrf.mxu0 }
 0x71d   : > { %v7078_v51 = vpop.eup %5410  ;;  %v2728_v52 = vadd.f32 %v7069_v49, %v2727_v8  ;;  %v2816_v60 = vmax.f32 %v7071_v63, %v7076_v3  ;;  %v2725_v17 = vadd.f32 %v2724_v61, %v2723_v4 }
 0x71e   : > { %v7083_v30 = vpop.eup %5412  ;;  %v2735_v37 = vadd.f32 %v7078_v51, %v7074_v53  ;;  %v7087_v29 = vpop.f32.mrf.mxu0 }
 0x71f   : > { %v7089_v36 = vpop.eup %5414  ;;  %v2729_v15 = vrot.slane %v2728_v52, 4  ;;  %2817 = vmax.xlane.f32.xlu0 %v2816_v60  ;;  %5422 = vrcp.f32 %v2725_v17 }
 0x720   : > { %v2736_v7 = vadd.f32 %v7083_v30, %v2735_v37  ;;  %v7092_v58 = vpop.f32.mrf.mxu0 }
 0x721   : > { %v2730_v8 = vadd.f32 %v2729_v15, %v2728_v52  ;;  %v2819_v4 = vmax.f32 %v7087_v29, %v7092_v58  ;;  %v5417_v27 = vpop.eup %5416 }
 0x722   : > { %v2737_v61 = vadd.f32 %v7089_v36, %v2736_v7  ;;  %v7097_v54 = vpop.f32.mrf.mxu0  ;;  %v5419_v23 = vpop.eup %5418  ;;  %v2755_v60 = vmul.f32 0.17677669, %v5417_v27 }
 0x723   : > { %v2731_v38 = vrot.slane %v2730_v8, 2  ;;  %2820 = vmax.xlane.f32.xlu1 %v2819_v4  ;;  %v2754_v15 = vmul.f32 0.17677669, %v5419_v23 }
 0x724   : > { %v2738_v18 = vrot.slane %v2737_v61, 4  ;;  %v7099_v20 = vpop.f32.mrf.mxu0  ;;  %v7106_v7 = vmul.f32 %v6947_v59, %v2755_v60  ;;  %v7109_v25 = vmul.f32 %v6954_v9, %v2755_v60  ;;  %v7112_v4 = vmul.f32 %v6931_v11, %v2755_v60 }
 0x725   : > { %v2732_v17 = vadd.f32 %v2731_v38, %v2730_v8  ;;  %v2822_v37 = vmax.f32 %v7097_v54, %v7099_v20  ;;  %v7115_v38 = vmul.f32 %v6922_v12, %v2754_v15  ;;  %v7118_v27 = vmul.f32 %v6928_v44, %v2754_v15 }
 0x726   : > { %v2739_v52 = vadd.f32 %v2738_v18, %v2737_v61  ;;  %v7103_v32 = vpop.f32.mrf.mxu0  ;;  %8083 = vst [vmem:[#allocation74_spill] sm:$0xff] %v7106_v7  ;;  %8084 = vst [vmem:[#allocation75_spill] sm:$0xff] %v7109_v25  ;;  %v7121_v23 = vmul.f32 %v6938_v34, %v2755_v60  ;;  %v7128_v11 = vmul.f32 %v6914_v35, %v2754_v15 }
 0x727   : > { %8085 = vst [vmem:[#allocation73_spill] sm:$0xff] %v7112_v4  ;;  %v5421_v48 = vpop.eup %5420  ;;  %v2733_v50 = vrot.slane %v2732_v17, 1  ;;  %2823 = vmax.xlane.f32.xlu1 %v2822_v37  ;;  %8086 = vst [vmem:[#allocation35_spill] sm:$0xff] %v7115_v38  ;;  %v7131_v8 = vmul.f32 %v6919_v43, %v2754_v15 }
 0x728   : > { %8087 = vst [vmem:[#allocation34_spill] sm:$0xff] %v7118_v27  ;;  %8088 = vst [vmem:[#allocation33_spill] sm:$0xff] %v7121_v23  ;;  %v2740_v59 = vrot.slane %v2739_v52, 2  ;;  %v7123_v18 = vpop.f32.mrf.mxu0  ;;  %v2756_v61 = vmul.f32 0.17677669, %v5421_v48 }
 0x729   : > { %8089 = vst [vmem:[#allocation32_spill] sm:$0xff] %v7128_v11  ;;  %8090 = vst [vmem:[#allocation37_spill] sm:$0xff] %v7131_v8  ;;  %v2825_v12 = vmax.f32 %v7103_v32, %v7123_v18  ;;  %v2734_v9 = vadd.f32 %v2733_v50, %v2732_v17 }
 0x72a   : > { %v7139_v60 = vpop.f32.mrf.mxu0  ;;  %v2741_v35 = vadd.f32 %v2740_v59, %v2739_v52  ;;  %v7144_v43 = vmul.f32 %v6977_v0, %v2756_v61  ;;  %v7147_v15 = vmul.f32 %v6983_v14, %v2756_v61  ;;  %v7150_v44 = vmul.f32 %v6967_v24, %v2756_v61 }
 0x72b   : > { %2826 = vmax.xlane.f32.xlu1 %v2825_v12  ;;  %v7153_v34 = vmul.f32 %v6973_v16, %v2756_v61  ;;  %5424 = vrcp.f32 %v2734_v9 }
 0x72c   : > { %8091 = vst [vmem:[#allocation36_spill] sm:$0xff] %v7144_v43  ;;  %8092 = vst [vmem:[#allocation39_spill] sm:$0xff] %v7147_v15  ;;  %v5423_v48 = vpop.eup %5422  ;;  %v7155_v4 = vpop.f32.mrf.mxu0  ;;  %v2742_v23 = vrot.slane %v2741_v35, 1 }
 0x72d   : > { %8093 = vst [vmem:[#allocation38_spill] sm:$0xff] %v7150_v44  ;;  %8094 = vst [vmem:[#allocation41_spill] sm:$0xff] %v7153_v34  ;;  %v2828_v50 = vmax.f32 %v7139_v60, %v7155_v4  ;;  %v2757_v17 = vmul.f32 0.17677669, %v5423_v48 }
 0x72e   : > { %v7163_v24 = vpop.f32.mrf.mxu0  ;;  %v2743_v52 = vadd.f32 %v2742_v23, %v2741_v35 }
 0x72f   : > { %2829 = vmax.xlane.f32.xlu1 %v2828_v50  ;;  %v7166_v16 = vmul.f32 %v7001_v40, %v2757_v17  ;;  %v7169_v59 = vmul.f32 %v7005_v21, %v2757_v17  ;;  %v7172_v9 = vmul.f32 %v6990_v28, %v2757_v17  ;;  %v7175_v12 = vmul.f32 %v6995_v13, %v2757_v17 }
 0x730   : > { %v7177_v61 = vpop.f32.mrf.mxu0  ;;  %5426 = vrcp.f32 %v2743_v52 }
 0x731   : > { %8095 = vst [vmem:[#allocation40_spill] sm:$0xff] %v7166_v16  ;;  %8096 = vst [vmem:[#allocation44_spill] sm:$0xff] %v7169_v59  ;;  %v2831_v48 = vmax.f32 %v7163_v24, %v7177_v61 }
 0x732   : > { %8097 = vst [vmem:[#allocation43_spill] sm:$0xff] %v7172_v9  ;;  %8098 = vst [vmem:[#allocation45_spill] sm:$0xff] %v7175_v12  ;;  %v7185_v21 = vpop.f32.mrf.mxu0 }
 0x733   : > { %2832 = vmax.xlane.f32.xlu1 %v2831_v48 }
 0x734   : > { %v7187_v28 = vpop.f32.mrf.mxu0 }
 0x735   : > { %v2834_v13 = vmax.f32 %v7185_v21, %v7187_v28 }
 0x736   : > { %v7191_v35 = vpop.f32.mrf.mxu0 }
 0x737   : > { %2835 = vmax.xlane.f32.xlu1 %v2834_v13 }
 0x738   : > { %v7193_v50 = vpop.f32.mrf.mxu0  ;;  %v5425_v17 = vpop.eup %5424 }
 0x739   : > { %v2837_v52 = vmax.f32 %v7191_v35, %v7193_v50  ;;  %v2758_v0 = vmul.f32 0.17677669, %v5425_v17 }
 0x73a   : > { %v2425_v14 = vpop.f32.mrf.mxu0 }
 0x73b   : > { %2838 = vmax.xlane.f32.xlu1 %v2837_v52  ;;  %v7198_v48 = vmul.f32 %v7063_v10, %v2758_v0  ;;  %v7201_v23 = vmul.f32 %v7069_v49, %v2758_v0  ;;  %v7204_v37 = vmul.f32 %v7055_v62, %v2758_v0  ;;  %v7207_v13 = vmul.f32 %v7059_v5, %v2758_v0 }
 0x73c   : > { %v2427_v40 = vpop.f32.mrf.mxu0 }
 0x73d   : > { %8099 = vst [vmem:[#allocation42_spill] sm:$0xff] %v7198_v48  ;;  %8100 = vst [vmem:[#allocation47_spill] sm:$0xff] %v7201_v23  ;;  %v5427_v44 = vpop.eup %5426 }
 0x73e   : > { %8101 = vst [vmem:[#allocation46_spill] sm:$0xff] %v7204_v37  ;;  %8102 = vst [vmem:[#allocation53_spill] sm:$0xff] %v7207_v13  ;;  %v2759_v34 = vmul.f32 0.17677669, %v5427_v44  ;;  %v2429_v52 = vpop.f32.mrf.mxu0  ;;  %v4817_v37 = vpack.i.bf16 %v2425_v14, %v2427_v40 }
 0x740   : > { %v7214_v10 = vmul.f32 %v7083_v30, %v2759_v34  ;;  %v7217_v49 = vmul.f32 %v7089_v36, %v2759_v34  ;;  %v7220_v62 = vmul.f32 %v7074_v53, %v2759_v34  ;;  %v7223_v5 = vmul.f32 %v7078_v51, %v2759_v34  ;;  %v2431_v17 = vpop.f32.mrf.mxu0 }
 0x741   : > { %v4819_v13 = vpack.i.bf16 %v2429_v52, %v2431_v17 }
 0x742   : > { %8103 = vst [vmem:[#allocation52_spill] sm:$0xff] %v7214_v10  ;;  %8104 = vst [vmem:[#allocation49_spill] sm:$0xff] %v7217_v49  ;;  %v2435_v9 = vpop.f32.mrf.mxu0 }
 0x743   : > { %8105 = vst [vmem:[#allocation48_spill] sm:$0xff] %v7220_v62  ;;  %8106 = vst [vmem:[#allocation55_spill] sm:$0xff] %v7223_v5 }
 0x744   : > { %v2437_v30 = vpop.f32.mrf.mxu0 }
 0x745   : > { %v4821_v48 = vpack.i.bf16 %v2435_v9, %v2437_v30 }
 0x746   : > { %v2439_v36 = vpop.f32.mrf.mxu0 }
 0x748   : > { %v2441_v53 = vpop.f32.mrf.mxu0 }
 0x749   : > { %v4823_v23 = vpack.i.bf16 %v2439_v36, %v2441_v53 }
 0x74a   : > { %v2445_v51 = vpop.f32.mrf.mxu0 }
 0x74c   : > { %4818 = vxpose.xlu0.b32.start [1/4] (short) %v4817_v37, 128  ;;  %v2447_v34 = vpop.f32.mrf.mxu0 }
 0x74d   : > { %v4905_v49 = vpack.i.bf16 %v2445_v51, %v2447_v34 }
 0x74e   : > { %v2449_v12 = vpop.f32.mrf.mxu0 }
 0x750   : > { %4820 = vxpose.xlu0.b32.cont [2/4] (short) %v4819_v13, 128  ;;  %v2451_v44 = vpop.f32.mrf.mxu0 }
 0x751   : > { %v4907_v62 = vpack.i.bf16 %v2449_v12, %v2451_v44 }
 0x752   : > { %v2455_v10 = vpop.f32.mrf.mxu0 }
 0x754   : > { %4822 = vxpose.xlu0.b32.cont [3/4] (short) %v4821_v48, 128  ;;  %v2457_v0 = vpop.f32.mrf.mxu0 }
 0x755   : > { %v4909_v37 = vpack.i.bf16 %v2455_v10, %v2457_v0 }
 0x756   : > { %v2459_v14 = vpop.f32.mrf.mxu0 }
 0x758   : > { %4824 = vxpose.xlu0.b32.end [4/4] (short) %v4823_v23, 128  ;;  %v2461_v40 = vpop.f32.mrf.mxu0 }
 0x759   : > { %v4911_v13 = vpack.i.bf16 %v2459_v14, %v2461_v40 }
 0x76e   : > { %4906 = vxpose.xlu1.b32.start [1/4] (short) %v4905_v49, 128 }
 0x772   : > { %4908 = vxpose.xlu1.b32.cont [2/4] (short) %v4907_v62, 128 }
 0x776   : > { %4910 = vxpose.xlu1.b32.cont [3/4] (short) %v4909_v37, 128 }
 0x77a   : > { %4912 = vxpose.xlu1.b32.end [4/4] (short) %v4911_v13, 128 }
 0x788   : > { %v2794_v9 = vpop.xlane.xlu0 %2793 }
 0x789   : > { %v2841_v13 = vsub.f32 %v6945_v47, %v2794_v9 }
 0x78c   : > { %v2797_v48 = vpop.xlane.xlu0 %2796 }
 0x790   : > { %v2800_v17 = vpop.xlane.xlu0 %2799 }
 0x791   : > { %v2844_v52 = vsub.f32 %v6961_v46, %v2800_v17  ;;  %v2845_v30 = vsub.f32 %v6963_v6, %v2800_v17 }
 0x793   : > { %v2880_v53 = vmul.f32 1.442695, %v2844_v52  ;;  %v2882_v12 = vmul.f32 1.442695, %v2845_v30 }
 0x794   : > { %v2803_v23 = vpop.xlane.xlu0 %2802 }
 0x795   : > { %5428 = vpow2.f32 %v2880_v53  ;;  %v2847_v47 = vsub.f32 %v6981_v2, %v2803_v23 }
 0x796   : > { %5430 = vpow2.f32 %v2882_v12  ;;  %v2874_v12 = vmul.f32 1.442695, %v2841_v13 }
 0x799   : > { %v2806_v36 = vpop.xlane.xlu0 %2805 }
 0x79a   : > { %v2848_v49 = vsub.f32 %v6988_v33, %v2806_v36  ;;  %v2849_v62 = vsub.f32 %v6999_v55, %v2806_v36  ;;  %v2842_v36 = vsub.f32 %v6952_v1, %v2797_v48  ;;  %v2886_v1 = vmul.f32 1.442695, %v2847_v47 }
 0x79c   : > { %v2809_v10 = vpop.xlane.xlu1 %2808  ;;  %v2888_v44 = vmul.f32 1.442695, %v2848_v49  ;;  %v2890_v51 = vmul.f32 1.442695, %v2849_v62  ;;  %v2843_v49 = vsub.f32 %v6957_v31, %v2797_v48  ;;  %v2846_v62 = vsub.f32 %v6971_v22, %v2803_v23 }
 0x79d   : > { %v2850_v0 = vsub.f32 %v7009_v41, %v2809_v10  ;;  %v2851_v34 = vsub.f32 %v7012_v45, %v2809_v10  ;;  %v2840_v45 = vsub.f32 %v6936_v57, %v2794_v9  ;;  %v2876_v9 = vmul.f32 1.442695, %v2842_v36 }
 0x79e   : > { %5432 = vpow2.f32 %v2888_v44  ;;  %v2878_v10 = vmul.f32 1.442695, %v2843_v49 }
 0x79f   : > { %v2892_v46 = vmul.f32 1.442695, %v2850_v0  ;;  %5434 = vpow2.f32 %v2890_v51  ;;  %v2894_v6 = vmul.f32 1.442695, %v2851_v34  ;;  %v2872_v53 = vmul.f32 1.442695, %v2840_v45 }
 0x7a0   : > { %v2812_v30 = vpop.xlane.xlu0 %2811  ;;  %v2884_v0 = vmul.f32 1.442695, %v2846_v62 }
 0x7a1   : > { %5436 = vpow2.f32 %v2892_v46  ;;  %v2852_v31 = vsub.f32 %v7017_v42, %v2812_v30  ;;  %v2853_v22 = vsub.f32 %v7034_v39, %v2812_v30 }
 0x7a2   : > { %5438 = vpow2.f32 %v2894_v6  ;;  %v7235_v14 = vpop.eup %5428 }
 0x7a3   : > { %v7237_v33 = vpop.eup %5430  ;;  %5440 = vpow2.f32 %v2872_v53  ;;  %v2896_v34 = vmul.f32 1.442695, %v2852_v31  ;;  %v2898_v23 = vmul.f32 1.442695, %v2853_v22 }
 0x7a4   : > { %v2942_v37 = vadd.f32 %v7237_v33, %v7235_v14  ;;  %v2815_v44 = vpop.xlane.xlu0 %2814  ;;  %5442 = vpow2.f32 %v2874_v12 }
 0x7a5   : > { %5444 = vpow2.f32 %v2876_v9  ;;  %v2854_v2 = vsub.f32 %v7051_v56, %v2815_v44  ;;  %v2855_v46 = vsub.f32 %v7061_v26, %v2815_v44 }
 0x7a6   : > { %5446 = vpow2.f32 %v2878_v10 }
 0x7a7   : > { %5448 = vpow2.f32 %v2884_v0  ;;  %v2900_v13 = vmul.f32 1.442695, %v2854_v2  ;;  %v2902_v39 = vmul.f32 1.442695, %v2855_v46  ;;  %v2465_v2 = vpop.f32.mrf.mxu0 }
 0x7a8   : > { %5450 = vpow2.f32 %v2886_v1  ;;  %v2818_v51 = vpop.xlane.xlu0 %2817 }
 0x7a9   : > { %v2856_v45 = vsub.f32 %v7071_v63, %v2818_v51  ;;  %5452 = vpow2.f32 %v2896_v34  ;;  %v2857_v42 = vsub.f32 %v7076_v3, %v2818_v51 }
 0x7aa   : > { %5454 = vpow2.f32 %v2898_v23 }
 0x7ab   : > { %v7239_v55 = vpop.eup %5432  ;;  %v2904_v53 = vmul.f32 1.442695, %v2856_v45  ;;  %5456 = vpow2.f32 %v2900_v13  ;;  %v2906_v63 = vmul.f32 1.442695, %v2857_v42 }
 0x7ac   : > { %8107 = vst [vmem:[#allocation54_spill] sm:$0xff] %v7239_v55  ;;  %v7243_v41 = vpop.eup %5434  ;;  %v2821_v48 = vpop.xlane.xlu1 %2820  ;;  %5458 = vpow2.f32 %v2902_v39 }
 0x7ad   : > { %v2948_v17 = vadd.f32 %v7243_v41, %v7239_v55  ;;  %v2858_v30 = vsub.f32 %v7087_v29, %v2821_v48  ;;  %v2859_v56 = vsub.f32 %v7092_v58, %v2821_v48  ;;  %5460 = vpow2.f32 %v2904_v53 }
 0x7ae   : > { %v7246_v40 = vpop.eup %5436  ;;  %5462 = vpow2.f32 %v2906_v63 }
 0x7af   : > { %8108 = vst [vmem:[#allocation51_spill] sm:$0xff] %v7246_v40  ;;  %v7251_v52 = vpop.eup %5438  ;;  %v2908_v3 = vmul.f32 1.442695, %v2858_v30  ;;  %v2910_v29 = vmul.f32 1.442695, %v2859_v56 }
 0x7b0   : > { %v2951_v57 = vadd.f32 %v7251_v52, %v7246_v40  ;;  %v2824_v6 = vpop.xlane.xlu1 %2823 }
 0x7b1   : > { %v2860_v9 = vsub.f32 %v7097_v54, %v2824_v6  ;;  %v2861_v44 = vsub.f32 %v7099_v20, %v2824_v6  ;;  %5464 = vpow2.f32 %v2908_v3  ;;  %v2467_v3 = vpop.f32.mrf.mxu0 }
 0x7b2   : > { %5466 = vpow2.f32 %v2910_v29 }
 0x7b3   : > { %v2912_v48 = vmul.f32 1.442695, %v2860_v9  ;;  %v2914_v46 = vmul.f32 1.442695, %v2861_v44 }
 0x7b4   : > { %v2827_v12 = vpop.xlane.xlu1 %2826 }
 0x7b5   : > { %2943 = vadd.xlane.f32.xlu0 %v2942_v37  ;;  %v2862_v22 = vsub.f32 %v7103_v32, %v2827_v12  ;;  %v2863_v6 = vsub.f32 %v7123_v18, %v2827_v12  ;;  %5468 = vpow2.f32 %v2912_v48 }
 0x7b6   : > { %5470 = vpow2.f32 %v2914_v46 }
 0x7b7   : > { %v2918_v18 = vmul.f32 1.442695, %v2863_v6 }
 0x7b8   : > { %v7288_v51 = vpop.xlane.xlu1 %2829 }
 0x7b9   : > { %2949 = vadd.xlane.f32.xlu0 %v2948_v17  ;;  %v7267_v17 = vpop.eup %5440 }
 0x7ba   : > { %v7270_v36 = vpop.eup %5442 }
 0x7bb   : > { %v7273_v49 = vpop.eup %5444 }
 0x7bc   : > { %v7275_v62 = vpop.eup %5446  ;;  %v7305_v12 = vpop.xlane.xlu1 %2832 }
 0x7bd   : > { %2952 = vadd.xlane.f32.xlu0 %v2951_v57  ;;  %v2936_v57 = vadd.f32 %v7270_v36, %v7267_v17  ;;  %v7279_v47 = vpop.eup %5448  ;;  %v2939_v0 = vadd.f32 %v7275_v62, %v7273_v49 }
 0x7be   : > { %v7282_v10 = vpop.eup %5450 }
 0x7bf   : > { %v2945_v54 = vadd.f32 %v7282_v10, %v7279_v47  ;;  %v7295_v42 = vpop.eup %5452 }
 0x7c0   : > { %8109 = vst [vmem:[#allocation50_spill] sm:$0xff] %v7295_v42  ;;  %v7301_v53 = vpop.eup %5454 }
 0x7c1   : > { %8110 = vst [vmem:[#allocation61_spill] sm:$0xff] %v7301_v53 }
 0x7c8   : > { %v7263_v37 = vpop.trf.xlu0 }
 0x7c9   : > { %v4829_v45 = vunpack.i.h.bf16 %v7263_v37  ;;  %v4826_v13 = vunpack.i.l.bf16 %v7263_v37  ;;  %v7307_v37 = vpop.eup %5456 }
 0x7ca   : > { %8111 = vst [vmem:[#allocation60_spill] sm:$0xff] %v7307_v37 }
 0x7cc   : > { %v4830_v26 = vpop.trf.xlu0 }
 0x7cd   : > { %v4834_v32 = vunpack.i.h.bf16 %v4830_v26  ;;  %v4831_v39 = vunpack.i.l.bf16 %v4830_v26  ;;  %v2954_v26 = vadd.f32 %v7301_v53, %v7295_v42 }
 0x7cf   : > { %v7311_v29 = vpack.c.bf16 %v4831_v39, %v4826_v13  ;;  %v7313_v9 = vpack.c.bf16 %v4834_v32, %v4829_v45 }
 0x7d0   : > { %v4835_v58 = vpop.trf.xlu0 }
 0x7d1   : > { %2937 = vadd.xlane.f32.xlu1 %v2936_v57  ;;  %v4839_v1 = vunpack.i.h.bf16 %v4835_v58  ;;  %v4836_v31 = vunpack.i.l.bf16 %v4835_v58  ;;  %v2916_v57 = vmul.f32 1.442695, %v2862_v22  ;;  %v7315_v58 = vpop.eup %5458 }
 0x7d2   : > { %8112 = vst [vmem:[#allocation57_spill] sm:$0xff] %v7315_v58  ;;  %v2957_v48 = vadd.f32 %v7315_v58, %v7307_v37 }
 0x7d3   : > { %5472 = vpow2.f32 %v2916_v57 }
 0x7d4   : > { %v4840_v34 = vpop.trf.xlu0  ;;  %5474 = vpow2.f32 %v2918_v18  ;;  %v4993_v18 = vpack.i.bf16 %v2465_v2, %v2467_v3 }
 0x7d5   : > { %2940 = vadd.xlane.f32.xlu1 %v2939_v0  ;;  %v4844_v23 = vunpack.i.h.bf16 %v4840_v34  ;;  %v4841_v20 = vunpack.i.l.bf16 %v4840_v34  ;;  %v2469_v0 = vpop.f32.mrf.mxu0 }
 0x7d7   : > { %v7297_v30 = vpack.c.bf16 %v4841_v20, %v4836_v31  ;;  %v7299_v56 = vpack.c.bf16 %v4844_v23, %v4839_v1  ;;  %v7319_v1 = vpop.eup %5460  ;;  %v2471_v20 = vpop.f32.mrf.mxu0 }
 0x7d8   : > { %v7303_v63 = vpop.trf.xlu0  ;;  %8113 = vst [vmem:[#allocation56_spill] sm:$0xff] %v7319_v1  ;;  %v7321_v31 = vpop.eup %5462  ;;  %v4995_v16 = vpack.i.bf16 %v2469_v0, %v2471_v20 }
 0x7d9   : > { %2946 = vadd.xlane.f32.xlu1 %v2945_v54  ;;  %8114 = vst [vmem:[#allocation63_spill] sm:$0xff] %v7321_v31  ;;  %v7325_v22 = vpop.eup %5464  ;;  %v7327_v54 = vpop.xlane.xlu1 %2835  ;;  %v2960_v46 = vadd.f32 %v7321_v31, %v7319_v1 }
 0x7da   : > { %8115 = vst [vmem:[#allocation62_spill] sm:$0xff] %v7325_v22  ;;  %v7331_v23 = vpop.eup %5466  ;;  %v2475_v45 = vpop.f32.mrf.mxu0 }
 0x7db   : > { %8116 = vst [vmem:[#allocation59_spill] sm:$0xff] %v7331_v23  ;;  %v7339_v32 = vpop.eup %5468  ;;  %v2963_v39 = vadd.f32 %v7331_v23, %v7325_v22 }
 0x7dc   : > { %v7317_v44 = vpop.trf.xlu0  ;;  %8117 = vst [vmem:[#allocation58_spill] sm:$0xff] %v7339_v32  ;;  %v7343_v57 = vpop.eup %5470 }
 0x7dd   : > { %2955 = vadd.xlane.f32.xlu1 %v2954_v26  ;;  %v7337_v13 = vpop.xlane.xlu1 %2838  ;;  %8118 = vst [vmem:[#allocation8_spill] sm:$0xff] %v7343_v57 }
 0x7e0   : > { %v7329_v34 = vpop.trf.xlu0  ;;  %v7347_v5 = vpop.eup %5472 }
 0x7e1   : > { %2958 = vadd.xlane.f32.xlu1 %v2957_v48  ;;  %v2477_v48 = vpop.f32.mrf.mxu0  ;;  %8119 = vst [vmem:[#allocation9_spill] sm:$0xff] %v7347_v5  ;;  %v7349_v15 = vpop.eup %5474 }
 0x7e2   : > { %8120 = vst [vmem:[#allocation10_spill] sm:$0xff] %v7349_v15  ;;  %v2969_v2 = vadd.f32 %v7349_v15, %v7347_v5  ;;  %v4997_v27 = vpack.i.bf16 %v2475_v45, %v2477_v48 }
 0x7e3   : > { %v2479_v11 = vpop.f32.mrf.mxu0 }
 0x7e4   : > { %v7335_v6 = vpop.trf.xlu0 }
 0x7e5   : > { %2961 = vadd.xlane.f32.xlu1 %v2960_v46  ;;  %v2966_v46 = vadd.f32 %v7343_v57, %v7339_v32  ;;  %v2481_v25 = vpop.f32.mrf.mxu0 }
 0x7e8   : > { %v7345_v26 = vpop.trf.xlu0 }
 0x7e9   : > { %2964 = vadd.xlane.f32.xlu1 %v2963_v39 }
 0x7ea   : > { %4994 = vxpose.xlu0.b32.start [1/4] (short) %v4993_v18, 128  ;;  %v4913_v43 = vpop.trf.xlu1 }
 0x7eb   : > { %v4917_v3 = vunpack.i.h.bf16 %v4913_v43  ;;  %v4914_v39 = vunpack.i.l.bf16 %v4913_v43 }
 0x7ec   : > { %v7353_v59 = vpop.trf.xlu0 }
 0x7ed   : > { %2967 = vadd.xlane.f32.xlu1 %v2966_v46 }
 0x7ee   : > { %4996 = vxpose.xlu0.b32.cont [2/4] (short) %v4995_v16, 128  ;;  %v4918_v8 = vpop.trf.xlu1  ;;  %v4999_v16 = vpack.i.bf16 %v2479_v11, %v2481_v25 }
 0x7ef   : > { %v4922_v38 = vunpack.i.h.bf16 %v4918_v8  ;;  %v4919_v18 = vunpack.i.l.bf16 %v4918_v8 }
 0x7f0   : > { %v7357_v7 = vpop.trf.xlu0 }
 0x7f1   : > { %2970 = vadd.xlane.f32.xlu1 %v2969_v2  ;;  %v7359_v20 = vpack.c.bf16 %v4919_v18, %v4914_v39  ;;  %v7361_v19 = vpack.c.bf16 %v4922_v38, %v4917_v3 }
 0x7f2   : > { %4998 = vxpose.xlu0.b32.cont [3/4] (short) %v4997_v27, 128  ;;  %v4923_v0 = vpop.trf.xlu1 }
 0x7f3   : > { %8121 = vst [vmem:[#allocation11_spill] sm:$0xff] %v7359_v20  ;;  %8122 = vst [vmem:[#allocation12_spill] sm:$0xff] %v7361_v19  ;;  %v4927_v32 = vunpack.i.h.bf16 %v4923_v0  ;;  %v4924_v5 = vunpack.i.l.bf16 %v4923_v0 }
 0x7f4   : > { %v4880_v46 = vpop.trf.xlu0 }
 0x7f6   : > { %5000 = vxpose.xlu0.b32.end [4/4] (short) %v4999_v16, 128  ;;  %v4928_v43 = vpop.trf.xlu1 }
 0x7f7   : > { %v4932_v57 = vunpack.i.h.bf16 %v4928_v43  ;;  %v4929_v1 = vunpack.i.l.bf16 %v4928_v43 }
 0x7f8   : > { %v4885_v8 = vpop.trf.xlu0 }
 0x7f9   : > { %v7363_v48 = vpack.c.bf16 %v4929_v1, %v4924_v5  ;;  %v7365_v15 = vpack.c.bf16 %v4932_v57, %v4927_v32  ;;  %v4886_v22 = vunpack.i.l.bf16 %v4885_v8  ;;  %v4889_v37 = vunpack.i.h.bf16 %v4885_v8 }
 0x7fa   : > { %v4933_v45 = vpop.trf.xlu1  ;;  %v4866_v8 = vunpack.i.l.bf16 %v7345_v26 }
 0x7fb   : > { %v4937_v2 = vunpack.i.h.bf16 %v4933_v45  ;;  %v4934_v39 = vunpack.i.l.bf16 %v4933_v45  ;;  %v4876_v45 = vunpack.i.l.bf16 %v7357_v7 }
 0x7fc   : > { %v4890_v27 = vpop.trf.xlu0 }
 0x7fd   : > { %v4891_v43 = vunpack.i.l.bf16 %v4890_v27  ;;  %v4894_v53 = vunpack.i.h.bf16 %v4890_v27  ;;  %v4871_v27 = vunpack.i.l.bf16 %v7353_v59 }
 0x7fe   : > { %v4938_v18 = vpop.trf.xlu1 }
 0x7ff   : > { %v4942_v38 = vunpack.i.h.bf16 %v4938_v18  ;;  %v4939_v3 = vunpack.i.l.bf16 %v4938_v18 }
 0x800   : > { %v4895_v25 = vpop.trf.xlu0 }
 0x801   : > { %v7367_v16 = vpack.c.bf16 %v4939_v3, %v4934_v39  ;;  %v7369_v0 = vpack.c.bf16 %v4942_v38, %v4937_v2  ;;  %v4899_v5 = vunpack.i.h.bf16 %v4895_v25  ;;  %v4896_v1 = vunpack.i.l.bf16 %v4895_v25 }
 0x802   : > { %v4943_v11 = vpop.trf.xlu1  ;;  %v4881_v39 = vunpack.i.l.bf16 %v4880_v46  ;;  %v3334_v38 = vpack.c.bf16 %v4891_v43, %v4886_v22  ;;  %v4879_v25 = vunpack.i.h.bf16 %v7357_v7  ;;  %v2485_v7 = vpop.f32.mrf.mxu0  ;;  %v3332_v43 = vpack.c.bf16 %v4871_v27, %v4866_v8 }
 0x803   : > { %v4947_v31 = vunpack.i.h.bf16 %v4943_v11  ;;  %v4944_v42 = vunpack.i.l.bf16 %v4943_v11  ;;  %v4884_v11 = vunpack.i.h.bf16 %v4880_v46  ;;  %v4854_v8 = vunpack.i.h.bf16 %v7317_v44 }
 0x804   : > { %v4900_v32 = vpop.trf.xlu0 }
 0x805   : > { %v4904_v57 = vunpack.i.h.bf16 %v4900_v32  ;;  %v4901_v23 = vunpack.i.l.bf16 %v4900_v32  ;;  %v3326_v32 = vpack.c.bf16 %v4894_v53, %v4889_v37  ;;  %v4856_v53 = vunpack.i.l.bf16 %v7329_v34 }
 0x806   : > { %v4948_v18 = vpop.trf.xlu1  ;;  %v4861_v37 = vunpack.i.l.bf16 %v7335_v6 }
 0x807   : > { %v4952_v19 = vunpack.i.h.bf16 %v4948_v18  ;;  %v4949_v55 = vunpack.i.l.bf16 %v4948_v18  ;;  %v3335_v3 = vpack.c.bf16 %v4901_v23, %v4896_v1  ;;  %v3327_v2 = vpack.c.bf16 %v4904_v57, %v4899_v5 }
 0x808   : > { %v3333_v18 = vpack.c.bf16 %v4881_v39, %v4876_v45  ;;  %v2487_v45 = vpop.f32.mrf.mxu0 }
 0x809   : > { %v7372_v58 = vpack.c.bf16 %v4949_v55, %v4944_v42  ;;  %v7374_v40 = vpack.c.bf16 %v4952_v19, %v4947_v31  ;;  %4292 = vmatprep.subr.bf16.mxu1 %v3335_v3  ;;  %v4869_v55 = vunpack.i.h.bf16 %v7345_v26  ;;  %v4874_v19 = vunpack.i.h.bf16 %v7353_v59 }
 0x80a   : > { %v4953_v20 = vpop.trf.xlu1  ;;  %4293 = vmatpush3.bf16.msra.mxu1 %v3327_v2  ;;  %v3325_v31 = vpack.c.bf16 %v4884_v11, %v4879_v25  ;;  %v4859_v26 = vunpack.i.h.bf16 %v7329_v34  ;;  %v4864_v59 = vunpack.i.h.bf16 %v7335_v6  ;;  %v4846_v3 = vunpack.i.l.bf16 %v7303_v63 }
 0x80b   : > { %4294 = vmatprep.subr.bf16.mxu1 %v3334_v38  ;;  %v4957_v23 = vunpack.i.h.bf16 %v4953_v20  ;;  %v4954_v5 = vunpack.i.l.bf16 %v4953_v20  ;;  %v3324_v39 = vpack.c.bf16 %v4874_v19, %v4869_v55  ;;  %v4851_v2 = vunpack.i.l.bf16 %v7317_v44 }
 0x80c   : > { %v3331_v38 = vpack.c.bf16 %v4861_v37, %v4856_v53  ;;  %v3323_v34 = vpack.c.bf16 %v4864_v59, %v4859_v26 }
 0x80e   : > { %v4958_v42 = vpop.trf.xlu1  ;;  %4295 = vmatpush3.bf16.msra.mxu1 %v3326_v32  ;;  %v4849_v32 = vunpack.i.h.bf16 %v7303_v63 }
 0x80f   : > { %v4962_v22 = vunpack.i.h.bf16 %v4958_v42  ;;  %v4959_v46 = vunpack.i.l.bf16 %v4958_v42  ;;  %4296 = vmatprep.subr.bf16.mxu1 %v3333_v18  ;;  %v2489_v18 = vpop.f32.mrf.mxu0 }
 0x811   : > { %v7383_v1 = vpack.c.bf16 %v4959_v46, %v4954_v5  ;;  %v7385_v57 = vpack.c.bf16 %v4962_v22, %v4957_v23  ;;  %v3330_v5 = vpack.c.bf16 %v4851_v2, %v4846_v3  ;;  %v3322_v22 = vpack.c.bf16 %v4854_v8, %v4849_v32 }
 0x812   : > { %v4963_v20 = vpop.trf.xlu1  ;;  %4297 = vmatpush3.bf16.msra.mxu1 %v3325_v31  ;;  %v2491_v31 = vpop.f32.mrf.mxu0 }
 0x813   : > { %4298 = vmatprep.subr.bf16.mxu1 %v3332_v43  ;;  %v4967_v25 = vunpack.i.h.bf16 %v4963_v20  ;;  %v4964_v11 = vunpack.i.l.bf16 %v4963_v20  ;;  %v5081_v20 = vpack.i.bf16 %v2485_v7, %v2487_v45 }
 0x814   : > { %v2495_v53 = vpop.f32.mrf.mxu0 }
 0x816   : > { %v4968_v27 = vpop.trf.xlu1  ;;  %4299 = vmatpush3.bf16.msra.mxu1 %v3324_v39  ;;  %v2497_v3 = vpop.f32.mrf.mxu0 }
 0x817   : > { %v4972_v6 = vunpack.i.h.bf16 %v4968_v27  ;;  %v4969_v23 = vunpack.i.l.bf16 %v4968_v27  ;;  %4300 = vmatprep.subr.bf16.mxu1 %v3331_v38  ;;  %v5085_v7 = vpack.i.bf16 %v2495_v53, %v2497_v3 }
 0x818   : > { %v2499_v32 = vpop.f32.mrf.mxu0 }
 0x819   : > { %v7393_v55 = vpack.c.bf16 %v4969_v23, %v4964_v11  ;;  %v7395_v19 = vpack.c.bf16 %v4972_v6, %v4967_v25  ;;  %v5083_v25 = vpack.i.bf16 %v2489_v18, %v2491_v31  ;;  %v2865_v18 = vsub.f32 %v7155_v4, %v7288_v51 }
 0x81a   : > { %v4973_v42 = vpop.trf.xlu1  ;;  %4301 = vmatpush3.bf16.msra.mxu1 %v3323_v34  ;;  %v2501_v45 = vpop.f32.mrf.mxu0  ;;  %v2870_v31 = vsub.f32 %v7191_v35, %v7337_v13 }
 0x81b   : > { %4302 = vmatprep.subr.bf16.mxu1 %v3330_v5  ;;  %v4977_v63 = vunpack.i.h.bf16 %v4973_v42  ;;  %v4974_v46 = vunpack.i.l.bf16 %v4973_v42  ;;  %v2922_v23 = vmul.f32 1.442695, %v2865_v18  ;;  %v2869_v5 = vsub.f32 %v7187_v28, %v7327_v54 }
 0x81c   : > { %v2932_v4 = vmul.f32 1.442695, %v2870_v31 }
 0x81e   : > { %v4978_v44 = vpop.trf.xlu1  ;;  %4303 = vmatpush3.bf16.msra.mxu1 %v3322_v22  ;;  %v2930_v22 = vmul.f32 1.442695, %v2869_v5 }
 0x81f   : > { %v4982_v37 = vunpack.i.h.bf16 %v4978_v44  ;;  %v4979_v43 = vunpack.i.l.bf16 %v4978_v44  ;;  %4304 = vmatprep.subr.bf16.mxu1 %v7297_v30 }
 0x821   : > { %v7398_v26 = vpack.c.bf16 %v4979_v43, %v4974_v46  ;;  %v7400_v59 = vpack.c.bf16 %v4982_v37, %v4977_v63 }
 0x822   : > { %v4983_v39 = vpop.trf.xlu1  ;;  %4305 = vmatpush3.bf16.msra.mxu1 %v7299_v56  ;;  %v5087_v56 = vpack.i.bf16 %v2499_v32, %v2501_v45  ;;  %v2867_v45 = vsub.f32 %v7177_v61, %v7305_v12 }
 0x823   : > { %4306 = vmatprep.subr.bf16.mxu1 %v7311_v29  ;;  %v4987_v2 = vunpack.i.h.bf16 %v4983_v39  ;;  %v4984_v38 = vunpack.i.l.bf16 %v4983_v39  ;;  %v2864_v29 = vsub.f32 %v7139_v60, %v7288_v51  ;;  %v2871_v60 = vsub.f32 %v7193_v50, %v7337_v13 }
 0x824   : > { %5082 = vxpose.xlu1.b32.start [1/4] (short) %v5081_v20, 128 }
 0x825   : > { %v2920_v6 = vmul.f32 1.442695, %v2864_v29  ;;  %v2934_v51 = vmul.f32 1.442695, %v2871_v60 }
 0x826   : > { %v4988_v11 = vpop.trf.xlu1  ;;  %4307 = vmatpush3.bf16.msra.mxu1 %v7313_v9  ;;  %v2868_v9 = vsub.f32 %v7185_v21, %v7327_v54 }
 0x827   : > { %v4992_v8 = vunpack.i.h.bf16 %v4988_v11  ;;  %v4989_v27 = vunpack.i.l.bf16 %v4988_v11  ;;  %5476 = vpow2.f32 %v2920_v6 }
 0x828   : > { %5084 = vxpose.xlu1.b32.cont [2/4] (short) %v5083_v25, 128  ;;  %v2928_v42 = vmul.f32 1.442695, %v2868_v9  ;;  %5478 = vpow2.f32 %v2922_v23 }
 0x829   : > { %v3351_v30 = vpack.c.bf16 %v4989_v27, %v4984_v38  ;;  %v7405_v34 = vpack.c.bf16 %v4992_v8, %v4987_v2 }
 0x82a   : > { %5480 = vpow2.f32 %v2928_v42 }
 0x82b   : > { %4320 = vmatprep.subr.bf16.mxu1 %v3351_v30  ;;  %5482 = vpow2.f32 %v2930_v22  ;;  %v2866_v30 = vsub.f32 %v7163_v24, %v7305_v12 }
 0x82c   : > { %5086 = vxpose.xlu1.b32.cont [3/4] (short) %v5085_v7, 128  ;;  %5484 = vpow2.f32 %v2932_v4  ;;  %v2926_v4 = vmul.f32 1.442695, %v2867_v45  ;;  %v8127_v45 = vld [vmem:[#allocation12_spill] sm:$0xff] }
 0x82d   : > { %5486 = vpow2.f32 %v2934_v51  ;;  %v2924_v24 = vmul.f32 1.442695, %v2866_v30  ;;  %v8126_v30 = vld [vmem:[#allocation54_spill] sm:$0xff] }
 0x830   : > { %5088 = vxpose.xlu1.b32.end [4/4] (short) %v5087_v56, 128 }
 0x834   : > { %v7419_v21 = vpop.eup %5476 }
 0x835   : > { %v7421_v63 = vpop.eup %5478 }
 0x836   : > { %v2972_v35 = vadd.f32 %v7421_v63, %v7419_v21 }
 0x837   : > { %v7423_v28 = vpop.eup %5480 }
 0x838   : > { %v7427_v54 = vpop.eup %5482 }
 0x839   : > { %v7429_v46 = vpop.eup %5484  ;;  %v2978_v50 = vadd.f32 %v7427_v54, %v7423_v28 }
 0x83a   : > { %v7433_v13 = vpop.eup %5486 }
 0x83b   : > { %v2981_v53 = vadd.f32 %v7433_v13, %v7429_v46 }
 0x83e   : > { %v2944_v44 = vpop.xlane.xlu0 %2943 }
 0x842   : > { %v2950_v43 = vpop.xlane.xlu0 %2949 }
 0x846   : > { %v2953_v39 = vpop.xlane.xlu0 %2952 }
 0x853   : > { %2973 = vadd.xlane.f32.xlu0 %v2972_v35 }
 0x857   : > { %2979 = vadd.xlane.f32.xlu0 %v2978_v50 }
 0x85a   : > { %v2938_v37 = vpop.xlane.xlu1 %2937 }
 0x85b   : > { %2982 = vadd.xlane.f32.xlu0 %v2981_v53  ;;  %5488 = vrcp.f32 %v2938_v37 }
 0x85e   : > { %v2941_v20 = vpop.xlane.xlu1 %2940 }
 0x85f   : > { %5490 = vrcp.f32 %v2941_v20 }
 0x860   : > { %5492 = vrcp.f32 %v2944_v44 }
 0x862   : > { %v2947_v3 = vpop.xlane.xlu1 %2946 }
 0x863   : > { %5494 = vrcp.f32 %v2947_v3 }
 0x864   : > { %5496 = vrcp.f32 %v2953_v39 }
 0x865   : > { %5498 = vrcp.f32 %v2950_v43 }
 0x866   : > { %v5001_v2 = vpop.trf.xlu0  ;;  %v2956_v61 = vpop.xlane.xlu1 %2955  ;;  %5500 = vpow2.f32 %v2924_v24 }
 0x867   : > { %v5005_v38 = vunpack.i.h.bf16 %v5001_v2  ;;  %v5002_v25 = vunpack.i.l.bf16 %v5001_v2  ;;  %5502 = vpow2.f32 %v2926_v4  ;;  %v8131_v4 = vld [vmem:[#allocation50_spill] sm:$0xff] }
 0x868   : > { %v5489_v32 = vpop.eup %5488 }
 0x869   : > { %v3001_v9 = vmul.f32 %v5489_v32, %v7270_v36  ;;  %v3000_v23 = vmul.f32 %v5489_v32, %v7267_v17 }
 0x86a   : > { %v5006_v11 = vpop.trf.xlu0  ;;  %v2959_v39 = vpop.xlane.xlu1 %2958 }
 0x86b   : > { %v5010_v8 = vunpack.i.h.bf16 %v5006_v11  ;;  %v5007_v7 = vunpack.i.l.bf16 %v5006_v11  ;;  %5504 = vrcp.f32 %v2959_v39 }
 0x86c   : > { %v5491_v27 = vpop.eup %5490  ;;  %5506 = vrcp.f32 %v2956_v61 }
 0x86d   : > { %v3003_v56 = vmul.f32 %v5491_v27, %v7275_v62  ;;  %v3002_v29 = vmul.f32 %v5491_v27, %v7273_v49  ;;  %v7443_v18 = vpack.c.bf16 %v5010_v8, %v5005_v38  ;;  %v7447_v5 = vpack.c.bf16 %v5007_v7, %v5002_v25  ;;  %v5493_v42 = vpop.eup %5492  ;;  %v8123_v25 = vld [vmem:[#allocation11_spill] sm:$0xff]  ;;  %v8125_v8 = vld [vmem:[#allocation57_spill] sm:$0xff] }
 0x86e   : > { %v5011_v6 = vpop.trf.xlu0  ;;  %v3005_v35 = vmul.f32 %v5493_v42, %v7237_v33 }
 0x86f   : > { %v3049_v22 = vpack.c.bf16 %v3003_v56, %v3001_v9  ;;  %v3048_v60 = vpack.c.bf16 %v3002_v29, %v3000_v23  ;;  %v5015_v12 = vunpack.i.h.bf16 %v5011_v6  ;;  %v5012_v49 = vunpack.i.l.bf16 %v5011_v6  ;;  %v8129_v23 = vld [vmem:[#allocation60_spill] sm:$0xff] }
 0x870   : > { %v5495_v31 = vpop.eup %5494 }
 0x871   : > { %v3007_v62 = vmul.f32 %v5495_v31, %v7282_v10  ;;  %3416 = vmatprep.mubr.bf16.mxu1 %v3049_v22  ;;  %v5497_v36 = vpop.eup %5496  ;;  %v3006_v37 = vmul.f32 %v5495_v31, %v7279_v47  ;;  %v8130_v22 = vld [vmem:[#allocation59_spill] sm:$0xff] }
 0x872   : > { %v5016_v51 = vpop.trf.xlu0  ;;  %3417 = vmatmul.mubr.bf16.vlgmr.msra.gmra.mxu1 %v3048_v60  ;;  %v5499_v53 = vpop.eup %5498  ;;  %v3011_v33 = vmul.f32 %v5497_v36, %v7251_v52 }
 0x873   : > { %v5020_v17 = vunpack.i.h.bf16 %v5016_v51  ;;  %4321 = vmatpush3.bf16.msra.mxu1 %v7405_v34  ;;  %v5017_v50 = vunpack.i.l.bf16 %v5016_v51  ;;  %v3051_v44 = vpack.c.bf16 %v3007_v62, %v3005_v35  ;;  %v3004_v34 = vmul.f32 %v5493_v42, %v7235_v14  ;;  %v2962_v52 = vpop.xlane.xlu1 %2961  ;;  %v7472_v14 = vpop.eup %5500 }
 0x874   : > { %4322 = vmatprep.subr.bf16.mxu1 %v7398_v26  ;;  %v3009_v3 = vmul.f32 %v5499_v53, %v7243_v41  ;;  %v7475_v41 = vpop.eup %5502  ;;  %v3008_v7 = vmul.f32 %v5499_v53, %v8126_v30 }
 0x875   : > { %v7454_v10 = vpack.c.bf16 %v5020_v17, %v5015_v12  ;;  %3424 = vmatprep.mubr.bf16.mxu1 %v3051_v44  ;;  %v7459_v20 = vpack.c.bf16 %v5017_v50, %v5012_v49  ;;  %v3050_v26 = vpack.c.bf16 %v3006_v37, %v3004_v34  ;;  %v8132_v12 = vld [vmem:[#allocation63_spill] sm:$0xff] }
 0x876   : > { %v7456_v43 = vpop.trf.xlu0  ;;  %v3053_v2 = vpack.c.bf16 %v3011_v33, %v3009_v3 }
 0x877   : > { %4323 = vmatpush3.bf16.msra.mxu1 %v7400_v59  ;;  %v2965_v59 = vpop.xlane.xlu1 %2964 }
 0x878   : > { %4324 = vmatprep.subr.bf16.mxu1 %v7393_v55  ;;  %5508 = vrcp.f32 %v2965_v59 }
 0x879   : > { %5510 = vrcp.f32 %v2962_v52 }
 0x87a   : > { %v7465_v47 = vpop.trf.xlu0  ;;  %3425 = vmatmul.mubr.bf16.gmra.mxu1 %v3050_v26 }
 0x87b   : > { %4325 = vmatpush3.bf16.msra.mxu1 %v7395_v19  ;;  %3465 = vmatprep.mubr.bf16.mxu1 %v3053_v2  ;;  %v7503_v31 = vpop.xlane.xlu1 %2967 }
 0x87c   : > { %4326 = vmatprep.subr.bf16.mxu1 %v7383_v1  ;;  %v2975_v1 = vadd.f32 %v7475_v41, %v7472_v14 }
 0x87e   : > { %v7469_v38 = vpop.trf.xlu0 }
 0x87f   : > { %4327 = vmatpush3.bf16.msra.mxu1 %v7385_v57  ;;  %v5505_v57 = vpop.eup %5504 }
 0x880   : > { %4328 = vmatprep.subr.bf16.mxu1 %v7372_v58  ;;  %v3015_v27 = vmul.f32 %v5505_v57, %v8125_v8  ;;  %v3014_v42 = vmul.f32 %v5505_v57, %v8129_v23 }
 0x882   : > { %v7477_v55 = vpop.trf.xlu0 }
 0x883   : > { %4329 = vmatpush3.bf16.msra.mxu1 %v7374_v40  ;;  %v5507_v40 = vpop.eup %5506 }
 0x884   : > { %4330 = vmatprep.subr.bf16.mxu1 %v7367_v16  ;;  %v8124_v16 = vld [vmem:[#allocation51_spill] sm:$0xff]  ;;  %v3012_v61 = vmul.f32 %v5507_v40, %v8131_v4 }
 0x885   : > { %v3010_v11 = vmul.f32 %v5497_v36, %v8124_v16  ;;  %v7498_v9 = vpop.eup %5508  ;;  %v2971_v36 = vpop.xlane.xlu1 %2970 }
 0x886   : > { %v7483_v19 = vpop.trf.xlu0  ;;  %v3019_v60 = vmul.f32 %v7498_v9, %v8130_v22  ;;  %v3054_v49 = vpack.c.bf16 %v3014_v42, %v3012_v61  ;;  %5512 = vrcp.f32 %v2971_v36 }
 0x887   : > { %2976 = vadd.xlane.f32.xlu1 %v2975_v1  ;;  %4331 = vmatpush3.bf16.msra.mxu1 %v7369_v0  ;;  %v8128_v0 = vld [vmem:[#allocation61_spill] sm:$0xff]  ;;  %v3052_v56 = vpack.c.bf16 %v3010_v11, %v3008_v7  ;;  %5514 = vrcp.f32 %v7503_v31 }
 0x888   : > { %4332 = vmatprep.subr.bf16.mxu1 %v7363_v48  ;;  %v3013_v48 = vmul.f32 %v5507_v40, %v8128_v0 }
 0x88a   : > { %v7487_v58 = vpop.trf.xlu0  ;;  %v3055_v29 = vpack.c.bf16 %v3015_v27, %v3013_v48 }
 0x88b   : > { %4333 = vmatpush3.bf16.msra.mxu1 %v7365_v15  ;;  %v7500_v15 = vpop.eup %5510  ;;  %v5047_v23 = vunpack.i.l.bf16 %v7487_v58  ;;  %v5050_v4 = vunpack.i.h.bf16 %v7487_v58  ;;  %v5040_v58 = vunpack.i.h.bf16 %v7477_v55 }
 0x88c   : > { %4334 = vmatprep.subr.bf16.mxu1 %v8123_v25  ;;  %v3017_v62 = vmul.f32 %v7500_v15, %v8132_v12 }
 0x88e   : > { %v7492_v32 = vpop.trf.xlu0  ;;  %v3057_v51 = vpack.c.bf16 %v3019_v60, %v3017_v62  ;;  %v5045_v60 = vunpack.i.h.bf16 %v7483_v19  ;;  %v5032_v62 = vunpack.i.l.bf16 %v7469_v38 }
 0x88f   : > { %4335 = vmatpush3.bf16.msra.mxu1 %v8127_v45  ;;  %v5052_v52 = vunpack.i.l.bf16 %v7492_v32  ;;  %v5055_v45 = vunpack.i.h.bf16 %v7492_v32 }
 0x892   : > { %v5056_v6 = vpop.trf.xlu0  ;;  %3466 = vmatmul.mubr.bf16.vlgmr.msra.gmra.mxu1 %v3052_v56 }
 0x893   : > { %3473 = vmatprep.mubr.bf16.mxu1 %v3055_v29  ;;  %v5057_v16 = vunpack.i.l.bf16 %v5056_v6  ;;  %v5060_v0 = vunpack.i.h.bf16 %v5056_v6  ;;  %v5042_v29 = vunpack.i.l.bf16 %v7483_v19  ;;  %v5513_v36 = vpop.eup %5512 }
 0x895   : > { %v3365_v42 = vpack.c.bf16 %v5057_v16, %v5052_v52  ;;  %v3357_v12 = vpack.c.bf16 %v5060_v0, %v5055_v45  ;;  %v8137_v45 = vld [vmem:[#allocation9_spill] sm:$0xff] }
 0x896   : > { %v5061_v24 = vpop.trf.xlu0 }
 0x897   : > { %v5062_v44 = vunpack.i.l.bf16 %v5061_v24  ;;  %v5065_v59 = vunpack.i.h.bf16 %v5061_v24 }
 0x89a   : > { %v5066_v35 = vpop.trf.xlu0  ;;  %3474 = vmatmul.mubr.bf16.gmra.mxu1 %v3054_v49  ;;  %v5037_v49 = vunpack.i.l.bf16 %v7477_v55  ;;  %v5030_v55 = vunpack.i.h.bf16 %v7465_v47 }
 0x89b   : > { %3514 = vmatprep.mubr.bf16.mxu1 %v3057_v51  ;;  %v5067_v53 = vunpack.i.l.bf16 %v5066_v35  ;;  %v5070_v1 = vunpack.i.h.bf16 %v5066_v35  ;;  %v3364_v51 = vpack.c.bf16 %v5047_v23, %v5042_v29 }
 0x89d   : > { %v3366_v27 = vpack.c.bf16 %v5067_v53, %v5062_v44  ;;  %v3358_v56 = vpack.c.bf16 %v5070_v1, %v5065_v59  ;;  %v3356_v44 = vpack.c.bf16 %v5050_v4, %v5045_v60  ;;  %v5022_v53 = vunpack.i.l.bf16 %v7456_v43  ;;  %v5515_v59 = vpop.eup %5514  ;;  %v8134_v1 = vld [vmem:[#allocation10_spill] sm:$0xff] }
 0x89e   : > { %v5071_v17 = vpop.trf.xlu0 }
 0x89f   : > { %v5075_v37 = vunpack.i.h.bf16 %v5071_v17  ;;  %v5072_v33 = vunpack.i.l.bf16 %v5071_v17 }
 0x8a0   : > { %v5089_v50 = vpop.trf.xlu1 }
 0x8a1   : > { %v5093_v39 = vunpack.i.h.bf16 %v5089_v50  ;;  %v5090_v34 = vunpack.i.l.bf16 %v5089_v50  ;;  %v5035_v50 = vunpack.i.h.bf16 %v7469_v38 }
 0x8a2   : > { %v5076_v3 = vpop.trf.xlu0 }
 0x8a3   : > { %v5080_v26 = vunpack.i.h.bf16 %v5076_v3  ;;  %v5077_v2 = vunpack.i.l.bf16 %v5076_v3  ;;  %v5025_v3 = vunpack.i.h.bf16 %v7456_v43  ;;  %v8133_v43 = vld [vmem:[#allocation62_spill] sm:$0xff] }
 0x8a4   : > { %v5094_v57 = vpop.trf.xlu1 }
 0x8a5   : > { %v5098_v40 = vunpack.i.h.bf16 %v5094_v57  ;;  %v5095_v25 = vunpack.i.l.bf16 %v5094_v57  ;;  %v3367_v11 = vpack.c.bf16 %v5077_v2, %v5072_v33  ;;  %v3359_v8 = vpack.c.bf16 %v5080_v26, %v5075_v37 }
 0x8a6   : > { %v5027_v37 = vunpack.i.l.bf16 %v7465_v47  ;;  %v3363_v33 = vpack.c.bf16 %v5037_v49, %v5032_v62  ;;  %v3354_v2 = vpack.c.bf16 %v5030_v55, %v5025_v3  ;;  %v3018_v47 = vmul.f32 %v7498_v9, %v8133_v43 }
 0x8a7   : > { %v7511_v30 = vpack.c.bf16 %v5095_v25, %v5090_v34  ;;  %v7513_v7 = vpack.c.bf16 %v5098_v40, %v5093_v39  ;;  %4348 = vmatprep.subr.bf16.mxu1 %v3367_v11  ;;  %v3355_v34 = vpack.c.bf16 %v5040_v58, %v5035_v50  ;;  %v3023_v57 = vmul.f32 %v5513_v36, %v8134_v1  ;;  %v8135_v25 = vld [vmem:[#allocation56_spill] sm:$0xff] }
 0x8a8   : > { %v5099_v48 = vpop.trf.xlu1  ;;  %4349 = vmatpush3.bf16.msra.mxu1 %v3359_v8  ;;  %v3362_v38 = vpack.c.bf16 %v5027_v37, %v5022_v53  ;;  %v3016_v16 = vmul.f32 %v7500_v15, %v8135_v25  ;;  %v8136_v11 = vld [vmem:[#allocation8_spill] sm:$0xff] }
 0x8a9   : > { %4350 = vmatprep.subr.bf16.mxu1 %v3366_v27  ;;  %v5103_v24 = vunpack.i.h.bf16 %v5099_v48  ;;  %v5100_v22 = vunpack.i.l.bf16 %v5099_v48  ;;  %v8138_v48 = vld [vmem:[#allocation58_spill] sm:$0xff] }
 0x8aa   : > { %v3056_v8 = vpack.c.bf16 %v3018_v47, %v3016_v16  ;;  %v3020_v9 = vmul.f32 %v5515_v59, %v8138_v48 }
 0x8ac   : > { %v5104_v61 = vpop.trf.xlu1  ;;  %4351 = vmatpush3.bf16.msra.mxu1 %v3358_v56 }
 0x8ad   : > { %v5108_v32 = vunpack.i.h.bf16 %v5104_v61  ;;  %v5105_v6 = vunpack.i.l.bf16 %v5104_v61  ;;  %4352 = vmatprep.subr.bf16.mxu1 %v3365_v42 }
 0x8af   : > { %v7522_v35 = vpack.c.bf16 %v5105_v6, %v5100_v22  ;;  %v7524_v17 = vpack.c.bf16 %v5108_v32, %v5103_v24 }
 0x8b0   : > { %v7527_v19 = vpop.trf.xlu1  ;;  %4353 = vmatpush3.bf16.msra.mxu1 %v3357_v12 }
 0x8b1   : > { %4354 = vmatprep.subr.bf16.mxu1 %v3364_v51 }
 0x8b4   : > { %v7532_v39 = vpop.trf.xlu1  ;;  %4355 = vmatpush3.bf16.msra.mxu1 %v3356_v44 }
 0x8b5   : > { %4356 = vmatprep.subr.bf16.mxu1 %v3363_v33  ;;  %v5115_v25 = vunpack.i.l.bf16 %v7532_v39 }
 0x8b8   : > { %v7537_v26 = vpop.trf.xlu1  ;;  %4357 = vmatpush3.bf16.msra.mxu1 %v3355_v34 }
 0x8b9   : > { %4358 = vmatprep.subr.bf16.mxu1 %v3362_v38  ;;  %v5123_v43 = vunpack.i.h.bf16 %v7537_v26 }
 0x8bc   : > { %v7539_v52 = vpop.trf.xlu1  ;;  %4359 = vmatpush3.bf16.msra.mxu1 %v3354_v2  ;;  %v5120_v2 = vunpack.i.l.bf16 %v7537_v26 }
 0x8bd   : > { %4360 = vmatprep.subr.bf16.mxu1 %v7459_v20  ;;  %v3021_v20 = vmul.f32 %v5515_v59, %v8136_v11  ;;  %v5128_v47 = vunpack.i.h.bf16 %v7539_v52 }
 0x8bf   : > { %v3059_v27 = vpack.c.bf16 %v3023_v57, %v3021_v20  ;;  %v5110_v57 = vunpack.i.l.bf16 %v7527_v19  ;;  %v3371_v11 = vpack.c.bf16 %v5128_v47, %v5123_v43 }
 0x8c0   : > { %v5129_v31 = vpop.trf.xlu1  ;;  %4361 = vmatpush3.bf16.msra.mxu1 %v7454_v10 }
 0x8c1   : > { %4362 = vmatprep.subr.bf16.mxu1 %v7447_v5  ;;  %v3022_v5 = vmul.f32 %v5513_v36, %v8137_v45  ;;  %v5130_v33 = vunpack.i.l.bf16 %v5129_v31  ;;  %v5133_v3 = vunpack.i.h.bf16 %v5129_v31  ;;  %v5125_v36 = vunpack.i.l.bf16 %v7539_v52  ;;  %v8139_v52 = vld [vmem:[#allocation72_spill] sm:$0xff] }
 0x8c2   : > { %v5113_v31 = vunpack.i.h.bf16 %v7527_v19  ;;  %v3378_v20 = vpack.c.bf16 %v5115_v25, %v5110_v57 }
 0x8c3   : > { %v3058_v56 = vpack.c.bf16 %v3022_v5, %v3020_v9  ;;  %v3379_v16 = vpack.c.bf16 %v5125_v36, %v5120_v2 }
 0x8c4   : > { %v5134_v40 = vpop.trf.xlu1  ;;  %4363 = vmatpush3.bf16.msra.mxu1 %v7443_v18 }
 0x8c5   : > { %v5135_v34 = vunpack.i.l.bf16 %v5134_v40  ;;  %v5138_v55 = vunpack.i.h.bf16 %v5134_v40  ;;  %v5118_v40 = vunpack.i.h.bf16 %v7532_v39 }
 0x8c7   : > { %3515 = vmatmul.mubr.bf16.vlgmr.msra.gmra.mxu1 %v3056_v8  ;;  %v3380_v59 = vpack.c.bf16 %v5135_v34, %v5130_v33  ;;  %v3372_v1 = vpack.c.bf16 %v5138_v55, %v5133_v3  ;;  %v3370_v8 = vpack.c.bf16 %v5118_v40, %v5113_v31 }
 0x8c8   : > { %v5139_v10 = vpop.trf.xlu1  ;;  %3522 = vmatprep.mubr.bf16.mxu1 %v3059_v27  ;;  %v8140_v27 = vld [vmem:[#allocation65_spill] sm:$0xff] }
 0x8c9   : > { %v5140_v62 = vunpack.i.l.bf16 %v5139_v10  ;;  %v5143_v58 = vunpack.i.h.bf16 %v5139_v10  ;;  %v8141_v19 = vpack.c.bf16 %v8139_v52, %v8140_v27 }
 0x8cc   : > { %v5144_v0 = vpop.trf.xlu1 }
 0x8cd   : > { %v5145_v49 = vunpack.i.l.bf16 %v5144_v0  ;;  %v5148_v44 = vunpack.i.h.bf16 %v5144_v0 }
 0x8cf   : > { %3523 = vmatmul.mubr.bf16.gmra.mxu1 %v3058_v56  ;;  %v3381_v37 = vpack.c.bf16 %v5145_v49, %v5140_v62  ;;  %v3373_v38 = vpack.c.bf16 %v5148_v44, %v5143_v58  ;;  %v8154_v62 = vmov 0  }
 0x8d0   : > { %v5149_v29 = vpop.trf.xlu1 }
 0x8d1   : > { %v5150_v24 = vunpack.i.l.bf16 %v5149_v29  ;;  %v5153_v12 = vunpack.i.h.bf16 %v5149_v29 }
 0x8d4   : > { %v5154_v23 = vpop.trf.xlu1 }
 0x8d5   : > { %v5155_v18 = vunpack.i.l.bf16 %v5154_v23  ;;  %v5158_v32 = vunpack.i.h.bf16 %v5154_v23 }
 0x8d7   : > { %v3382_v50 = vpack.c.bf16 %v5155_v18, %v5150_v24  ;;  %v3374_v53 = vpack.c.bf16 %v5158_v32, %v5153_v12  ;;  %v8142_v24 = vld [vmem:[#allocation67_spill] sm:$0xff]  ;;  %v8143_v18 = vld [vmem:[#allocation66_spill] sm:$0xff] }
 0x8d8   : > { %v5159_v42 = vpop.trf.xlu1  ;;  %v8152_v12 = vld [vmem:[#allocation74_spill] sm:$0xff] }
 0x8d9   : > { %v5163_v15 = vunpack.i.h.bf16 %v5159_v42  ;;  %v5160_v22 = vunpack.i.l.bf16 %v5159_v42 }
 0x8dc   : > { %v5164_v60 = vpop.trf.xlu1  ;;  %v2974_v26 = vpop.xlane.xlu0 %2973 }
 0x8dd   : > { %v5168_v4 = vunpack.i.h.bf16 %v5164_v60  ;;  %v5165_v61 = vunpack.i.l.bf16 %v5164_v60  ;;  %5516 = vrcp.f32 %v2974_v26 }
 0x8df   : > { %v3375_v6 = vpack.c.bf16 %v5168_v4, %v5163_v15  ;;  %v3383_v51 = vpack.c.bf16 %v5165_v61, %v5160_v22  ;;  %v8144_v22 = vpack.c.bf16 %v8142_v24, %v8143_v18  ;;  %v8149_v4 = vld [vmem:[#allocation76_spill] sm:$0xff]  ;;  %v8161_v18 = vld [vmem:[#allocation37_spill] sm:$0xff] }
 0x8e0   : > { %v2980_v39 = vpop.xlane.xlu0 %2979 }
 0x8e1   : > { %4376 = vmatprep.subr.bf16.mxu1 %v3383_v51 }
 0x8e2   : > { %4377 = vmatpush3.bf16.msra.mxu1 %v3375_v6 }
 0x8e3   : > { %4378 = vmatprep.subr.bf16.mxu1 %v3382_v50 }
 0x8e4   : > { %v2983_v10 = vpop.xlane.xlu0 %2982 }
 0x8e5   : > { %5518 = vrcp.f32 %v2983_v10 }
 0x8e6   : > { %4379 = vmatpush3.bf16.msra.mxu1 %v3374_v53  ;;  %5520 = vrcp.f32 %v2980_v39 }
 0x8e7   : > { %4380 = vmatprep.subr.bf16.mxu1 %v3381_v37 }
 0x8ea   : > { %4381 = vmatpush3.bf16.msra.mxu1 %v3373_v38  ;;  %v5517_v5 = vpop.eup %5516 }
 0x8eb   : > { %4382 = vmatprep.subr.bf16.mxu1 %v3380_v59  ;;  %v3024_v48 = vmul.f32 %v5517_v5, %v7419_v21 }
 0x8ee   : > { %4383 = vmatpush3.bf16.msra.mxu1 %v3372_v1 }
 0x8ef   : > { %4384 = vmatprep.subr.bf16.mxu1 %v3379_v16 }
 0x8f2   : > { %4385 = vmatpush3.bf16.msra.mxu1 %v3371_v11 }
 0x8f3   : > { %4386 = vmatprep.subr.bf16.mxu1 %v3378_v20 }
 0x8f6   : > { %4387 = vmatpush3.bf16.msra.mxu1 %v3370_v8 }
 0x8f7   : > { %4388 = vmatprep.subr.bf16.mxu1 %v7522_v35  ;;  %v5519_v35 = vpop.eup %5518 }
 0x8f8   : > { %v5521_v0 = vpop.eup %5520  ;;  %v3031_v56 = vmul.f32 %v5519_v35, %v7433_v13  ;;  %v3030_v21 = vmul.f32 %v5519_v35, %v7429_v46 }
 0x8f9   : > { %v3029_v42 = vmul.f32 %v5521_v0, %v7427_v54  ;;  %v3028_v13 = vmul.f32 %v5521_v0, %v7423_v28  ;;  %v8151_v54 = vld [vmem:[#allocation75_spill] sm:$0xff] }
 0x8fa   : > { %4389 = vmatpush3.bf16.msra.mxu1 %v7524_v17  ;;  %v8153_v32 = vpack.c.bf16 %v8151_v54, %v8152_v12  ;;  %v8170_v12 = vld [vmem:[#allocation45_spill] sm:$0xff] }
 0x8fb   : > { %4390 = vmatprep.subr.bf16.mxu1 %v7511_v30  ;;  %v3025_v30 = vmul.f32 %v5517_v5, %v7421_v63  ;;  %v3063_v15 = vpack.c.bf16 %v3031_v56, %v3029_v42  ;;  %v8145_v63 = vld [vmem:[#allocation71_spill] sm:$0xff]  ;;  %v3062_v6 = vpack.c.bf16 %v3030_v21, %v3028_v13  ;;  %v8155_v56 = vld [vmem:[#allocation34_spill] sm:$0xff]  ;;  %v8158_v42 = vld [vmem:[#allocation33_spill] sm:$0xff] }
 0x8fc   : > { %v8165_v21 = vld [vmem:[#allocation40_spill] sm:$0xff] }
 0x8fe   : > { %4391 = vmatpush3.bf16.msra.mxu1 %v7513_v7 }
 0x8ff   : > { %3622 = vmatprep.subr.bf16.mxu1 %v8141_v19 }
 0x910   : > { %v2977_v45 = vpop.xlane.xlu1 %2976 }
 0x911   : > { %5522 = vrcp.f32 %v2977_v45 }
 0x91e   : > { %v5523_v17 = vpop.eup %5522 }
 0x91f   : > { %v3027_v7 = vmul.f32 %v5523_v17, %v7475_v41  ;;  %v3026_v9 = vmul.f32 %v5523_v17, %v7472_v14  ;;  %v8146_v41 = vld [vmem:[#allocation70_spill] sm:$0xff]  ;;  %v8148_v14 = vld [vmem:[#allocation69_spill] sm:$0xff] }
 0x920   : > { %v8147_v60 = vpack.c.bf16 %v8145_v63, %v8146_v41  ;;  %v8150_v61 = vpack.c.bf16 %v8148_v14, %v8149_v4  ;;  %v8167_v4 = vld [vmem:[#allocation39_spill] sm:$0xff] }
 0x921   : > { %v3061_v29 = vpack.c.bf16 %v3027_v7, %v3025_v30  ;;  %v3060_v23 = vpack.c.bf16 %v3026_v9, %v3024_v48 }
 0x923   : > { %3563 = vmatprep.mubr.bf16.mxu1 %v3061_v29  ;;  %v8156_v29 = vld [vmem:[#allocation35_spill] sm:$0xff] }
 0x924   : > { %3564 = vmatmul.mubr.bf16.vlgmr.msra.gmra.mxu1 %v3060_v23  ;;  %v8157_v23 = vpack.c.bf16 %v8155_v56, %v8156_v29 }
 0x925   : > { %3623 = vmatpush1.bf16.msra.mxu1 %v8144_v22  ;;  %3571 = vmatprep.mubr.bf16.mxu1 %v3063_v15  ;;  %v8159_v15 = vld [vmem:[#allocation73_spill] sm:$0xff]  ;;  %v8162_v22 = vld [vmem:[#allocation32_spill] sm:$0xff] }
 0x926   : > { %3624 = vmatprep.subr.bf16.mxu1 %v8147_v60  ;;  %v8160_v24 = vpack.c.bf16 %v8158_v42, %v8159_v15  ;;  %v8163_v63 = vpack.c.bf16 %v8161_v18, %v8162_v22  ;;  %v8164_v60 = vld [vmem:[#allocation44_spill] sm:$0xff] }
 0x927   : > { %v8166_v13 = vpack.c.bf16 %v8164_v60, %v8165_v21  ;;  %v8188_v15 = vld [vmem:[#allocation68_spill] sm:$0xff] }
 0x928   : > { %v8189_v18 = vld [vmem:[#allocation64_spill] sm:$0xff] }
 0x929   : > { %3625 = vmatpush1.bf16.msra.mxu1 %v8150_v61  ;;  %v8168_v61 = vld [vmem:[#allocation36_spill] sm:$0xff] }
 0x92a   : > { %3697 = vmatprep.subr.bf16.mxu1 %v8153_v32  ;;  %v8169_v54 = vpack.c.bf16 %v8167_v4, %v8168_v61  ;;  %v8171_v32 = vld [vmem:[#allocation43_spill] sm:$0xff] }
 0x92c   : > { %3572 = vmatmul.mubr.bf16.gmra.mxu1 %v3062_v6  ;;  %v8172_v6 = vpack.c.bf16 %v8170_v12, %v8171_v32 }
 0x92d   : > { %3642 = vmatprep.mubr.bf16.mxu1 %v8154_v62 }
 0x932   : > { %v4308_v49 = vpop.f32.mrf.mxu1 }
 0x934   : > { %v4309_v51 = vpop.f32.mrf.mxu1 }
 0x935   : > { %v4310_v44 = vadd.f32 %v4309_v51, %v4308_v49  ;;  %v8173_v49 = vld [vmem:[#allocation41_spill] sm:$0xff]  ;;  %v8174_v51 = vld [vmem:[#allocation38_spill] sm:$0xff] }
 0x936   : > { %v4311_v50 = vpop.f32.mrf.mxu1 }
 0x938   : > { %v4312_v58 = vpop.f32.mrf.mxu1 }
 0x939   : > { %v4313_v46 = vadd.f32 %v4312_v58, %v4311_v50  ;;  %v8175_v50 = vpack.c.bf16 %v8173_v49, %v8174_v51 }
 0x93a   : > { %v4314_v53 = vpop.f32.mrf.mxu1 }
 0x93b   : > { %v3580_v28 = vpack.c.bf16 %v4313_v46, %v4310_v44  ;;  %v8176_v44 = vld [vmem:[#allocation49_spill] sm:$0xff]  ;;  %v8177_v46 = vld [vmem:[#allocation52_spill] sm:$0xff] }
 0x93c   : > { %v4315_v37 = vpop.f32.mrf.mxu1 }
 0x93d   : > { %3588 = vxpose.xlu0.c.b16.start [1/2] (short) (narrow) %v3580_v28, 32  ;;  %v4316_v38 = vadd.f32 %v4315_v37, %v4314_v53  ;;  %v8178_v53 = vpack.c.bf16 %v8176_v44, %v8177_v46 }
 0x93e   : > { %v4317_v33 = vpop.f32.mrf.mxu1 }
 0x940   : > { %v4318_v34 = vpop.f32.mrf.mxu1 }
 0x941   : > { %v4319_v3 = vadd.f32 %v4318_v34, %v4317_v33 }
 0x943   : > { %v3581_v55 = vpack.c.bf16 %v4319_v3, %v4316_v38 }
 0x945   : > { %3589 = vxpose.xlu0.c.b16.end [2/2] (short) (narrow) %v3581_v55, 32 }
 0x952   : > { %v4336_v2 = vpop.f32.mrf.mxu1 }
 0x954   : > { %v4337_v36 = vpop.f32.mrf.mxu1 }
 0x955   : > { %v4338_v47 = vadd.f32 %v4337_v36, %v4336_v2 }
 0x956   : > { %v4339_v59 = vpop.f32.mrf.mxu1 }
 0x958   : > { %v4340_v43 = vpop.f32.mrf.mxu1 }
 0x959   : > { %v4341_v1 = vadd.f32 %v4340_v43, %v4339_v59 }
 0x95a   : > { %v4342_v57 = vpop.f32.mrf.mxu1 }
 0x95b   : > { %v3582_v25 = vpack.c.bf16 %v4341_v1, %v4338_v47 }
 0x95c   : > { %v4343_v16 = vpop.f32.mrf.mxu1 }
 0x95d   : > { %3663 = vxpose.xlu1.c.b16.start [1/2] (short) (narrow) %v3582_v25, 32  ;;  %v4344_v11 = vadd.f32 %v4343_v16, %v4342_v57  ;;  %v8179_v16 = vld [vmem:[#allocation47_spill] sm:$0xff] }
 0x95e   : > { %v4345_v31 = vpop.f32.mrf.mxu1 }
 0x960   : > { %v4346_v40 = vpop.f32.mrf.mxu1 }
 0x961   : > { %v4347_v20 = vadd.f32 %v4346_v40, %v4345_v31  ;;  %v8180_v31 = vld [vmem:[#allocation42_spill] sm:$0xff] }
 0x962   : > { %v8181_v40 = vpack.c.bf16 %v8179_v16, %v8180_v31 }
 0x963   : > { %v3583_v8 = vpack.c.bf16 %v4347_v20, %v4344_v11  ;;  %v8182_v11 = vld [vmem:[#allocation55_spill] sm:$0xff]  ;;  %v8183_v20 = vld [vmem:[#allocation48_spill] sm:$0xff] }
 0x965   : > { %3664 = vxpose.xlu1.c.b16.end [2/2] (short) (narrow) %v3583_v8, 32  ;;  %v8184_v8 = vpack.c.bf16 %v8182_v11, %v8183_v20 }
 0x969   : > { %5170 = vset.pattern.permute.xlu1 %v8154_v62 }
 0x987   : > { %v4364_v26 = vpop.f32.mrf.mxu1 }
 0x989   : > { %v4365_v52 = vpop.f32.mrf.mxu1 }
 0x98a   : > { %v4366_v39 = vadd.f32 %v4365_v52, %v4364_v26  ;;  %v276_v26 = vld [vmem:[%s7788_s3] sm:$0xf]  ;;  %v8185_v52 = vld [vmem:[#allocation53_spill] sm:$0xff] }
 0x98b   : > { %v4367_v27 = vpop.f32.mrf.mxu1 }
 0x98d   : > { %v4368_v19 = vpop.f32.mrf.mxu1 }
 0x98e   : > { %v4369_v10 = vadd.f32 %v4368_v19, %v4367_v27  ;;  %v8186_v27 = vld [vmem:[#allocation46_spill] sm:$0xff] }
 0x98f   : > { %v4370_v45 = vpop.f32.mrf.mxu1  ;;  %v8187_v19 = vpack.c.bf16 %v8185_v52, %v8186_v27 }
 0x990   : > { %v3584_v5 = vpack.c.bf16 %v4369_v10, %v4366_v39 }
 0x991   : > { %v4371_v35 = vpop.f32.mrf.mxu1 }
 0x992   : > { %3738 = vxpose.xlu0.c.b16.start [1/2] (short) (narrow) %v3584_v5, 32  ;;  %v4372_v30 = vadd.f32 %v4371_v35, %v4370_v45 }
 0x993   : > { %v4373_v0 = vpop.f32.mrf.mxu1 }
 0x995   : > { %v4374_v17 = vpop.f32.mrf.mxu1 }
 0x996   : > { %v4375_v7 = vadd.f32 %v4374_v17, %v4373_v0 }
 0x998   : > { %v3585_v48 = vpack.c.bf16 %v4375_v7, %v4372_v30 }
 0x99a   : > { %3739 = vxpose.xlu0.c.b16.end [2/2] (short) (narrow) %v3585_v48, 32 }
 0x9a3   : > { %v3596_v9 = vpop.trf.xlu0 }
 0x9a4   : > { %4161 = vmatmul.mubr.msk.bf16.vlgmr.msra.gmra.mxu1 %vm1810_vm2, %v3596_v9 }
 0x9a5   : > { %3698 = vmatpush1.bf16.msra.mxu1 %v8157_v23  ;;  %3652 = vmatprep.mubr.bf16.mxu1 %v8154_v62 }
 0x9a6   : > { %3699 = vmatprep.subr.bf16.mxu1 %v8160_v24 }
 0x9a7   : > { %v3597_v41 = vpop.trf.xlu0 }
 0x9a9   : > { %3700 = vmatpush1.bf16.msra.mxu1 %v8163_v63 }
 0x9aa   : > { %3772 = vmatprep.subr.bf16.mxu1 %v8166_v13 }
 0x9ac   : > { %4162 = vmatmul.mubr.msk.bf16.gmra.mxu1 %vm1810_vm2, %v3597_v41 }
 0x9ad   : > { %3717 = vmatprep.mubr.bf16.mxu1 %v8154_v62 }
 0x9c3   : > { %v3671_v14 = vpop.trf.xlu1 }
 0x9c4   : > { %4163 = vmatmul.mubr.msk.bf16.vlgmr.msra.gmra.mxu1 %vm1810_vm2, %v3671_v14 }
 0x9c5   : > { %3773 = vmatpush1.bf16.msra.mxu1 %v8169_v54  ;;  %3727 = vmatprep.mubr.bf16.mxu1 %v8154_v62 }
 0x9c6   : > { %3774 = vmatprep.subr.bf16.mxu1 %v8172_v6 }
 0x9c7   : > { %v3672_v58 = vpop.trf.xlu1 }
 0x9c9   : > { %3775 = vmatpush1.bf16.msra.mxu1 %v8175_v50 }
 0x9ca   : > { %3847 = vmatprep.subr.bf16.mxu1 %v8178_v53 }
 0x9cc   : > { %4164 = vmatmul.mubr.msk.bf16.gmra.mxu1 %vm1810_vm2, %v3672_v58 }
 0x9cd   : > { %3792 = vmatprep.mubr.bf16.mxu1 %v8154_v62 }
 0x9e4   : > { %v4392_v28 = vpop.f32.mrf.mxu1 }
 0x9e6   : > { %v4393_v37 = vpop.f32.mrf.mxu1 }
 0x9e7   : > { %v4394_v38 = vadd.f32 %v4393_v37, %v4392_v28 }
 0x9e8   : > { %v4395_v33 = vpop.f32.mrf.mxu1 }
 0x9ea   : > { %v4396_v34 = vpop.f32.mrf.mxu1 }
 0x9eb   : > { %v4397_v3 = vadd.f32 %v4396_v34, %v4395_v33 }
 0x9ec   : > { %v4398_v55 = vpop.f32.mrf.mxu1 }
 0x9ed   : > { %v3586_v2 = vpack.c.bf16 %v4397_v3, %v4394_v38 }
 0x9ee   : > { %v4399_v36 = vpop.f32.mrf.mxu1 }
 0x9ef   : > { %3813 = vxpose.xlu0.c.b16.start [1/2] (short) (narrow) %v3586_v2, 32  ;;  %v4400_v47 = vadd.f32 %v4399_v36, %v4398_v55 }
 0x9f0   : > { %v4401_v59 = vpop.f32.mrf.mxu1 }
 0x9f2   : > { %v4402_v43 = vpop.f32.mrf.mxu1 }
 0x9f3   : > { %v4403_v1 = vadd.f32 %v4402_v43, %v4401_v59 }
 0x9f5   : > { %v3587_v57 = vpack.c.bf16 %v4403_v1, %v4400_v47 }
 0x9f7   : > { %3814 = vxpose.xlu0.c.b16.end [2/2] (short) (narrow) %v3587_v57, 32 }
 0x9f8   : > { %v3746_v25 = vpop.trf.xlu0 }
 0x9f9   : > { %4165 = vmatmul.mubr.msk.bf16.vlgmr.msra.gmra.mxu1 %vm1810_vm2, %v3746_v25 }
 0x9fa   : > { %3848 = vmatpush1.bf16.msra.mxu1 %v8181_v40  ;;  %3802 = vmatprep.mubr.bf16.mxu1 %v8154_v62 }
 0x9fb   : > { %3849 = vmatprep.subr.bf16.mxu1 %v8184_v8 }
 0x9fc   : > { %v3747_v39 = vpop.trf.xlu0 }
 0x9fe   : > { %3850 = vmatpush1.bf16.msra.mxu1 %v8187_v19 }
 0xa00   : > { %5169 = vset.pattern.permute.xlu0 %v8154_v62 }
 0xa01   : > { %2113 = vperm.xlu0 %5169, %v276_v26   ;;  %4166 = vmatmul.mubr.msk.bf16.gmra.mxu1 %vm1810_vm2, %v3747_v39 }
 0xa02   : > { %3867 = vmatprep.mubr.bf16.mxu1 %v8154_v62 }
 0xa55   : > { %v3821_v10 = vpop.trf.xlu0 }
 0xa56   : > { %4167 = vmatmul.mubr.msk.bf16.vlgmr.msra.gmra.mxu1 %vm1810_vm2, %v3821_v10 }
 0xa57   : > { %3877 = vmatprep.mubr.bf16.mxu1 %v8154_v62 }
 0xa59   : > { %v3822_v45 = vpop.trf.xlu0 }
 0xa5e   : > { %4168 = vmatmul.mubr.msk.bf16.gmra.mxu1 %vm1810_vm2, %v3822_v45 }
 0xa64   : > { %v7642_v5 = vpop.f32.mrf.mxu1 }
 0xa66   : > { %v7644_v35 = vpop.f32.mrf.mxu1 }
 0xa68   : > { %v7646_v0 = vpop.f32.mrf.mxu1 }
 0xa69   : > { %v3888_v17 = vpack.c.bf16 %v7646_v0, %v7642_v5 }
 0xa6a   : > { %v7650_v30 = vpop.f32.mrf.mxu1 }
 0xa6b   : > { %v3889_v7 = vpack.c.bf16 %v7650_v30, %v7644_v35 }
 0xa6c   : > { %v7654_v48 = vpop.f32.mrf.mxu1 }
 0xa6e   : > { %v7656_v62 = vpop.f32.mrf.mxu1 }
 0xa70   : > { %v7658_v9 = vpop.f32.mrf.mxu1 }
 0xa71   : > { %v3890_v56 = vpack.c.bf16 %v7658_v9, %v7654_v48 }
 0xa72   : > { %v7662_v29 = vpop.f32.mrf.mxu1 }
 0xa73   : > { %v3891_v23 = vpack.c.bf16 %v7662_v29, %v7656_v62 }
 0xa7c   : > { %v7666_v42 = vpop.permute.xlu0 %2113 }
 0xa7d   : > { %v7670_v24 = vadd.f32 %v8188_v15, %v7666_v42  ;;  %v7674_v22 = vadd.f32 %v8189_v18, %v7666_v42 }
 0xa7f   : > { %v2158_v63 = vsel %vm2157_vm3, %v7670_v24, 0.0  ;;  %v2159_v41 = vsel %vm2157_vm3, %v7674_v22, 0.0  ;;  %v2171_v60 = vmul.f32 %v7670_v24, %v7670_v24  ;;  %v2172_v21 = vmul.f32 %v7674_v22, %v7674_v22 }
 0xa80   : > { %v2160_v13 = vadd.f32 %v2159_v41, %v2158_v63 }
 0xa81   : > { %v2173_v14 = vsel %vm2157_vm3, %v2171_v60, 0.0  ;;  %v2174_v4 = vsel %vm2157_vm3, %v2172_v21, 0.0 }
 0xa82   : > { %2161 = vadd.xlane.f32.xlu0 %v2160_v13  ;;  %v2175_v61 = vadd.f32 %v2174_v4, %v2173_v14 }
 0xa84   : > { %2176 = vadd.xlane.f32.xlu1 %v2175_v61  ;;  %v7686_v54 = vpop.f32.mrf.mxu1 }
 0xa86   : > { %v3721_v12 = vpop.f32.mrf.mxu1 }
 0xa88   : > { %v3723_v32 = vpop.f32.mrf.mxu1 }
 0xa8a   : > { %v3725_v6 = vpop.f32.mrf.mxu1 }
 0xa8b   : > { %v3893_v61 = vpack.c.bf16 %v3725_v6, %v3721_v12 }
 0xa8c   : > { %v3729_v49 = vpop.f32.mrf.mxu1 }
 0xa8e   : > { %v3731_v51 = vpop.f32.mrf.mxu1 }
 0xa90   : > { %v3733_v50 = vpop.f32.mrf.mxu1 }
 0xa91   : > { %v3894_v4 = vpack.c.bf16 %v3733_v50, %v3729_v49 }
 0xa92   : > { %v3735_v58 = vpop.f32.mrf.mxu1 }
 0xa93   : > { %v3895_v14 = vpack.c.bf16 %v3735_v58, %v3731_v51 }
 0xab9   : > { %v3794_v44 = vpop.f32.mrf.mxu1 }
 0xabb   : > { %v3796_v46 = vpop.f32.mrf.mxu1 }
 0xabd   : > { %v3798_v53 = vpop.f32.mrf.mxu1 }
 0xabe   : > { %v3896_v13 = vpack.c.bf16 %v3798_v53, %v3794_v44  ;;  %v277_v53 = vld [vmem:[%s7789_s4] sm:$0xf] }
 0xabf   : > { %v3800_v28 = vpop.f32.mrf.mxu1 }
 0xac0   : > { %v3897_v21 = vpack.c.bf16 %v3800_v28, %v3796_v46 }
 0xac1   : > { %v3804_v37 = vpop.f32.mrf.mxu1 }
 0xac3   : > { %v3806_v34 = vpop.f32.mrf.mxu1 }
 0xac5   : > { %v3808_v59 = vpop.f32.mrf.mxu1 }
 0xac6   : > { %v3898_v60 = vpack.c.bf16 %v3808_v59, %v3804_v37 }
 0xac7   : > { %v3810_v57 = vpop.f32.mrf.mxu1 }
 0xac8   : > { %v3899_v41 = vpack.c.bf16 %v3810_v57, %v3806_v34  ;;  %v278_v34 = vld [vmem:[%s7790_s5] sm:$0xf] }
 0xb0b   : > { %v2162_v33 = vpop.xlane.xlu0 %2161 }
 0xb0c   : > { %v2163_v38 = vrot.slane %v2162_v33, 4 }
 0xb0d   : > { %v2177_v3 = vpop.xlane.xlu1 %2176 }
 0xb0e   : > { %v2164_v55 = vadd.f32 %v2163_v38, %v2162_v33  ;;  %v2178_v2 = vrot.slane %v2177_v3, 4  ;;  %v3892_v33 = vpack.c.bf16 %v3723_v32, %v7686_v54  ;;  %v5528_v54 = vld [vmem:[%s7787_s2] sm:$0x3] }
 0xb10   : > { %v2165_v36 = vrot.slane %v2164_v55, 2  ;;  %v2179_v43 = vadd.f32 %v2178_v2, %v2177_v3 }
 0xb12   : > { %v2180_v47 = vrot.slane %v2179_v43, 2  ;;  %v2166_v1 = vadd.f32 %v2165_v36, %v2164_v55 }
 0xb14   : > { %v2167_v25 = vrot.slane %v2166_v1, 1  ;;  %v2181_v16 = vadd.f32 %v2180_v47, %v2179_v43 }
 0xb16   : > { %v3869_v31 = vpop.f32.mrf.mxu1  ;;  %v2168_v40 = vadd.f32 %v2167_v25, %v2166_v1  ;;  %v2182_v11 = vrot.slane %v2181_v16, 1 }
 0xb18   : > { %4404 = vpush %v2168_v40  ;;  %v3871_v20 = vpop.f32.mrf.mxu1  ;;  %v2183_v8 = vadd.f32 %v2182_v11, %v2181_v16 }
 0xb1a   : > { %4406 = vpush %v2183_v8  ;;  %v3873_v26 = vpop.f32.mrf.mxu1 }
 0xb1b   : > { %v3900_v63 = vpack.c.bf16 %v3873_v26, %v3869_v31 }
 0xb1c   : > { %v3875_v52 = vpop.f32.mrf.mxu1 }
 0xb1d   : > { %v3901_v18 = vpack.c.bf16 %v3875_v52, %v3871_v20 }
 0xb1e   : > { %v3879_v27 = vpop.f32.mrf.mxu1 }
 0xb20   : > { %v3881_v19 = vpop.f32.mrf.mxu1 }
 0xb22   : > { %v3883_v39 = vpop.f32.mrf.mxu1 }
 0xb23   : > { %v3902_v15 = vpack.c.bf16 %v3883_v39, %v3879_v27 }
 0xb24   : > { %v3885_v10 = vpop.f32.mrf.mxu1 }
 0xb25   : > { %v3903_v45 = vpack.c.bf16 %v3885_v10, %v3881_v19 }
 0xb27   : > { %3904 = vmatprep.subr.bf16.mxu0 %v3903_v45 }
 0xb28   : > { %3905 = vmatpush1.bf16.msra.mxu0 %v3902_v15 }
 0xb29   : > { %3906 = vmatprep.subr.bf16.mxu0 %v3901_v18 }
 0xb2c   : > { %3907 = vmatpush1.bf16.msra.mxu0 %v3900_v63 }
 0xb2d   : > { %3908 = vmatprep.subr.bf16.mxu0 %v3899_v41 }
 0xb30   : > { %3909 = vmatpush1.bf16.msra.mxu0 %v3898_v60 }
 0xb31   : > { %3910 = vmatprep.subr.bf16.mxu0 %v3897_v21 }
 0xb34   : > { %3911 = vmatpush1.bf16.msra.mxu0 %v3896_v13 }
 0xb35   : > { %3912 = vmatprep.subr.bf16.mxu0 %v3895_v14 }
 0xb38   : > { %3913 = vmatpush1.bf16.msra.mxu0 %v3894_v4 }
 0xb39   : > { %3914 = vmatprep.subr.bf16.mxu0 %v3893_v61 }
 0xb3c   : > { %3915 = vmatpush1.bf16.msra.mxu0 %v3892_v33 }
 0xb3d   : > { %3916 = vmatprep.subr.bf16.mxu0 %v3891_v23 }
 0xb40   : > { %3917 = vmatpush1.bf16.msra.mxu0 %v3890_v56 }
 0xb41   : > { %3918 = vmatprep.subr.bf16.mxu0 %v3889_v7 }
 0xb44   : > { %3919 = vmatpush1.bf16.msra.mxu0 %v3888_v17 }
 0xb47   : > { %3937 = vmatmul.mubr.bf16.vlgmr.msra.gmra.mxu0 %v5528_v54 }
 0xb49   : > { %s4405_s17 = spop %4404 }
 0xb4a   : > { %v2170_v62 = vstv %s4405_s17  ;;  %s7741_s17 = scalar_lea.hbm %s7791_s6, %s4179_s11 }
 0xb4b   : > { %s4407_s26 = spop %4406  ;;  %v2186_v29 = vmul.f32 0.0009765625, %v2170_v62 }
 0xb4c   : > { %v2185_v23 = vstv %s4407_s26  ;;  %s4003_s26 = scalar_lea.sflag [#allocation4], %s5763_s29 }
 0xb4d   : > { %v2188_v48 = vmul.f32 %v2186_v29, %v2186_v29  ;;  %v2187_v9 = vmul.f32 0.0009765625, %v2185_v23 }
 0xb4f   : > { %v2189_v56 = vsub.f32 %v2187_v9, %v2188_v48 }
 0xb51   : > { %v2190_v12 = vadd.f32 1e-05, %v2189_v56 }
 0xb53   : > { %5524 = vrsqrt.f32 %v2190_v12 }
 0xc07   : > { %v3938_v35 = vpop.f32.mrf.mxu0 }
 0xc08   : > { %v7705_v30 = vadd.f32 %v3938_v35, %v7666_v42 }
 0xc09   : > { %v3940_v5 = vpop.f32.mrf.mxu0 }
 0xc0a   : > { %v3958_v0 = vmul.f32 %v7705_v30, %v7705_v30  ;;  %v7710_v17 = vadd.f32 %v3940_v5, %v7666_v42  ;;  %v3945_v6 = vsel %vm2157_vm3, %v7705_v30, 0.0  ;;  %v5525_v42 = vpop.eup %5524 }
 0xc0b   : > { %v3942_v7 = vpop.f32.mrf.mxu0  ;;  %v2192_v28 = vmul.f32 %v5525_v42, %v277_v53 }
 0xc0c   : > { %v3959_v32 = vmul.f32 %v7710_v17, %v7710_v17  ;;  %v3946_v49 = vsel %vm2157_vm3, %v7710_v17, 0.0  ;;  %v3960_v58 = vsel %vm2157_vm3, %v3958_v0, 0.0 }
 0xc0d   : > { %v3947_v51 = vadd.f32 %v3946_v49, %v3945_v6  ;;  %v3943_v50 = vpop.f32.mrf.mxu0  ;;  %v2200_v37 = vmul.f32 %v2192_v28, %v2186_v29 }
 0xc0e   : > { %v3961_v44 = vsel %vm2157_vm3, %v3959_v32, 0.0 }
 0xc0f   : > { %3948 = vadd.xlane.f32.xlu0 %v3947_v51  ;;  %v3962_v46 = vadd.f32 %v3961_v44, %v3960_v58  ;;  %v2201_v38 = vsub.f32 %v278_v34, %v2200_v37 }
 0xc11   : > { %3963 = vadd.xlane.f32.xlu1 %v3962_v46 }
 0xc22   : > { %2204 = vperm.xlu1 %5170, %v2201_v38  }
 0xc25   : > { %2195 = vperm.xlu0 %5169, %v2192_v28  }
 0xc98   : > { %v3949_v3 = vpop.xlane.xlu0 %3948 }
 0xc99   : > { %v3950_v55 = vrot.slane %v3949_v3, 4 }
 0xc9a   : > { %v3964_v2 = vpop.xlane.xlu1 %3963 }
 0xc9b   : > { %v3951_v36 = vadd.f32 %v3950_v55, %v3949_v3  ;;  %v3965_v59 = vrot.slane %v3964_v2, 4 }
 0xc9d   : > { %v3952_v43 = vrot.slane %v3951_v36, 2  ;;  %v3966_v47 = vadd.f32 %v3965_v59, %v3964_v2 }
 0xc9e   : > { %v2205_v20 = vpop.permute.xlu1 %2204 }
 0xc9f   : > { %v3967_v1 = vrot.slane %v3966_v47, 2  ;;  %v3953_v57 = vadd.f32 %v3952_v43, %v3951_v36 }
 0xca0   : > { %v2196_v25 = vpop.permute.xlu0 %2195 }
 0xca1   : > { %v2198_v16 = vmul.f32 %v2196_v25, %v7670_v24  ;;  %v2199_v31 = vmul.f32 %v2196_v25, %v7674_v22  ;;  %v3954_v40 = vrot.slane %v3953_v57, 1  ;;  %v3968_v11 = vadd.f32 %v3967_v1, %v3966_v47 }
 0xca3   : > { %v2207_v8 = vadd.f32 %v2205_v20, %v2198_v16  ;;  %v2208_v26 = vadd.f32 %v2205_v20, %v2199_v31  ;;  %v3955_v52 = vadd.f32 %v3954_v40, %v3953_v57  ;;  %v3969_v27 = vrot.slane %v3968_v11, 1 }
 0xca5   : > { %v2211_v19 = vcombine.low %v2207_v8, %v2208_v26  ;;  %4408 = vpush %v3955_v52  ;;  %v3970_v39 = vadd.f32 %v3969_v27, %v3968_v11 }
 0xca7   : > { %2213 = vst [vmem:[%s7729_s18] sm:$0xff] %v2211_v19  ;;  %4410 = vpush %v3970_v39 }
 0xcd6   : > { %s4409_s8 = spop %4408 }
 0xcd7   : > { %v3957_v10 = vstv %s4409_s8 }
 0xcd8   : > { %v3973_v24 = vmul.f32 0.0009765625, %v3957_v10  ;;  %s4411_s19 = spop %4410 }
 0xcd9   : > { %v3972_v22 = vstv %s4411_s19 }
 0xcda   : > { %v3975_v45 = vmul.f32 %v3973_v24, %v3973_v24  ;;  %v3974_v15 = vmul.f32 0.0009765625, %v3972_v22 }
 0xcdc   : > { %v3976_v18 = vsub.f32 %v3974_v15, %v3975_v45 }
 0xcde   : > { %v3977_v63 = vadd.f32 1e-05, %v3976_v18 }
 0xce0   : > { %5526 = vrsqrt.f32 %v3977_v63 }
 0xced   : > { %v5527_v41 = vpop.eup %5526 }
 0xcee   : > { %v3979_v60 = vmul.f32 %v5527_v41, %v277_v53 }
 0xcf0   : > { %3982 = vperm.xlu1 %5170, %v3979_v60   ;;  %v3987_v21 = vmul.f32 %v3979_v60, %v3973_v24 }
 0xcf2   : > { %v3988_v13 = vsub.f32 %v278_v34, %v3987_v21 }
 0xcf4   : > { %3991 = vperm.xlu1 %5170, %v3988_v13  }
 0xd6b   : > { %v3983_v14 = vpop.permute.xlu1 %3982 }
 0xd6c   : > { %v3985_v4 = vmul.f32 %v3983_v14, %v7705_v30  ;;  %v3986_v61 = vmul.f32 %v3983_v14, %v7710_v17 }
 0xd6f   : > { %v3992_v33 = vpop.permute.xlu1 %3991 }
 0xd70   : > { %v3994_v54 = vadd.f32 %v3992_v33, %v3985_v4  ;;  %v3995_v62 = vadd.f32 %v3992_v33, %v3986_v61 }
 0xd72   : > { %v3998_v29 = vcombine.low %v3994_v54, %v3995_v62 }
 0xd74   : > { %4169 = vst [vmem:[%s7729_s18 + $0x8] sm:$0xff] %v3998_v29 }
 0xd75   : > { %5570 = shalt.err (!%p5567_p10)
}
 0xd76   : > { %s5571_s13 = scalar_lea.hbm %s7741_s17, 256  ;;  %s5575_s8 = scalar_lea.hbm %s7791_s6, 512 }
 0xd77   : > { %p5572_p0 = scmp.ne.s32.totalorder %s7741_s17, %s5571_s13  ;;  %p5576_p1 = scmp.lt.s32.totalorder %s7741_s17, %s7791_s6 }
 0xd78   : > { %p5577_p3 = scmp.lt.s32.totalorder %s5575_s8, %s5571_s13 }
 0xd79   : > { %p5573_p2 = pnand %p5572_p0, %p8190_p12 }
 0xd7a   : > { %p5578_p6 = por %p5577_p3, %p5576_p1 }
 0xd7b   : > { %p5574_p9 = pneg %p5573_p2 }
 0xd7d   : > { %p5579_p11 = pnand %p5578_p6, %p5574_p9 }
 0xd7f   : > { %5582 = shalt.err (!%p5579_p11)
}
 0xd80   : > { %s5629_s14 = smov 128   ;;  %s5630_s15 = smov 8  }
 0xd81   : > { %4414 = dma.vmem_to_hbm [thread:$0]  (%p8190_p12), %s7736_s20, 256, %s7741_s17, %s4003_s26, %s5629_s14, %s5629_s14, %s5630_s15  }
 0xd82 PF: > { %s4032_s28 = sand.u32 1, %s5609_s21   ;;  %p8191_p13 = scmp.ne.s32.totalorder %s7915_s10, 0 }
 0xd83   : > { %p8192_p4 = scmp.ge.s32.totalorder %s5621_s24, 2  ;;  %s4033_s25 = scalar_lea.sflag [#allocation4], %s4032_s28 }
 0xd85   : > { %p4421_p5 = pnand %p8192_p4, %p8191_p13 }
 0xd87   : > { %p4422_p7 = pneg %p4421_p5 }
 0xd89   : > { %5604 = dma.done.wait (%p4422_p7), %s4033_s25, 256  }
 0xd8a   : > { %5606 = vsyncadd (%p4422_p7), %s4033_s25, 4294967040  ;;  %p19_p8 = scmp.ge.s32.totalorder %s5691_s27, 4   ;;  %s8193_s21 = smov %s5613_s22 }
 0xd8b   : > { %s8194_s22 = smov %s5617_s23  ;;  %s8195_s23 = smov %s5703_s30 }
 0xd8c   : > { %s8196_s24 = smov %s5691_s27  ;;  %21 = sbr.rel (!%p19_p8) target bundleno = 5 (0x5), region = 91 }
 0xd91   :  { %4038 = vsyncpa [#allocation3], 1 }
 0xd92   :  { %4040 = vsyncpa [#allocation3 + $0x1], 1 }
 0xd93   :  { %4041 = vsyncpa [#allocation4], 1 }
 0xd94   :  { %4043 = vsyncpa [#allocation4 + $0x1], 1 }

</bundles_post_ra>
